<compile_context>
chip_gen: v7x
topology: tpu7x:2x2x1
jax: 0.10.0
libtpu: 0.0.40
codegen_flags: <defaults>
</compile_context>

<pallas_src>
import math
import numpy as np
import jax
import jax.numpy as jnp
from jax.experimental import pallas as pl
from jax.experimental.pallas import tpu as pltpu


# Set to jnp.bfloat16 on v6e/v7x for ~3x MXU throughput (inputs only; the
# accumulation stays f32).  Kept f32 here so the output matches the f32
# reference tightly (exp() amplifies bf16 score error).
MATMUL_DTYPE = jnp.float32


def exphormer_attn_kernel(cnt_ref, sidx_ref,          # scalar-prefetch (SMEM)
                          q_ref, k_ref, v_ref, adj_ref,
                          out_ref,
                          wv_acc, z_acc):
    """One (dest-tile i, nonzero-src-tile slot j) step, all heads at once."""
    j = pl.program_id(1)

    @pl.when(j == 0)
    def _init():
        wv_acc[...] = jnp.zeros_like(wv_acc)
        z_acc[...] = jnp.zeros_like(z_acc)

    # Only accumulate for real (nonzero) src tiles of this dest tile.
    @pl.when(j < cnt_ref[pl.program_id(0)])
    def _accumulate():
        q = q_ref[...].astype(MATMUL_DTYPE)            # [H, Td, Dh] (pre-scaled by 1/sqrt(Dh))
        k = k_ref[...].astype(MATMUL_DTYPE)            # [H, Ts, Dh]
        v = v_ref[...].astype(MATMUL_DTYPE)            # [H, Ts, Dh]
        adj = adj_ref[...].astype(jnp.float32)         # [Td, Ts] edge counts

        # score[h, d, s] = exp(clamp(Q[h,d] . K[h,s], -5, 5)) * #edges(s->d)
        s = jnp.einsum('hde,hse->hds', q, k,
                       preferred_element_type=jnp.float32)      # [H, Td, Ts]
        p = jnp.exp(jnp.clip(s, -5.0, 5.0)) * adj[None, :, :]

        z_acc[...] += jnp.sum(p, axis=-1, keepdims=True)         # [H, Td, 1]
        wv_acc[...] += jnp.einsum('hds,hse->hde',
                                  p.astype(MATMUL_DTYPE), v,
                                  preferred_element_type=jnp.float32)

    @pl.when(j == pl.num_programs(1) - 1)
    def _finalize():
        inv = pl.reciprocal(z_acc[...] + 1e-6, approx=True)      # EUP reciprocal
        out_ref[...] = (wv_acc[...] * inv).astype(out_ref.dtype)


def _round_up(a, b):
    return -(-a // b) * b


def _choose_tile(n, tile):
    """Pick a tile size satisfying Mosaic's (8,128) block constraints."""
    if tile >= n:
        t = max(_round_up(n, 8), 8)          # single tile == (padded) full extent
    else:
        t = max(128, (tile // 128) * 128)    # lane-aligned multiple of 128
    return _round_up(n, t), t


def exphormer_attention(x, edge_index, Wq, bq, Wk, bk, Wv, bv,
                        num_heads, out_dim_total, tile=256):
    """Forward pass of ExphormerAttention (use_virt_nodes=False).

    x:          [N, in_dim] float32
    edge_index: [2, E] int32, row 0 = src, row 1 = dest.  Must be concrete
                (host-visible): it builds the block-sparse tile schedule and
                sizes the grid.
    W*:         [in_dim, H*Dh], b*: [H*Dh]
    tile:       node tile size (256 is a safe default for v5e/v6e/v7x VMEM;
                512 is fine on v5e/v6e for large N).
    Returns [N, H*Dh].
    """
    N, in_dim = x.shape
    H = num_heads
    Dh = out_dim_total // H

    N_pad, T = _choose_tile(N, tile)
    n_t = N_pad // T

    # ---- Fused, full-MXU-width Q/K/V projection (XLA glue, one wide matmul).
    # The 1/sqrt(Dh) score scale is folded into the Q weights/bias.
    scale = 1.0 / math.sqrt(Dh)
    W = jnp.concatenate([Wq * scale, Wk, Wv], axis=1)            # [in_dim, 3*H*Dh]
    B = jnp.concatenate([bq * scale, bk, bv], axis=0)            # [3*H*Dh]
    x_pad = jnp.pad(x, ((0, N_pad - N), (0, 0)))
    qkv = jnp.dot(x_pad, W, preferred_element_type=jnp.float32) + B
    q, k, v = jnp.split(qkv, 3, axis=1)
    heads = lambda t: jnp.transpose(t.reshape(N_pad, H, Dh), (1, 0, 2))  # [H, N_pad, Dh]
    q, k, v = heads(q), heads(k), heads(v)

    # ---- Dense adjacency counts, bf16 (exact small integers, half the bytes).
    # adj[d, s] = number of edges s -> d  (padded rows/cols stay zero).
    src = edge_index[0].astype(jnp.int32)
    dst = edge_index[1].astype(jnp.int32)
    adj = (jnp.zeros((N_pad, N_pad), jnp.float32)
           .at[dst, src].add(1.0)
           .astype(jnp.bfloat16))

    # ---- Block-sparse tile schedule (scalar-prefetched into SMEM):
    # for each dest tile, the compacted list of src tiles containing >=1 edge.
    dst_t = dst // T
    src_t = src // T
    has = jnp.zeros((n_t, n_t), jnp.bool_).at[dst_t, src_t].set(True)
    cnt = jnp.sum(has, axis=1).astype(jnp.int32)                          # [n_t]
    order = jnp.argsort(jnp.logical_not(has), axis=1, stable=True)        # nonzero tiles first
    max_nnz = max(int(jax.device_get(jnp.max(cnt))), 1)                   # host-side grid sizing
    sidx = order[:, :max_nnz].astype(jnp.int32)                           # [n_t, max_nnz]

    q_spec = pl.BlockSpec((H, T, Dh), lambda i, j, cnt_ref, sidx_ref: (0, i, 0))
    kv_spec = pl.BlockSpec((H, T, Dh), lambda i, j, cnt_ref, sidx_ref: (0, sidx_ref[i, j], 0))
    adj_spec = pl.BlockSpec((T, T), lambda i, j, cnt_ref, sidx_ref: (i, sidx_ref[i, j]))
    out_spec = pl.BlockSpec((H, T, Dh), lambda i, j, cnt_ref, sidx_ref: (0, i, 0))

    out = pl.pallas_call(
        exphormer_attn_kernel,
        out_shape=jax.ShapeDtypeStruct((H, N_pad, Dh), jnp.float32),
        grid_spec=pltpu.PrefetchScalarGridSpec(
            num_scalar_prefetch=2,
            grid=(n_t, max_nnz),
            in_specs=[q_spec, kv_spec, kv_spec, adj_spec],
            out_specs=out_spec,
            scratch_shapes=[pltpu.VMEM((H, T, Dh), jnp.float32),   # wV accumulator
                            pltpu.VMEM((H, T, 1), jnp.float32)],   # Z  accumulator
        ),
        compiler_params=pltpu.CompilerParams(
            dimension_semantics=("parallel", "arbitrary"),
            vmem_limit_bytes=64 * 1024 * 1024,
        ),
    )(cnt, sidx, q, k, v, adj)

    # [H, N_pad, Dh] -> [N, H*Dh]  (matches torch .view(-1, out_dim*num_heads))
    return jnp.transpose(out, (1, 0, 2)).reshape(N_pad, H * Dh)[:N]


def reference(x, edge_index, Wq, bq, Wk, bk, Wv, bv, num_heads, out_dim_total):
    """Pure-JAX port of the PyTorch forward (scatter-add form)."""
    N, _ = x.shape
    H = num_heads
    Dh = out_dim_total // H
    Q = (x @ Wq + bq).reshape(N, H, Dh)
    K = (x @ Wk + bk).reshape(N, H, Dh)
    V = (x @ Wv + bv).reshape(N, H, Dh)
    src = edge_index[0]
    dst = edge_index[1]
    score = jnp.sum(K[src] * Q[dst] / math.sqrt(Dh), axis=-1, keepdims=True)
    score = jnp.exp(jnp.clip(score, -5.0, 5.0))          # [E, H, 1]
    msg = V[src] * score                                 # [E, H, Dh]
    wV = jnp.zeros_like(V).at[dst].add(msg)
    Z = jnp.zeros((N, H, 1), jnp.float32).at[dst].add(score)
    return (wV / (Z + 1e-6)).reshape(N, H * Dh)


if __name__ == "__main__":
    # Small deterministic problem.  N=200 is not a tile multiple, so padding,
    # multi-tile accumulation and the block-sparse schedule are all exercised
    # (tile=128 -> 2x2 node tiles).
    N, in_dim, H, out_dim_total = 200, 64, 4, 64
    E = 800
    use_bias = True  # ExphormerAttention(use_bias=True)

    key = jax.random.PRNGKey(0)
    kx, ke1, ke2, kq, kk, kv, kbq, kbk, kbv = jax.random.split(key, 9)

    x = jax.random.normal(kx, (N, in_dim), jnp.float32)
    edge_index = jnp.stack([
        jax.random.randint(ke1, (E,), 0, N, jnp.int32),   # src
        jax.random.randint(ke2, (E,), 0, N, jnp.int32),   # dest
    ], axis=0)

    scale = 1.0 / math.sqrt(in_dim)
    Wq = jax.random.uniform(kq, (in_dim, out_dim_total), jnp.float32, -scale, scale)
    Wk = jax.random.uniform(kk, (in_dim, out_dim_total), jnp.float32, -scale, scale)
    Wv = jax.random.uniform(kv, (in_dim, out_dim_total), jnp.float32, -scale, scale)
    if use_bias:
        bq = jax.random.uniform(kbq, (out_dim_total,), jnp.float32, -scale, scale)
        bk = jax.random.uniform(kbk, (out_dim_total,), jnp.float32, -scale, scale)
        bv = jax.random.uniform(kbv, (out_dim_total,), jnp.float32, -scale, scale)
    else:
        bq = bk = bv = jnp.zeros((out_dim_total,), jnp.float32)
    # NOTE: the module's self.E linear is never used in forward(), so it is omitted.

    out = exphormer_attention(x, edge_index, Wq, bq, Wk, bk, Wv, bv,
                              H, out_dim_total, tile=128)
    out = jax.block_until_ready(out)

    ref = reference(x, edge_index, Wq, bq, Wk, bk, Wv, bv, H, out_dim_total)
    out_np, ref_np = np.asarray(out), np.asarray(ref)
    # Tolerance covers the approximate (EUP) reciprocal used for 1/(Z+1e-6);
    # everything else is f32-exact up to summation order.
    if not np.allclose(out_np, ref_np, rtol=2e-3, atol=2e-3):
        raise AssertionError(
            "Pallas kernel does not match reference; max abs err = %g"
            % float(np.max(np.abs(out_np - ref_np))))

    print("KERNEL_OK")
</pallas_src>

<mosaic_0001>
module attributes {stable_mosaic.version = 11 : i64} {
  func.func @exphormer_attn_kernel(%arg0: i32, %arg1: i32, %arg2: memref<2xi32, #tpu.memory_space<smem>>, %arg3: memref<2x2xi32, #tpu.memory_space<smem>>, %arg4: memref<4x128x16xf32, #tpu.memory_space<vmem>>, %arg5: memref<4x128x16xf32, #tpu.memory_space<vmem>>, %arg6: memref<4x128x16xf32, #tpu.memory_space<vmem>>, %arg7: memref<128x128xbf16, #tpu.memory_space<vmem>>, %arg8: memref<4x128x16xf32, #tpu.memory_space<vmem>>, %arg9: memref<4x128x16xf32, #tpu.memory_space<vmem>>, %arg10: memref<4x128x1xf32, #tpu.memory_space<vmem>>) attributes {dimension_semantics = [#tpu.dimension_semantics<parallel>, #tpu.dimension_semantics<arbitrary>], iteration_bounds = array<i64: 2, 2>, scalar_prefetch = 2 : i64, scratch_operands = 2 : i64, tpu.core_type = #tpu.core_type<tc>, window_params = [{transform_indices = @transform_0, window_bounds = array<i64: 4, 128, 16>}, {transform_indices = @transform_1, window_bounds = array<i64: 4, 128, 16>}, {transform_indices = @transform_2, window_bounds = array<i64: 4, 128, 16>}, {transform_indices = @transform_3, window_bounds = array<i64: 128, 128>}, {transform_indices = @transform_4, window_bounds = array<i64: 4, 128, 16>}]} {
    %c0_i32 = arith.constant 0 : i32
    %0 = arith.cmpi eq, %arg1, %c0_i32 : i32
    %1 = arith.extui %0 : i1 to i32
    %c0_i32_0 = arith.constant 0 : i32
    %2 = arith.cmpi ne, %1, %c0_i32_0 : i32
    scf.if %2 {
      %cst = arith.constant 0.000000e+00 : f32
      %11 = vector.broadcast %cst : f32 to vector<4x128x16xf32>
      %c0 = arith.constant 0 : index
      %c0_3 = arith.constant 0 : index
      %c0_4 = arith.constant 0 : index
      %12 = vector.load %arg9[%c0, %c0_3, %c0_4] : memref<4x128x16xf32, #tpu.memory_space<vmem>>, vector<4x128x16xf32>
      tpu.vector_store %arg9[%c0, %c0_3, %c0_4], %11 {strides = array<i32>} : memref<4x128x16xf32, #tpu.memory_space<vmem>>, vector<4x128x16xf32>,
      %cst_5 = arith.constant 0.000000e+00 : f32
      %13 = vector.broadcast %cst_5 : f32 to vector<4x128x1xf32>
      %c0_6 = arith.constant 0 : index
      %c0_7 = arith.constant 0 : index
      %c0_8 = arith.constant 0 : index
      %14 = vector.load %arg10[%c0_6, %c0_7, %c0_8] : memref<4x128x1xf32, #tpu.memory_space<vmem>>, vector<4x128x1xf32>
      tpu.vector_store %arg10[%c0_6, %c0_7, %c0_8], %13 {strides = array<i32>} : memref<4x128x1xf32, #tpu.memory_space<vmem>>, vector<4x128x1xf32>,
    } else {
    }
    %3 = arith.index_cast %arg0 : i32 to index
    %4 = memref.load %arg2[%3] : memref<2xi32, #tpu.memory_space<smem>>
    %5 = arith.cmpi slt, %arg1, %4 : i32
    %6 = arith.extui %5 : i1 to i32
    %c0_i32_1 = arith.constant 0 : i32
    %7 = arith.cmpi ne, %6, %c0_i32_1 : i32
    scf.if %7 {
      %c0 = arith.constant 0 : index
      %c0_3 = arith.constant 0 : index
      %c0_4 = arith.constant 0 : index
      %11 = vector.load %arg4[%c0, %c0_3, %c0_4] : memref<4x128x16xf32, #tpu.memory_space<vmem>>, vector<4x128x16xf32>
      %c0_5 = arith.constant 0 : index
      %c0_6 = arith.constant 0 : index
      %c0_7 = arith.constant 0 : index
      %12 = vector.load %arg5[%c0_5, %c0_6, %c0_7] : memref<4x128x16xf32, #tpu.memory_space<vmem>>, vector<4x128x16xf32>
      %c0_8 = arith.constant 0 : index
      %c0_9 = arith.constant 0 : index
      %c0_10 = arith.constant 0 : index
      %13 = vector.load %arg6[%c0_8, %c0_9, %c0_10] : memref<4x128x16xf32, #tpu.memory_space<vmem>>, vector<4x128x16xf32>
      %c0_11 = arith.constant 0 : index
      %c0_12 = arith.constant 0 : index
      %14 = vector.load %arg7[%c0_11, %c0_12] : memref<128x128xbf16, #tpu.memory_space<vmem>>, vector<128x128xbf16>
      %15 = arith.extf %14 : vector<128x128xbf16> to vector<128x128xf32>
      "tpu.trace_start"() <{level = 10 : i32, message = "hde,hse->hds"}> : () -> ()
      %cst = arith.constant dense<0.000000e+00> : vector<4x128x128xf32>
      %16 = tpu.matmul %11, %12, %cst {dimension_numbers = #tpu.dot_dimension_numbers<[2], [2], [1], [1], [0, 0, 0, 1, 1, 1], [0], [0]>} : vector<4x128x16xf32>, vector<4x128x16xf32>, vector<4x128x128xf32> -> vector<4x128x128xf32>
      %cst_13 = arith.constant -5.000000e+00 : f32
      %cst_14 = arith.constant 5.000000e+00 : f32
      "tpu.trace_stop"() : () -> ()
      %17 = vector.broadcast %cst_13 : f32 to vector<4x128x128xf32>
      %18 = arith.maximumf %17, %16 : vector<4x128x128xf32>
      %19 = vector.broadcast %cst_14 : f32 to vector<4x128x128xf32>
      %20 = arith.minimumf %19, %18 : vector<4x128x128xf32>
      %21 = math.exp %20 : vector<4x128x128xf32>
      %22 = vector.shape_cast %15 : vector<128x128xf32> to vector<1x128x128xf32>
      %23 = vector.broadcast %22 : vector<1x128x128xf32> to vector<4x128x128xf32>
      %24 = arith.mulf %21, %23 : vector<4x128x128xf32>
      %c0_15 = arith.constant 0 : index
      %c0_16 = arith.constant 0 : index
      %c0_17 = arith.constant 0 : index
      %25 = vector.load %arg10[%c0_15, %c0_16, %c0_17] : memref<4x128x1xf32, #tpu.memory_space<vmem>>, vector<4x128x1xf32>
      %cst_18 = arith.constant dense<0.000000e+00> : vector<4x128xf32>
      %26 = vector.multi_reduction <add>, %24, %cst_18 [2] : vector<4x128x128xf32> to vector<4x128xf32>
      %27 = vector.shape_cast %26 : vector<4x128xf32> to vector<4x128x1xf32>
      %28 = arith.addf %25, %27 : vector<4x128x1xf32>
      %c0_19 = arith.constant 0 : index
      %c0_20 = arith.constant 0 : index
      %c0_21 = arith.constant 0 : index
      %29 = vector.load %arg10[%c0_19, %c0_20, %c0_21] : memref<4x128x1xf32, #tpu.memory_space<vmem>>, vector<4x128x1xf32>
      tpu.vector_store %arg10[%c0_19, %c0_20, %c0_21], %28 {strides = array<i32>} : memref<4x128x1xf32, #tpu.memory_space<vmem>>, vector<4x128x1xf32>,
      %c0_22 = arith.constant 0 : index
      %c0_23 = arith.constant 0 : index
      %c0_24 = arith.constant 0 : index
      %30 = vector.load %arg9[%c0_22, %c0_23, %c0_24] : memref<4x128x16xf32, #tpu.memory_space<vmem>>, vector<4x128x16xf32>
      "tpu.trace_start"() <{level = 10 : i32, message = "hds,hse->hde"}> : () -> ()
      %cst_25 = arith.constant dense<0.000000e+00> : vector<4x128x16xf32>
      %31 = tpu.matmul %24, %13, %cst_25 {dimension_numbers = #tpu.dot_dimension_numbers<[2], [1], [1], [2], [0, 0, 0, 1, 1, 2], [0], [0]>} : vector<4x128x128xf32>, vector<4x128x16xf32>, vector<4x128x16xf32> -> vector<4x128x16xf32>
      "tpu.trace_stop"() : () -> ()
      %32 = arith.addf %30, %31 : vector<4x128x16xf32>
      %c0_26 = arith.constant 0 : index
      %c0_27 = arith.constant 0 : index
      %c0_28 = arith.constant 0 : index
      %33 = vector.load %arg9[%c0_26, %c0_27, %c0_28] : memref<4x128x16xf32, #tpu.memory_space<vmem>>, vector<4x128x16xf32>
      tpu.vector_store %arg9[%c0_26, %c0_27, %c0_28], %32 {strides = array<i32>} : memref<4x128x16xf32, #tpu.memory_space<vmem>>, vector<4x128x16xf32>,
    } else {
    }
    %c1_i32 = arith.constant 1 : i32
    %8 = arith.cmpi eq, %arg1, %c1_i32 : i32
    %9 = arith.extui %8 : i1 to i32
    %c0_i32_2 = arith.constant 0 : i32
    %10 = arith.cmpi ne, %9, %c0_i32_2 : i32
    scf.if %10 {
      %c0 = arith.constant 0 : index
      %c0_3 = arith.constant 0 : index
      %c0_4 = arith.constant 0 : index
      %11 = vector.load %arg10[%c0, %c0_3, %c0_4] : memref<4x128x1xf32, #tpu.memory_space<vmem>>, vector<4x128x1xf32>
      %cst = arith.constant 9.99999997E-7 : f32
      %12 = vector.broadcast %cst : f32 to vector<4x128x1xf32>
      %13 = arith.addf %11, %12 : vector<4x128x1xf32>
      %14 = tpu.reciprocal %13 {approx = true} : vector<4x128x1xf32> -> vector<4x128x1xf32>
      %c0_5 = arith.constant 0 : index
      %c0_6 = arith.constant 0 : index
      %c0_7 = arith.constant 0 : index
      %15 = vector.load %arg9[%c0_5, %c0_6, %c0_7] : memref<4x128x16xf32, #tpu.memory_space<vmem>>, vector<4x128x16xf32>
      %16 = vector.broadcast %14 : vector<4x128x1xf32> to vector<4x128x16xf32>
      %17 = arith.mulf %15, %16 : vector<4x128x16xf32>
      %c0_8 = arith.constant 0 : index
      %c0_9 = arith.constant 0 : index
      %c0_10 = arith.constant 0 : index
      %18 = vector.load %arg8[%c0_8, %c0_9, %c0_10] : memref<4x128x16xf32, #tpu.memory_space<vmem>>, vector<4x128x16xf32>
      tpu.vector_store %arg8[%c0_8, %c0_9, %c0_10], %17 {strides = array<i32>} : memref<4x128x16xf32, #tpu.memory_space<vmem>>, vector<4x128x16xf32>,
    } else {
    }
    return
  }
  func.func @transform_0(%arg0: i32, %arg1: i32, %arg2: memref<2xi32, #tpu.memory_space<smem>>, %arg3: memref<2x2xi32, #tpu.memory_space<smem>>) -> (i32, i32, i32) {
    %c0_i32 = arith.constant 0 : i32
    %c0_i32_0 = arith.constant 0 : i32
    %c0_i32_1 = arith.constant 0 : i32
    return %c0_i32, %arg0, %c0_i32_0 : i32, i32, i32
  }
  func.func @transform_1(%arg0: i32, %arg1: i32, %arg2: memref<2xi32, #tpu.memory_space<smem>>, %arg3: memref<2x2xi32, #tpu.memory_space<smem>>) -> (i32, i32, i32) {
    %0 = arith.index_cast %arg0 : i32 to index
    %1 = arith.index_cast %arg1 : i32 to index
    %2 = memref.load %arg3[%0, %1] : memref<2x2xi32, #tpu.memory_space<smem>>
    %c0_i32 = arith.constant 0 : i32
    %c0_i32_0 = arith.constant 0 : i32
    %c0_i32_1 = arith.constant 0 : i32
    return %c0_i32, %2, %c0_i32_0 : i32, i32, i32
  }
  func.func @transform_2(%arg0: i32, %arg1: i32, %arg2: memref<2xi32, #tpu.memory_space<smem>>, %arg3: memref<2x2xi32, #tpu.memory_space<smem>>) -> (i32, i32, i32) {
    %0 = arith.index_cast %arg0 : i32 to index
    %1 = arith.index_cast %arg1 : i32 to index
    %2 = memref.load %arg3[%0, %1] : memref<2x2xi32, #tpu.memory_space<smem>>
    %c0_i32 = arith.constant 0 : i32
    %c0_i32_0 = arith.constant 0 : i32
    %c0_i32_1 = arith.constant 0 : i32
    return %c0_i32, %2, %c0_i32_0 : i32, i32, i32
  }
  func.func @transform_3(%arg0: i32, %arg1: i32, %arg2: memref<2xi32, #tpu.memory_space<smem>>, %arg3: memref<2x2xi32, #tpu.memory_space<smem>>) -> (i32, i32) {
    %0 = arith.index_cast %arg0 : i32 to index
    %1 = arith.index_cast %arg1 : i32 to index
    %2 = memref.load %arg3[%0, %1] : memref<2x2xi32, #tpu.memory_space<smem>>
    %c0_i32 = arith.constant 0 : i32
    return %arg0, %2 : i32, i32
  }
  func.func @transform_4(%arg0: i32, %arg1: i32, %arg2: memref<2xi32, #tpu.memory_space<smem>>, %arg3: memref<2x2xi32, #tpu.memory_space<smem>>) -> (i32, i32, i32) {
    %c0_i32 = arith.constant 0 : i32
    %c0_i32_0 = arith.constant 0 : i32
    %c0_i32_1 = arith.constant 0 : i32
    return %c0_i32, %arg0, %c0_i32_0 : i32, i32, i32
  }
}

</mosaic_0001>

<bundles_post_ra>
// kernel: tpu_custom_call.1
= control target key start
LH: loop header
LB: loop body
LE: loop exit
PB: predicated region body
PF: predicated region fallthrough
CT: control target
= control target key end

     0   :  { %s7832_s0 = inlined_call_operand.hbm [shape: s32[2], index: 0, kind: input, shape index: {}]   ;;  %s7833_s2 = inlined_call_operand.hbm [shape: f32[4,256,16], index: 2, kind: input, shape index: {}]   ;;  %s7834_s3 = inlined_call_operand.hbm [shape: f32[4,256,16], index: 3, kind: input, shape index: {}]   ;;  %s7835_s4 = inlined_call_operand.hbm [shape: f32[4,256,16], index: 4, kind: input, shape index: {}]   ;;  %s7836_s5 = inlined_call_operand.hbm [shape: bf16[256,256], index: 5, kind: input, shape index: {}]   ;;  %s7837_s6 = inlined_call_operand.hbm [shape: f32[4,256,16], index: 6, kind: output, shape index: {}]   ;;  %s7838_s1 = inlined_call_operand.hbm [shape: s32[2,2], index: 1, kind: input, shape index: {}]  }
   0x1   :  { %7859 = sst [smem:[#allocation52_spill]] %s7833_s2  ;;  %s5958_s23 = scalar_lea.hbm %s7832_s0, 16 }
   0x2   :  { %7860 = sst [smem:[#allocation53_spill]] %s7834_s3  ;;  %p5959_p0 = scmp.ne.s32.totalorder %s7832_s0, %s5958_s23 }
   0x3   :  { %7861 = sst [smem:[#allocation54_spill]] %s7835_s4  ;;  %p5962_p1 = scmp.lt.u32.totalorder %s5958_s23, %s7832_s0 }
   0x4   :  { %7862 = sst [smem:[#allocation55_spill]] %s7836_s5 }
   0x5   :  { %7863 = sst [smem:[#allocation56_spill]] %s7837_s6  ;;  %p5964_p2 = pnand %p5962_p1, %p5959_p0 }
   0x7   :  { %5967 = shalt.err (!%p5964_p2)  }
   0x8   :  { %s6164_s28 = smov [#allocation5]   ;;  %s5968_s9 = scalar_lea.hbm %s7838_s1, 32 }
   0x9   :  { %12 = dma.hbm_to_smem %s7832_s0, 16, %s6164_s28, [#allocation4] }
   0xa   :  { %p5969_p3 = scmp.ne.s32.totalorder %s7838_s1, %s5968_s9  ;;  %p5972_p4 = scmp.lt.u32.totalorder %s5968_s9, %s7838_s1 }
   0xc   :  { %p5974_p5 = pnand %p5972_p4, %p5969_p3 }
   0xe   :  { %5977 = shalt.err (!%p5974_p5)  }
   0xf   :  { %s6165_s14 = smov [#allocation6]  }
  0x10   :  { %14 = dma.hbm_to_smem %s7838_s1, 32, %s6165_s14, [#allocation4] }
  0x11   :  { %6074 = dma.done.wait [#allocation4], 48 }
  0x12   :  { %6075 = vsyncadd [#allocation4], 4294967248 }
  0x13   :  { %16 = sfence }
  0x14   :  { %17 = vsyncpa [#allocation8], 0 }
  0x15   :  { %19 = vsyncpa [#allocation8 + $0x1], 0 }
  0x16   :  { %20 = vsyncpa [#allocation11], 0 }
  0x17   :  { %22 = vsyncpa [#allocation11 + $0x1], 0 }
  0x18   :  { %23 = vsyncpa [#allocation14], 0 }
  0x19   :  { %25 = vsyncpa [#allocation14 + $0x1], 0 }
  0x1a   :  { %26 = vsyncpa [#allocation9], 0 }
  0x1b   :  { %28 = vsyncpa [#allocation9 + $0x1], 0  ;;  %s6256_s0 = smov 0   ;;  %s6258_s17 = smov 0  }
  0x1c   :  { %s6260_s18 = smov 0   ;;  %s6262_s19 = smov 0  }
  0x1d   :  { %s6264_s1 = smov 0   ;;  %s6266_s20 = smov 0  }
  0x1e   :  { %s6268_s21 = smov 0   ;;  %s6270_s22 = smov 0  }
  0x1f   :  { %s6272_s23 = smov 0   ;;  %s6274_s24 = smov 0  }
  0x20   :  { %s6276_s25 = smov 0   ;;  %s6278_s26 = smov 0  }
  0x21   :  { %s6280_s27 = smov 0   ;;  %s6282_s28 = smov 0  }
  0x22   :  { %s6284_s29 = smov 0   ;;  %s6286_s30 = smov 0  }
  0x23   :  { %s6288_s7 = smov 0  }
  0x24 LB: > { %7864 = sst [smem:[#allocation36_spill]] %s6114_s1  ;;  %s6342_s8 = sadd.s32 4294967295, %s6162_s7   ;;  %s6162_s7 = sphi %s6288_s7, %s34_s7   ;;  %s6158_s30 = sphi %s6286_s30, %s7940_s30   ;;  %s6154_s29 = sphi %s6284_s29, %s7924_s29   ;;  %s6150_s28 = sphi %s6282_s28, %s7939_s28   ;;  %s6146_s27 = sphi %s6280_s27, %s7938_s27   ;;  %s6142_s26 = sphi %s6278_s26, %s7937_s26   ;;  %s6138_s25 = sphi %s6276_s25, %s7936_s25   ;;  %s6134_s24 = sphi %s6274_s24, %s7935_s24   ;;  %s6130_s23 = sphi %s6272_s23, %s7934_s23   ;;  %s6126_s22 = sphi %s6270_s22, %s7933_s22   ;;  %s6122_s21 = sphi %s6268_s21, %s7932_s21   ;;  %s6118_s20 = sphi %s6266_s20, %s7931_s20   ;;  %s6114_s1 = sphi %s6264_s1, %s7930_s1   ;;  %s6110_s19 = sphi %s6262_s19, %s7918_s19   ;;  %s6106_s18 = sphi %s6260_s18, %s7929_s18   ;;  %s6102_s17 = sphi %s6258_s17, %s7927_s17   ;;  %s6098_s0 = sphi %s6256_s0, %s7926_s0  }
  0x25   : > { %7865 = sst [smem:[#allocation37_spill]] %s6134_s24  ;;  %s43_s10 = sadd.s32 1, %s6154_s29 }
  0x26   : > { %7866 = sst [smem:[#allocation38_spill]] %s6142_s26  ;;  %s46_s11 = sadd.s32 1, %s6158_s30 }
  0x27   : > { %7867 = sst [smem:[#allocation39_spill]] %s6146_s27  ;;  %p44_p6 = scmp.ge.s32.totalorder %s43_s10, 2 }
  0x28   : > { %7868 = sst [smem:[#allocation40_spill]] %s6150_s28  ;;  %s53_s12 = sadd.s32 1, %s6142_s26 }
  0x29   : > { %7869 = sst [smem:[#allocation41_spill]] %s6154_s29  ;;  %p7849_p7 = scmp.ne.s32.totalorder %s6142_s26, %s6138_s25 }
  0x2a   : > { %p61_p8 = scmp.eq.s32.totalorder %s6162_s7, 0  ;;  %s7942_s10 = smov (%p44_p6, %s43_s10), 0 }
  0x2b   : > { %7870 = sst [smem:[#allocation42_spill]] %s7942_s10  ;;  %s7944_s11 = smov (!%p44_p6, %s46_s11), %s6158_s30 }
  0x2c   : > { %p6359_p9 = por %p61_p8, %p7849_p7  ;;  %p7848_p10 = scmp.ne.s32.totalorder %s6138_s25, %s6134_s24 }
  0x2d   : > { %p48_p11 = scmp.ge.s32.totalorder %s7944_s11, 2  ;;  %p67_p12 = scmp.eq.s32.totalorder %s6342_s8, 0 }
  0x2e   : > { %s76_s14 = sshra.s32 %s6154_s29, 7  ;;  %s81_s15 = sand.u32 127, %s6154_s29 }
  0x2f   : > { %s7946_s11 = smov (%p48_p11, %s7944_s11), 0  ;;  %p6375_p13 = por %p67_p12, %p7848_p10 }
  0x30   : > { %7872 = sst [smem:[#allocation43_spill]] %s7946_s11  ;;  %s78_s9 = sadd.s32 %s6158_s30, %s76_s14 }
  0x31   : > { %s7873_s16 = scalar_select %p6375_p13, 1, 0 }
  0x32   : > { %s6382_s6 = ssub.s32 %s6158_s30, %s7946_s11  ;;  %s4180_s29 = sshll.u32 %s78_s9, 7 }
  0x33   : > { %7874 = sst [smem:[#allocation44_spill]] %s7873_s16  ;;  %p51_p0 = scmp.eq.s32.totalorder %s6382_s6, 0 }
  0x34   : > { %s6385_s28 = sadd.s32 %s4180_s29, %s81_s15  ;;  %s84_s5 = sshra.s32 %s7942_s10, 7 }
  0x35   : > { %s83_s27 = sld [smem:[#allocation6 + %s6385_s28]]  ;;  %s86_s14 = sadd.s32 %s84_s5, %s7946_s11 }
  0x36   : > { %s6390_s16 = scalar_select %p51_p0, %s6142_s26, %s53_s12  }
  0x37   : > { %s89_s4 = sand.u32 127, %s7942_s10  ;;  %s4181_s9 = sshll.u32 %s86_s14, 7 }
  0x38   : > { %7875 = sst [smem:[#allocation45_spill]] %s6390_s16  ;;  %s95_s3 = sadd.s32 1, %s6130_s23 }
  0x39   : > { %s90_s29 = sadd.s32 %s4181_s9, %s89_s4  ;;  %p102_p1 = scmp.ne.s32.totalorder %s6130_s23, %s6126_s22 }
  0x3a   : > { %s91_s15 = sld [smem:[#allocation6 + %s90_s29]]  ;;  %p108_p2 = scmp.ne.s32.totalorder %s6126_s22, %s6122_s21 }
  0x3b   : > { %p6401_p3 = por %p102_p1, %p61_p8  ;;  %s125_s12 = sld [smem:[#allocation6 + %s6385_s28]] }
  0x3c   : > { %p6408_p4 = por %p108_p2, %p67_p12  ;;  %s133_s4 = sld [smem:[#allocation6 + %s90_s29]] }
  0x3d   : > { %s137_s14 = sadd.s32 1, %s6118_s20  ;;  %p144_p5 = scmp.ne.s32.totalorder %s6118_s20, %s6114_s1 }
  0x3e   : > { %s7877_s5 = scalar_select %p6408_p4, 1, 0 }
  0x3f   : > { %p150_p6 = scmp.ne.s32.totalorder %s6114_s1, %s6110_s19  ;;  %s167_s21 = sld [smem:[#allocation6 + %s6385_s28]] }
  0x40   : > { %7878 = sst [smem:[#allocation46_spill]] %s7877_s5  ;;  %p6420_p11 = por %p144_p5, %p61_p8 }
  0x41   : > { %s175_s11 = sld [smem:[#allocation6 + %s90_s29]]  ;;  %s92_s10 = ssub.s32 %s83_s27, %s91_s15 }
  0x42   : > { %p6426_p0 = por %p150_p6, %p67_p12  ;;  %p93_p1 = scmp.eq.s32.totalorder %s92_s10, 0 }
  0x43   : > { %s181_s19 = sadd.s32 1, %s6106_s18  ;;  %s134_s1 = ssub.s32 %s125_s12, %s133_s4 }
  0x44   : > { %s7880_s16 = scalar_select %p6426_p0, 1, 0 }
  0x45   : > { %p188_p2 = scmp.ne.s32.totalorder %s6106_s18, %s6102_s17  ;;  %p135_p5 = scmp.eq.s32.totalorder %s134_s1, 0 }
  0x46   : > { %7881 = sst [smem:[#allocation47_spill]] %s7880_s16  ;;  %p194_p6 = scmp.ne.s32.totalorder %s6102_s17, %s6098_s0 }
  0x47   : > { %s6434_s5 = scalar_select %p93_p1, %s6130_s23, %s95_s3  }
  0x48   : > { %p6438_p10 = por %p188_p2, %p61_p8  ;;  %s177_s29 = ssub.s32 %s167_s21, %s175_s11 }
  0x49   : > { %7882 = sst [smem:[#allocation48_spill]] %s6434_s5  ;;  %s178_s10 = sor.u32 %s177_s29, %s6382_s6 }
  0x4a   : > { %s6445_s15 = scalar_select %p135_p5, %s6118_s20, %s137_s14  }
  0x4b   : > { %p6450_p7 = por %p194_p6, %p67_p12  ;;  %p179_p0 = scmp.eq.s32.totalorder %s178_s10, 0 }
  0x4c   : > { %7884 = sst [smem:[#allocation49_spill]] %s6445_s15  ;;  %p218_p4 = scmp.eq.s32.totalorder %s6342_s8, 3 }
  0x4d   : > { %s7886_s3 = sadd.s32 4294967294, %s6162_s7   ;;  %p7888_p8 = scmp.ne.s32.totalorder %s6142_s26, %s6138_s25 }
  0x4e   : > { %p224_p1 = scmp.eq.s32.totalorder %s7886_s3, 3  ;;  %p7890_p13 = scmp.ne.s32.totalorder %s6138_s25, %s6134_s24 }
  0x4f   : > { %s6458_s1 = scalar_select %p179_p0, %s6106_s18, %s181_s19  }
  0x50   : > { %p6463_p2 = por %p218_p4, %p7888_p8  ;;  %p6470_p5 = por %p224_p1, %p7890_p13 }
  0x51   : > { %7887 = sst [smem:[#allocation50_spill]] %s6458_s1  ;;  %p4187_p12 = scmp.ge.s32.totalorder %s6162_s7, 4 }
  0x52   : > { %s7889_s12 = scalar_select %p6463_p2, 1, 0 }
  0x53   : > { %s7891_s0 = scalar_select %p6470_p5, 1, 0 }
  0x54   : > { %240 = sbr.rel (%p4187_p12) target bundleno = 175 (0xaf), region = 16 }
  0x55   : > { %7892 = sst [smem:[#allocation51_spill]] %s7891_s0 }
  0x5b   : > { %s244_s6 = sand.u32 1, %s6142_s26   ;;  %s4416_s11 = sshll.u32 %s6158_s30, 11 }
  0x5c   : > { %s4188_s4 = sshll.u32 %s244_s6, 9  ;;  %s7893_s19 = sld [smem:[#allocation52_spill]] }
  0x5d   : > { %s5484_s10 = scalar_select %p6359_p9, [#allocation0], [#allocation24] }
  0x5e   : > { %s248_s3 = scalar_lea.vmem [#allocation7], %s4188_s4  ;;  %s6166_s1 = smov 4096  }
  0x5f   : > { %s267_s5 = sshll.u32 %s248_s3, 4  ;;  %s259_s15 = sld [smem:[%s5484_s10]]   ;;  %s268_s5 = int_to_ptr.vmem [resolvable:$true] %s267_s5 }
  0x60   : > { %5485 = sst [smem:[#allocation17]] (%p6359_p9), %s6166_s1  ;;  %s6167_s26 = smov 2048  }
  0x61   : > { %5486 = sst [smem:[#allocation17 + $0x1]] (%p6359_p9), %s6167_s26  ;;  %s6168_s0 = smov 16  }
  0x62   : > { %s254_s29 = scalar_lea.hbm %s7893_s19, %s4416_s11  ;;  %5487 = sst [smem:[#allocation17 + $0x2]] (%p6359_p9), %s6168_s0 }
  0x63   : > { %s6169_s24 = smov 128   ;;  %s6170_s4 = smov 8  }
  0x64   : > { %5488 = sst [smem:[#allocation17 + $0x3]] (%p6359_p9), %s6169_s24  ;;  %s245_s21 = scalar_lea.sflag [#allocation8], %s244_s6 }
  0x65   : > { %5489 = sst [smem:[#allocation17 + $0x4]] (%p6359_p9), %s6169_s24  ;;  %s4191_s11 = sshll.u32 %s259_s15, 26 }
  0x66   : > { %5490 = sst [smem:[#allocation17 + $0x5]] (%p6359_p9), %s6170_s4  ;;  %s4192_s14 = sadd.s32 134217728, %s4191_s11 }
  0x67   : > { %s6171_s19 = smov [#allocation16]  }
  0x68   : > { %5491 = dma.general (%p6359_p9), %s254_s29, 8192, %s268_s5, %s245_s21, %s6171_s19, [#allocation17], %s4192_s14, 0  }
  0x69   : > { %s290_s26 = sand.u32 1, %s6162_s7   ;;  %s292_s24 = sand.u32 1, %s6130_s23  }
  0x6a   : > { %s4193_s15 = sshll.u32 %s292_s24, 9  ;;  %s6172_s3 = smov 4096  }
  0x6b   : > { %s5492_s1 = scalar_select %p6401_p3, [#allocation6], [#allocation25] }
  0x6c   : > { %s5493_s0 = scalar_select %p6401_p3, %s6385_s28, 0 }
  0x6d   : > { %s5494_s13 = scalar_select %p6401_p3, [#allocation0], [#allocation26] }
  0x6e   : > { %s302_s5 = sld [smem:[%s5492_s1 + %s5493_s0]]  ;;  %s294_s6 = scalar_lea.vmem [#allocation10], %s4193_s15 }
  0x6f   : > { %s321_s29 = sshll.u32 %s294_s6, 4  ;;  %s313_s10 = sld [smem:[%s5494_s13]]   ;;  %s322_s29 = int_to_ptr.vmem [resolvable:$true] %s321_s29 }
  0x70   : > { %5495 = sst [smem:[#allocation19]] (%p6401_p3), %s6172_s3  ;;  %s6173_s11 = smov 2048  }
  0x71   : > { %5496 = sst [smem:[#allocation19 + $0x1]] (%p6401_p3), %s6173_s11  ;;  %s6174_s4 = smov 16  }
  0x72   : > { %5497 = sst [smem:[#allocation19 + $0x2]] (%p6401_p3), %s6174_s4  ;;  %s6175_s14 = smov 128  }
  0x73   : > { %5498 = sst [smem:[#allocation19 + $0x3]] (%p6401_p3), %s6175_s14  ;;  %s7894_s15 = sld [smem:[#allocation53_spill]] }
  0x74   : > { %s4417_s21 = sshll.u32 %s302_s5, 11  ;;  %5499 = sst [smem:[#allocation19 + $0x4]] (%p6401_p3), %s6175_s14 }
  0x75   : > { %s4197_s0 = sshll.u32 %s313_s10, 26  ;;  %s6176_s6 = smov 8  }
  0x76   : > { %s4198_s13 = sadd.s32 134217728, %s4197_s0  ;;  %5500 = sst [smem:[#allocation19 + $0x5]] (%p6401_p3), %s6176_s6 }
  0x77   : > { %s6520_s3 = scalar_lea.sflag [#allocation11], %s290_s26  ;;  %s6177_s11 = smov [#allocation18]  }
  0x79   : > { %s308_s1 = scalar_lea.hbm %s7894_s15, %s4417_s21 }
  0x7a   : > { %5501 = dma.general (%p6401_p3), %s308_s1, 8192, %s322_s29, %s6520_s3, %s6177_s11, [#allocation19], %s4198_s13, 0  }
  0x7b   : > { %s346_s5 = sand.u32 1, %s6118_s20   ;;  %s6178_s4 = smov 4096  }
  0x7c   : > { %s4199_s10 = sshll.u32 %s346_s5, 9  ;;  %5505 = sst [smem:[#allocation21]] (%p6420_p11), %s6178_s4 }
  0x7d   : > { %s5502_s26 = scalar_select %p6420_p11, [#allocation6], [#allocation27] }
  0x7e   : > { %s5503_s2 = scalar_select %p6420_p11, %s6385_s28, 0 }
  0x7f   : > { %s5504_s29 = scalar_select %p6420_p11, [#allocation0], [#allocation28] }
  0x80   : > { %s356_s14 = sld [smem:[%s5502_s26 + %s5503_s2]]  ;;  %s348_s21 = scalar_lea.vmem [#allocation12], %s4199_s10 }
  0x81   : > { %s375_s19 = sshll.u32 %s348_s21, 4  ;;  %s367_s24 = sld [smem:[%s5504_s29]]   ;;  %s376_s19 = int_to_ptr.vmem [resolvable:$true] %s375_s19 }
  0x82   : > { %s6179_s15 = smov 2048   ;;  %s6180_s1 = smov 16  }
  0x83   : > { %5506 = sst [smem:[#allocation21 + $0x1]] (%p6420_p11), %s6179_s15  ;;  %s6181_s0 = smov 128  }
  0x84   : > { %5507 = sst [smem:[#allocation21 + $0x2]] (%p6420_p11), %s6180_s1  ;;  %s6182_s6 = smov 8  }
  0x85   : > { %5508 = sst [smem:[#allocation21 + $0x3]] (%p6420_p11), %s6181_s0  ;;  %s7895_s10 = sld [smem:[#allocation54_spill]] }
  0x86   : > { %5509 = sst [smem:[#allocation21 + $0x4]] (%p6420_p11), %s6181_s0  ;;  %s4418_s13 = sshll.u32 %s356_s14, 11 }
  0x87   : > { %5510 = sst [smem:[#allocation21 + $0x5]] (%p6420_p11), %s6182_s6  ;;  %s4203_s26 = sshll.u32 %s367_s24, 26 }
  0x88   : > { %s4204_s2 = sadd.s32 134217728, %s4203_s26  ;;  %s6183_s29 = smov [#allocation20]  }
  0x89   : > { %s398_s21 = sand.u32 1, %s6106_s18   ;;  %s7948_s28 = smov (!%p6438_p10, %s6385_s28), 0 }
  0x8a   : > { %s4205_s14 = sshll.u32 %s398_s21, 6  ;;  %s4419_s24 = sshll.u32 %s6158_s30, 5 }
  0x8b   : > { %s362_s4 = scalar_lea.hbm %s7895_s10, %s4418_s13  ;;  %s402_s0 = scalar_lea.vmem [#allocation13], %s4205_s14 }
  0x8c   : > { %5511 = dma.general (%p6420_p11), %s362_s4, 8192, %s376_s19, %s6520_s3, %s6183_s29, [#allocation21], %s4204_s2, 0  }
  0x8d   : > { %s5512_s15 = scalar_select %p6438_p10, [#allocation6], [#allocation29] }
  0x8e   : > { %s419_s13 = sshll.u32 %s402_s0, 4  ;;  %s7896_s11 = sld [smem:[#allocation55_spill]]  ;;  %s6558_s13 = int_to_ptr.vmem [resolvable:$true] %s419_s13 }
  0x8f   : > { %s410_s1 = sld [smem:[%s5512_s15 + %s7948_s28]]  ;;  %s6565_s10 = scalar_lea.sflag [#allocation14], %s398_s21 }
  0x94   : > { %s5982_s2 = scalar_lea.hbm %s7896_s11, 4096 }
  0x95   : > { %s416_s9 = sadd.s32 %s4419_s24, %s410_s1 }
  0x96   : > { %s4209_s3 = sshll.u32 %s416_s9, 6 }
  0x97   : > { %s6563_s5 = scalar_lea.hbm %s7896_s11, %s4209_s3 }
  0x98   : > { %s5978_s4 = scalar_lea.hbm %s6563_s5, 1024  ;;  %p5983_p4 = scmp.lt.u32.totalorder %s6563_s5, %s7896_s11 }
  0x99   : > { %p5979_p9 = scmp.ne.s32.totalorder %s6563_s5, %s5978_s4  ;;  %p5984_p11 = scmp.lt.u32.totalorder %s5982_s2, %s5978_s4 }
  0x9a   : > { %p5986_p6 = scmp.lt.u32.totalorder %s5978_s4, %s6563_s5 }
  0x9b   : > { %p5980_p13 = pnand %p5979_p9, %p6438_p10  ;;  %p5985_p0 = por %p5984_p11, %p5983_p4 }
  0x9d   : > { %p5981_p3 = pneg %p5980_p13  ;;  %p5987_p1 = por %p5986_p6, %p5985_p0 }
  0x9f   : > { %p5988_p8 = pnand %p5987_p1, %p5981_p3 }
  0xa1   : > { %5991 = shalt.err (!%p5988_p8)
}
  0xa2   : > { %s5992_s21 = scalar_lea.vmem %s6558_s13, 1024  ;;  %s6184_s15 = smov [#allocation13]  }
  0xa3   : > { %p5993_p12 = scmp.ne.s32.totalorder %s6558_s13, %s5992_s21  ;;  %s5996_s1 = sshll.u32 %s6184_s15, 4  ;;  %s5997_s1 = int_to_ptr.vmem [resolvable:$false] %s5996_s1 }
  0xa4   : > { %s5998_s0 = scalar_lea.vmem %s5997_s1, 2048  ;;  %p5999_p5 = scmp.lt.s32.totalorder %s6558_s13, %s5997_s1 }
  0xa5   : > { %p5994_p9 = pnand %p5993_p12, %p6438_p10  ;;  %p6000_p2 = scmp.lt.s32.totalorder %s5998_s0, %s5992_s21 }
  0xa7   : > { %p5995_p13 = pneg %p5994_p9  ;;  %p6001_p4 = por %p6000_p2, %p5999_p5 }
  0xa9   : > { %p6002_p11 = pnand %p6001_p4, %p5995_p13 }
  0xab   : > { %6005 = shalt.err (!%p6002_p11)
}
  0xac   : > { %s6185_s24 = smov 128   ;;  %s6186_s9 = smov 64  }
  0xad   : > { %s6187_s3 = smov 4  }
  0xae   : > { %5514 = dma.hbm_to_vmem [thread:$0]  (%p6438_p10), %s6563_s5, 1024, %s6558_s13, %s6565_s10, %s6185_s24, %s6186_s9, %s6187_s3  }
  0xaf PF: > { %p4210_p3 = scmp.ge.s32.totalorder %s6162_s7, 1  ;;  %p427_p0 = scmp.lt.s32.totalorder %s6162_s7, 5 }
  0xb1   : > { %p428_p6 = pnand %p4210_p3, %p427_p0 }
  0xb2   : > { %s7897_s19 = sld [smem:[#allocation44_spill]] (!%p428_p6)  ;;  %s6592_s6 = sand.u32 (!%p428_p6), 1, %s6138_s25  }
  0xb3   : > { %431 = sbr.rel (%p428_p6) target bundleno = 1192 (0x4a8), region = 36  ;;  %s4211_s4 = sshll.u32 (!%p428_p6), %s6592_s6, 9 }
  0xb4   : > { %s434_s28 = scalar_lea.sflag (!%p428_p6), [#allocation8], %s6592_s6  ;;  %s6596_s26 = scalar_lea.vmem (!%p428_p6), [#allocation7], %s4211_s4 }
  0xb8   : > { %p7898_p2 = scmp.ne.s32.totalorder (!%p428_p6), %s7897_s19, 0 }
  0xba   : > { %6077 = dma.done.wait (%p7898_p2), %s434_s28, 8192  }
  0xbb   : > { %6079 = vsyncadd (%p7898_p2), %s434_s28, 4294959104  ;;  %s7899_s27 = sld [smem:[#allocation46_spill]]  ;;  %s442_s13 = sand.u32 1, %s6342_s8  }
  0xbc   : > { %s444_s5 = sand.u32 1, %s6126_s22   ;;  %s443_s2 = scalar_lea.sflag [#allocation11], %s442_s13 }
  0xbd   : > { %s4212_s10 = sshll.u32 %s444_s5, 9 }
  0xbe   : > { %s6604_s29 = scalar_lea.vmem [#allocation10], %s4212_s10 }
  0xc1   : > { %p7900_p10 = scmp.ne.s32.totalorder %s7899_s27, 0 }
  0xc3   : > { %6081 = dma.done.wait (%p7900_p10), %s443_s2, 8192  }
  0xc4   : > { %6083 = vsyncadd (%p7900_p10), %s443_s2, 4294959104  ;;  %s7901_s14 = sld [smem:[#allocation36_spill]]  ;;  %s7902_s21 = sld [smem:[#allocation47_spill]] }
  0xca   : > { %s453_s15 = sand.u32 1, %s7901_s14   ;;  %p7903_p5 = scmp.ne.s32.totalorder %s7902_s21, 0 }
  0xcb   : > { %s4213_s1 = sshll.u32 %s453_s15, 9 }
  0xcc   : > { %s6611_s0 = scalar_lea.vmem [#allocation12], %s4213_s1 }
  0xcd   : > { %6085 = dma.done.wait (%p7903_p5), %s443_s2, 8192  }
  0xce   : > { %6087 = vsyncadd (%p7903_p5), %s443_s2, 4294959104  ;;  %s460_s8 = sand.u32 1, %s6102_s17  }
  0xcf   : > { %s4214_s24 = sshll.u32 %s460_s8, 6  ;;  %s461_s9 = scalar_lea.sflag [#allocation14], %s460_s8 }
  0xd0   : > { %s6618_s3 = scalar_lea.vmem [#allocation13], %s4214_s24 }
  0xd1   : > { %6089 = dma.done.wait (%p6450_p7), %s461_s9, 1024  }
  0xd2   : > { %6091 = vsyncadd (%p6450_p7), %s461_s9, 4294966272  ;;  %s6624_s19 = scalar_lea.vmem [#allocation15], %s4211_s4  ;;  %s7904_s28 = sld [smem:[#allocation39_spill]] }
  0xd8   : > { %p4216_p1 = scmp.ne.s32.totalorder %s7904_s28, 0 }
  0xd9   : > { %vm537_vm0 = vcmask (!%p4216_p1), 130048   ;;  %vm602_vm1 = vcmask (!%p4216_p1), 7168   ;;  %v6188_v0 = vmov (!%p4216_p1), 0.0  }
  0xda   : > { %536 = sbr.rel (%p4216_p1) target bundleno = 282 (0x11a), region = 56  ;;  %538 = vst.msk [vmem:[#allocation2] sm:$0xff] (!%p4216_p1), %vm537_vm0, %v6188_v0  ;;  %539 = vst.msk [vmem:[#allocation2 + $0x8] sm:$0xff] (!%p4216_p1), %vm537_vm0, %v6188_v0 }
  0xdb   : > { %540 = vst.msk [vmem:[#allocation2 + $0x10] sm:$0xff] (!%p4216_p1), %vm537_vm0, %v6188_v0  ;;  %541 = vst.msk [vmem:[#allocation2 + $0x18] sm:$0xff] (!%p4216_p1), %vm537_vm0, %v6188_v0 }
  0xdc   : > { %542 = vst.msk [vmem:[#allocation2 + $0x20] sm:$0xff] (!%p4216_p1), %vm537_vm0, %v6188_v0  ;;  %543 = vst.msk [vmem:[#allocation2 + $0x28] sm:$0xff] (!%p4216_p1), %vm537_vm0, %v6188_v0 }
  0xdd   : > { %544 = vst.msk [vmem:[#allocation2 + $0x30] sm:$0xff] (!%p4216_p1), %vm537_vm0, %v6188_v0  ;;  %545 = vst.msk [vmem:[#allocation2 + $0x38] sm:$0xff] (!%p4216_p1), %vm537_vm0, %v6188_v0 }
  0xde   : > { %546 = vst.msk [vmem:[#allocation2 + $0x40] sm:$0xff] (!%p4216_p1), %vm537_vm0, %v6188_v0  ;;  %547 = vst.msk [vmem:[#allocation2 + $0x48] sm:$0xff] (!%p4216_p1), %vm537_vm0, %v6188_v0 }
  0xdf   : > { %548 = vst.msk [vmem:[#allocation2 + $0x50] sm:$0xff] (!%p4216_p1), %vm537_vm0, %v6188_v0  ;;  %549 = vst.msk [vmem:[#allocation2 + $0x58] sm:$0xff] (!%p4216_p1), %vm537_vm0, %v6188_v0 }
  0xe0   : > { %550 = vst.msk [vmem:[#allocation2 + $0x60] sm:$0xff] (!%p4216_p1), %vm537_vm0, %v6188_v0  ;;  %551 = vst.msk [vmem:[#allocation2 + $0x68] sm:$0xff] (!%p4216_p1), %vm537_vm0, %v6188_v0 }
  0xe1   : > { %552 = vst.msk [vmem:[#allocation2 + $0x70] sm:$0xff] %vm537_vm0, %v6188_v0  ;;  %553 = vst.msk [vmem:[#allocation2 + $0x78] sm:$0xff] %vm537_vm0, %v6188_v0 }
  0xe2   : > { %554 = vst.msk [vmem:[#allocation2 + $0x80] sm:$0xff] %vm537_vm0, %v6188_v0  ;;  %555 = vst.msk [vmem:[#allocation2 + $0x88] sm:$0xff] %vm537_vm0, %v6188_v0 }
  0xe3   : > { %556 = vst.msk [vmem:[#allocation2 + $0x90] sm:$0xff] %vm537_vm0, %v6188_v0  ;;  %557 = vst.msk [vmem:[#allocation2 + $0x98] sm:$0xff] %vm537_vm0, %v6188_v0 }
  0xe4   : > { %558 = vst.msk [vmem:[#allocation2 + $0xa0] sm:$0xff] %vm537_vm0, %v6188_v0  ;;  %559 = vst.msk [vmem:[#allocation2 + $0xa8] sm:$0xff] %vm537_vm0, %v6188_v0 }
  0xe5   : > { %560 = vst.msk [vmem:[#allocation2 + $0xb0] sm:$0xff] %vm537_vm0, %v6188_v0  ;;  %561 = vst.msk [vmem:[#allocation2 + $0xb8] sm:$0xff] %vm537_vm0, %v6188_v0 }
  0xe6   : > { %562 = vst.msk [vmem:[#allocation2 + $0xc0] sm:$0xff] %vm537_vm0, %v6188_v0  ;;  %563 = vst.msk [vmem:[#allocation2 + $0xc8] sm:$0xff] %vm537_vm0, %v6188_v0 }
  0xe7   : > { %564 = vst.msk [vmem:[#allocation2 + $0xd0] sm:$0xff] %vm537_vm0, %v6188_v0  ;;  %565 = vst.msk [vmem:[#allocation2 + $0xd8] sm:$0xff] %vm537_vm0, %v6188_v0 }
  0xe8   : > { %566 = vst.msk [vmem:[#allocation2 + $0xe0] sm:$0xff] %vm537_vm0, %v6188_v0  ;;  %567 = vst.msk [vmem:[#allocation2 + $0xe8] sm:$0xff] %vm537_vm0, %v6188_v0 }
  0xe9   : > { %568 = vst.msk [vmem:[#allocation2 + $0xf0] sm:$0xff] %vm537_vm0, %v6188_v0  ;;  %569 = vst.msk [vmem:[#allocation2 + $0xf8] sm:$0xff] %vm537_vm0, %v6188_v0 }
  0xea   : > { %570 = vst.msk [vmem:[#allocation2 + $0x100] sm:$0xff] %vm537_vm0, %v6188_v0  ;;  %571 = vst.msk [vmem:[#allocation2 + $0x108] sm:$0xff] %vm537_vm0, %v6188_v0 }
  0xeb   : > { %572 = vst.msk [vmem:[#allocation2 + $0x110] sm:$0xff] %vm537_vm0, %v6188_v0  ;;  %573 = vst.msk [vmem:[#allocation2 + $0x118] sm:$0xff] %vm537_vm0, %v6188_v0 }
  0xec   : > { %574 = vst.msk [vmem:[#allocation2 + $0x120] sm:$0xff] %vm537_vm0, %v6188_v0  ;;  %575 = vst.msk [vmem:[#allocation2 + $0x128] sm:$0xff] %vm537_vm0, %v6188_v0 }
  0xed   : > { %576 = vst.msk [vmem:[#allocation2 + $0x130] sm:$0xff] %vm537_vm0, %v6188_v0  ;;  %577 = vst.msk [vmem:[#allocation2 + $0x138] sm:$0xff] %vm537_vm0, %v6188_v0 }
  0xee   : > { %578 = vst.msk [vmem:[#allocation2 + $0x140] sm:$0xff] %vm537_vm0, %v6188_v0  ;;  %579 = vst.msk [vmem:[#allocation2 + $0x148] sm:$0xff] %vm537_vm0, %v6188_v0 }
  0xef   : > { %580 = vst.msk [vmem:[#allocation2 + $0x150] sm:$0xff] %vm537_vm0, %v6188_v0  ;;  %581 = vst.msk [vmem:[#allocation2 + $0x158] sm:$0xff] %vm537_vm0, %v6188_v0 }
  0xf0   : > { %582 = vst.msk [vmem:[#allocation2 + $0x160] sm:$0xff] %vm537_vm0, %v6188_v0  ;;  %583 = vst.msk [vmem:[#allocation2 + $0x168] sm:$0xff] %vm537_vm0, %v6188_v0 }
  0xf1   : > { %584 = vst.msk [vmem:[#allocation2 + $0x170] sm:$0xff] %vm537_vm0, %v6188_v0  ;;  %585 = vst.msk [vmem:[#allocation2 + $0x178] sm:$0xff] %vm537_vm0, %v6188_v0 }
  0xf2   : > { %586 = vst.msk [vmem:[#allocation2 + $0x180] sm:$0xff] %vm537_vm0, %v6188_v0  ;;  %587 = vst.msk [vmem:[#allocation2 + $0x188] sm:$0xff] %vm537_vm0, %v6188_v0 }
  0xf3   : > { %588 = vst.msk [vmem:[#allocation2 + $0x190] sm:$0xff] %vm537_vm0, %v6188_v0  ;;  %589 = vst.msk [vmem:[#allocation2 + $0x198] sm:$0xff] %vm537_vm0, %v6188_v0 }
  0xf4   : > { %590 = vst.msk [vmem:[#allocation2 + $0x1a0] sm:$0xff] %vm537_vm0, %v6188_v0  ;;  %591 = vst.msk [vmem:[#allocation2 + $0x1a8] sm:$0xff] %vm537_vm0, %v6188_v0 }
  0xf5   : > { %592 = vst.msk [vmem:[#allocation2 + $0x1b0] sm:$0xff] %vm537_vm0, %v6188_v0  ;;  %593 = vst.msk [vmem:[#allocation2 + $0x1b8] sm:$0xff] %vm537_vm0, %v6188_v0 }
  0xf6   : > { %594 = vst.msk [vmem:[#allocation2 + $0x1c0] sm:$0xff] %vm537_vm0, %v6188_v0  ;;  %595 = vst.msk [vmem:[#allocation2 + $0x1c8] sm:$0xff] %vm537_vm0, %v6188_v0 }
  0xf7   : > { %596 = vst.msk [vmem:[#allocation2 + $0x1d0] sm:$0xff] %vm537_vm0, %v6188_v0  ;;  %597 = vst.msk [vmem:[#allocation2 + $0x1d8] sm:$0xff] %vm537_vm0, %v6188_v0 }
  0xf8   : > { %598 = vst.msk [vmem:[#allocation2 + $0x1e0] sm:$0xff] %vm537_vm0, %v6188_v0  ;;  %599 = vst.msk [vmem:[#allocation2 + $0x1e8] sm:$0xff] %vm537_vm0, %v6188_v0 }
  0xf9   : > { %600 = vst.msk [vmem:[#allocation2 + $0x1f0] sm:$0xff] %vm537_vm0, %v6188_v0  ;;  %601 = vst.msk [vmem:[#allocation2 + $0x1f8] sm:$0xff] %vm537_vm0, %v6188_v0 }
  0xfa   : > { %603 = vst.msk [vmem:[#allocation3] sm:$0xff] %vm602_vm1, %v6188_v0  ;;  %604 = vst.msk [vmem:[#allocation3 + $0x8] sm:$0xff] %vm602_vm1, %v6188_v0 }
  0xfb   : > { %605 = vst.msk [vmem:[#allocation3 + $0x10] sm:$0xff] %vm602_vm1, %v6188_v0  ;;  %606 = vst.msk [vmem:[#allocation3 + $0x18] sm:$0xff] %vm602_vm1, %v6188_v0 }
  0xfc   : > { %607 = vst.msk [vmem:[#allocation3 + $0x20] sm:$0xff] %vm602_vm1, %v6188_v0  ;;  %608 = vst.msk [vmem:[#allocation3 + $0x28] sm:$0xff] %vm602_vm1, %v6188_v0 }
  0xfd   : > { %609 = vst.msk [vmem:[#allocation3 + $0x30] sm:$0xff] %vm602_vm1, %v6188_v0  ;;  %610 = vst.msk [vmem:[#allocation3 + $0x38] sm:$0xff] %vm602_vm1, %v6188_v0 }
  0xfe   : > { %611 = vst.msk [vmem:[#allocation3 + $0x40] sm:$0xff] %vm602_vm1, %v6188_v0  ;;  %612 = vst.msk [vmem:[#allocation3 + $0x48] sm:$0xff] %vm602_vm1, %v6188_v0 }
  0xff   : > { %613 = vst.msk [vmem:[#allocation3 + $0x50] sm:$0xff] %vm602_vm1, %v6188_v0  ;;  %614 = vst.msk [vmem:[#allocation3 + $0x58] sm:$0xff] %vm602_vm1, %v6188_v0 }
 0x100   : > { %615 = vst.msk [vmem:[#allocation3 + $0x60] sm:$0xff] %vm602_vm1, %v6188_v0  ;;  %616 = vst.msk [vmem:[#allocation3 + $0x68] sm:$0xff] %vm602_vm1, %v6188_v0 }
 0x101   : > { %617 = vst.msk [vmem:[#allocation3 + $0x70] sm:$0xff] %vm602_vm1, %v6188_v0  ;;  %618 = vst.msk [vmem:[#allocation3 + $0x78] sm:$0xff] %vm602_vm1, %v6188_v0 }
 0x102   : > { %619 = vst.msk [vmem:[#allocation3 + $0x80] sm:$0xff] %vm602_vm1, %v6188_v0  ;;  %620 = vst.msk [vmem:[#allocation3 + $0x88] sm:$0xff] %vm602_vm1, %v6188_v0 }
 0x103   : > { %621 = vst.msk [vmem:[#allocation3 + $0x90] sm:$0xff] %vm602_vm1, %v6188_v0  ;;  %622 = vst.msk [vmem:[#allocation3 + $0x98] sm:$0xff] %vm602_vm1, %v6188_v0 }
 0x104   : > { %623 = vst.msk [vmem:[#allocation3 + $0xa0] sm:$0xff] %vm602_vm1, %v6188_v0  ;;  %624 = vst.msk [vmem:[#allocation3 + $0xa8] sm:$0xff] %vm602_vm1, %v6188_v0 }
 0x105   : > { %625 = vst.msk [vmem:[#allocation3 + $0xb0] sm:$0xff] %vm602_vm1, %v6188_v0  ;;  %626 = vst.msk [vmem:[#allocation3 + $0xb8] sm:$0xff] %vm602_vm1, %v6188_v0 }
 0x106   : > { %627 = vst.msk [vmem:[#allocation3 + $0xc0] sm:$0xff] %vm602_vm1, %v6188_v0  ;;  %628 = vst.msk [vmem:[#allocation3 + $0xc8] sm:$0xff] %vm602_vm1, %v6188_v0 }
 0x107   : > { %629 = vst.msk [vmem:[#allocation3 + $0xd0] sm:$0xff] %vm602_vm1, %v6188_v0  ;;  %630 = vst.msk [vmem:[#allocation3 + $0xd8] sm:$0xff] %vm602_vm1, %v6188_v0 }
 0x108   : > { %631 = vst.msk [vmem:[#allocation3 + $0xe0] sm:$0xff] %vm602_vm1, %v6188_v0  ;;  %632 = vst.msk [vmem:[#allocation3 + $0xe8] sm:$0xff] %vm602_vm1, %v6188_v0 }
 0x109   : > { %633 = vst.msk [vmem:[#allocation3 + $0xf0] sm:$0xff] %vm602_vm1, %v6188_v0  ;;  %634 = vst.msk [vmem:[#allocation3 + $0xf8] sm:$0xff] %vm602_vm1, %v6188_v0 }
 0x10a   : > { %635 = vst.msk [vmem:[#allocation3 + $0x100] sm:$0xff] %vm602_vm1, %v6188_v0  ;;  %636 = vst.msk [vmem:[#allocation3 + $0x108] sm:$0xff] %vm602_vm1, %v6188_v0 }
 0x10b   : > { %637 = vst.msk [vmem:[#allocation3 + $0x110] sm:$0xff] %vm602_vm1, %v6188_v0  ;;  %638 = vst.msk [vmem:[#allocation3 + $0x118] sm:$0xff] %vm602_vm1, %v6188_v0 }
 0x10c   : > { %639 = vst.msk [vmem:[#allocation3 + $0x120] sm:$0xff] %vm602_vm1, %v6188_v0  ;;  %640 = vst.msk [vmem:[#allocation3 + $0x128] sm:$0xff] %vm602_vm1, %v6188_v0 }
 0x10d   : > { %641 = vst.msk [vmem:[#allocation3 + $0x130] sm:$0xff] %vm602_vm1, %v6188_v0  ;;  %642 = vst.msk [vmem:[#allocation3 + $0x138] sm:$0xff] %vm602_vm1, %v6188_v0 }
 0x10e   : > { %643 = vst.msk [vmem:[#allocation3 + $0x140] sm:$0xff] %vm602_vm1, %v6188_v0  ;;  %644 = vst.msk [vmem:[#allocation3 + $0x148] sm:$0xff] %vm602_vm1, %v6188_v0 }
 0x10f   : > { %645 = vst.msk [vmem:[#allocation3 + $0x150] sm:$0xff] %vm602_vm1, %v6188_v0  ;;  %646 = vst.msk [vmem:[#allocation3 + $0x158] sm:$0xff] %vm602_vm1, %v6188_v0 }
 0x110   : > { %647 = vst.msk [vmem:[#allocation3 + $0x160] sm:$0xff] %vm602_vm1, %v6188_v0  ;;  %648 = vst.msk [vmem:[#allocation3 + $0x168] sm:$0xff] %vm602_vm1, %v6188_v0 }
 0x111   : > { %649 = vst.msk [vmem:[#allocation3 + $0x170] sm:$0xff] %vm602_vm1, %v6188_v0  ;;  %650 = vst.msk [vmem:[#allocation3 + $0x178] sm:$0xff] %vm602_vm1, %v6188_v0 }
 0x112   : > { %651 = vst.msk [vmem:[#allocation3 + $0x180] sm:$0xff] %vm602_vm1, %v6188_v0  ;;  %652 = vst.msk [vmem:[#allocation3 + $0x188] sm:$0xff] %vm602_vm1, %v6188_v0 }
 0x113   : > { %653 = vst.msk [vmem:[#allocation3 + $0x190] sm:$0xff] %vm602_vm1, %v6188_v0  ;;  %654 = vst.msk [vmem:[#allocation3 + $0x198] sm:$0xff] %vm602_vm1, %v6188_v0 }
 0x114   : > { %655 = vst.msk [vmem:[#allocation3 + $0x1a0] sm:$0xff] %vm602_vm1, %v6188_v0  ;;  %656 = vst.msk [vmem:[#allocation3 + $0x1a8] sm:$0xff] %vm602_vm1, %v6188_v0 }
 0x115   : > { %657 = vst.msk [vmem:[#allocation3 + $0x1b0] sm:$0xff] %vm602_vm1, %v6188_v0  ;;  %658 = vst.msk [vmem:[#allocation3 + $0x1b8] sm:$0xff] %vm602_vm1, %v6188_v0 }
 0x116   : > { %659 = vst.msk [vmem:[#allocation3 + $0x1c0] sm:$0xff] %vm602_vm1, %v6188_v0  ;;  %660 = vst.msk [vmem:[#allocation3 + $0x1c8] sm:$0xff] %vm602_vm1, %v6188_v0 }
 0x117   : > { %661 = vst.msk [vmem:[#allocation3 + $0x1d0] sm:$0xff] %vm602_vm1, %v6188_v0  ;;  %662 = vst.msk [vmem:[#allocation3 + $0x1d8] sm:$0xff] %vm602_vm1, %v6188_v0 }
 0x118   : > { %663 = vst.msk [vmem:[#allocation3 + $0x1e0] sm:$0xff] %vm602_vm1, %v6188_v0  ;;  %664 = vst.msk [vmem:[#allocation3 + $0x1e8] sm:$0xff] %vm602_vm1, %v6188_v0 }
 0x119   : > { %665 = vst.msk [vmem:[#allocation3 + $0x1f0] sm:$0xff] %vm602_vm1, %v6188_v0  ;;  %666 = vst.msk [vmem:[#allocation3 + $0x1f8] sm:$0xff] %vm602_vm1, %v6188_v0 }
 0x11a PF: > { %s7905_s16 = sld [smem:[#allocation40_spill]]  ;;  %s7906_s27 = sld [smem:[#allocation39_spill]] }
 0x120   : > { %s667_s4 = sld [smem:[#allocation5 + %s7905_s16]] }
 0x126   : > { %p4217_p7 = scmp.ge.s32.totalorder %s7906_s27, %s667_s4 }
 0x127   : > { %v736_v1 = vld [vmem:[%s6604_s29] sm:$0xff] (!%p4217_p7)  ;;  %v737_v2 = vld [vmem:[%s6604_s29 + $0x8] sm:$0xff] (!%p4217_p7)  ;;  %vm896_vm2 = vcmask (!%p4217_p7), 130048   ;;  %v738_v7 = vld [vmem:[%s6604_s29 + $0x10] sm:$0xff] (!%p4217_p7)  ;;  %vm2437_vm4 = vcmask (!%p4217_p7), 7168  }
 0x128   : > { %671 = sbr.rel (%p4217_p7) target bundleno = 903 (0x387), region = 60  ;;  %v752_v3 = vld [vmem:[%s6604_s29 + $0x80] sm:$0xff] (!%p4217_p7)  ;;  %v5164_v4 = vpack.c.bf16 (!%p4217_p7), %v737_v2, %v736_v1  ;;  %vm6890_vm3 = vmpackc.low (!%p4217_p7), %vm896_vm2, %vm896_vm2  ;;  %v753_v6 = vld [vmem:[%s6604_s29 + $0x88] sm:$0xff] (!%p4217_p7) }
 0x129   : > { %v5212_v8 = vpack.c.bf16 (!%p4217_p7), %v753_v6, %v752_v3  ;;  %v739_v9 = vld [vmem:[%s6604_s29 + $0x18] sm:$0xff] (!%p4217_p7)  ;;  %v754_v10 = vld [vmem:[%s6604_s29 + $0x90] sm:$0xff] (!%p4217_p7)  ;;  %v740_v14 = vld [vmem:[%s6604_s29 + $0x20] sm:$0xff] (!%p4217_p7) }
 0x12a   : > { %v755_v11 = vld [vmem:[%s6604_s29 + $0x98] sm:$0xff] (!%p4217_p7)  ;;  %5166 = vmatprep.subr.msk.bf16.mxu0 (!%p4217_p7), %vm6890_vm3, %v5164_v4  ;;  %v5170_v12 = vpack.c.bf16 (!%p4217_p7), %v739_v9, %v738_v7  ;;  %v741_v15 = vld [vmem:[%s6604_s29 + $0x28] sm:$0xff] (!%p4217_p7)  ;;  %v756_v16 = vld [vmem:[%s6604_s29 + $0xa0] sm:$0xff] (!%p4217_p7) }
 0x12b   : > { %v5218_v13 = vpack.c.bf16 (!%p4217_p7), %v755_v11, %v754_v10  ;;  %5214 = vmatprep.subr.msk.bf16.mxu1 (!%p4217_p7), %vm6890_vm3, %v5212_v8  ;;  %5169 = vmatpush3.bf16.xpose.msk.msra.mxu0 (!%p4217_p7), %vm6890_vm3, %v5164_v4  ;;  %v757_v17 = vld [vmem:[%s6604_s29 + $0xa8] sm:$0xff] (!%p4217_p7)  ;;  %v5176_v18 = vpack.c.bf16 (!%p4217_p7), %v741_v15, %v740_v14  ;;  %v672_v20 = vld [vmem:[%s6596_s26] sm:$0xff] (!%p4217_p7)  ;;  %v742_v22 = vld [vmem:[%s6604_s29 + $0x30] sm:$0xff] (!%p4217_p7) }
 0x12c   : > { %5217 = vmatpush3.bf16.xpose.msk.msra.mxu1 (!%p4217_p7), %vm6890_vm3, %v5212_v8  ;;  %5172 = vmatprep.subr.msk.bf16.mxu0 (!%p4217_p7), %vm6890_vm3, %v5170_v12  ;;  %v5224_v19 = vpack.c.bf16 (!%p4217_p7), %v757_v17, %v756_v16  ;;  %v688_v21 = vld [vmem:[%s6596_s26 + $0x80] sm:$0xff] (!%p4217_p7)  ;;  %v743_v23 = vld [vmem:[%s6604_s29 + $0x38] sm:$0xff] (!%p4217_p7)  ;;  %v758_v24 = vld [vmem:[%s6604_s29 + $0xb0] sm:$0xff] (!%p4217_p7) }
 0x12d   : > { %5220 = vmatprep.subr.msk.bf16.mxu1 (!%p4217_p7), %vm6890_vm3, %v5218_v13  ;;  %4748 = vmatprep.mubr.msk.f32.mxu0 (!%p4217_p7), %vm896_vm2, %v672_v20  ;;  %v759_v25 = vld [vmem:[%s6604_s29 + $0xb8] sm:$0xff] (!%p4217_p7)  ;;  %v5182_v26 = vpack.c.bf16 (!%p4217_p7), %v743_v23, %v742_v22  ;;  %v744_v28 = vld [vmem:[%s6604_s29 + $0x40] sm:$0xff] (!%p4217_p7)  ;;  %v745_v29 = vld [vmem:[%s6604_s29 + $0x48] sm:$0xff] (!%p4217_p7) }
 0x12e   : > { %4804 = vmatprep.mubr.msk.f32.mxu1 (!%p4217_p7), %vm896_vm2, %v688_v21  ;;  %v5230_v27 = vpack.c.bf16 (!%p4217_p7), %v759_v25, %v758_v24  ;;  %v760_v30 = vld [vmem:[%s6604_s29 + $0xc0] sm:$0xff] (!%p4217_p7)  ;;  %v761_v31 = vld [vmem:[%s6604_s29 + $0xc8] sm:$0xff] (!%p4217_p7)  ;;  %v5188_v32 = vpack.c.bf16 (!%p4217_p7), %v745_v29, %v744_v28  ;;  %v746_v34 = vld [vmem:[%s6604_s29 + $0x50] sm:$0xff] (!%p4217_p7) }
 0x12f   : > { %v5236_v33 = vpack.c.bf16 %v761_v31, %v760_v30  ;;  %v747_v35 = vld [vmem:[%s6604_s29 + $0x58] sm:$0xff]  ;;  %v762_v36 = vld [vmem:[%s6604_s29 + $0xd0] sm:$0xff]  ;;  %v748_v40 = vld [vmem:[%s6604_s29 + $0x60] sm:$0xff] }
 0x130   : > { %v763_v37 = vld [vmem:[%s6604_s29 + $0xd8] sm:$0xff]  ;;  %v5194_v38 = vpack.c.bf16 %v747_v35, %v746_v34  ;;  %v749_v41 = vld [vmem:[%s6604_s29 + $0x68] sm:$0xff]  ;;  %v764_v42 = vld [vmem:[%s6604_s29 + $0xe0] sm:$0xff] }
 0x131   : > { %v5242_v39 = vpack.c.bf16 %v763_v37, %v762_v36  ;;  %v765_v43 = vld [vmem:[%s6604_s29 + $0xe8] sm:$0xff]  ;;  %v5200_v44 = vpack.c.bf16 %v749_v41, %v748_v40  ;;  %v750_v46 = vld [vmem:[%s6604_s29 + $0x70] sm:$0xff]  ;;  %v751_v47 = vld [vmem:[%s6604_s29 + $0x78] sm:$0xff] }
 0x132   : > { %v5248_v45 = vpack.c.bf16 %v765_v43, %v764_v42  ;;  %v766_v48 = vld [vmem:[%s6604_s29 + $0xf0] sm:$0xff]  ;;  %v767_v49 = vld [vmem:[%s6604_s29 + $0xf8] sm:$0xff]  ;;  %v5206_v50 = vpack.c.bf16 %v751_v47, %v750_v46  ;;  %v768_v52 = vld [vmem:[%s6604_s29 + $0x100] sm:$0xff] }
 0x133   : > { %5175 = vmatpush3.bf16.xpose.msk.msra.mxu0 %vm6890_vm3, %v5170_v12  ;;  %v5254_v51 = vpack.c.bf16 %v767_v49, %v766_v48  ;;  %v769_v53 = vld [vmem:[%s6604_s29 + $0x108] sm:$0xff]  ;;  %v784_v54 = vld [vmem:[%s6604_s29 + $0x180] sm:$0xff]  ;;  %v770_v58 = vld [vmem:[%s6604_s29 + $0x110] sm:$0xff] }
 0x134   : > { %5223 = vmatpush3.bf16.xpose.msk.msra.mxu1 %vm6890_vm3, %v5218_v13  ;;  %5178 = vmatprep.subr.msk.bf16.mxu0 %vm6890_vm3, %v5176_v18  ;;  %v785_v55 = vld [vmem:[%s6604_s29 + $0x188] sm:$0xff]  ;;  %v5260_v56 = vpack.c.bf16 %v769_v53, %v768_v52  ;;  %v771_v59 = vld [vmem:[%s6604_s29 + $0x118] sm:$0xff]  ;;  %v786_v61 = vld [vmem:[%s6604_s29 + $0x190] sm:$0xff] }
 0x135   : > { %5226 = vmatprep.subr.msk.bf16.mxu1 %vm6890_vm3, %v5224_v19  ;;  %v5308_v57 = vpack.c.bf16 %v785_v55, %v784_v54  ;;  %v673_v60 = vld [vmem:[%s6596_s26 + $0x8] sm:$0xff]  ;;  %v787_v62 = vld [vmem:[%s6604_s29 + $0x198] sm:$0xff]  ;;  %v674_v0 = vld [vmem:[%s6596_s26 + $0x10] sm:$0xff]  ;;  %v5266_v1 = vpack.c.bf16 %v771_v59, %v770_v58 }
 0x136   : > { %v689_v63 = vld [vmem:[%s6596_s26 + $0x88] sm:$0xff]  ;;  %v690_v2 = vld [vmem:[%s6596_s26 + $0x90] sm:$0xff]  ;;  %v5314_v3 = vpack.c.bf16 %v787_v62, %v786_v61  ;;  %v675_v4 = vld [vmem:[%s6596_s26 + $0x18] sm:$0xff] }
 0x137   : > { %v691_v6 = vld [vmem:[%s6596_s26 + $0x98] sm:$0xff]  ;;  %v676_v7 = vld [vmem:[%s6596_s26 + $0x20] sm:$0xff]  ;;  %v773_v9 = vld [vmem:[%s6604_s29 + $0x128] sm:$0xff] }
 0x138   : > { %v772_v8 = vld [vmem:[%s6604_s29 + $0x120] sm:$0xff]  ;;  %v789_v12 = vld [vmem:[%s6604_s29 + $0x1a8] sm:$0xff]  ;;  %v678_v17 = vld [vmem:[%s6596_s26 + $0x30] sm:$0xff] }
 0x139   : > { %v692_v10 = vld [vmem:[%s6596_s26 + $0xa0] sm:$0xff]  ;;  %v677_v13 = vld [vmem:[%s6596_s26 + $0x28] sm:$0xff]  ;;  %v5272_v14 = vpack.c.bf16 %v773_v9, %v772_v8  ;;  %v695_v20 = vld [vmem:[%s6596_s26 + $0xb8] sm:$0xff] }
 0x13a   : > { %v788_v11 = vld [vmem:[%s6604_s29 + $0x1a0] sm:$0xff]  ;;  %v693_v15 = vld [vmem:[%s6596_s26 + $0xa8] sm:$0xff]  ;;  %v774_v22 = vld [vmem:[%s6604_s29 + $0x130] sm:$0xff] }
 0x13b   : > { %5181 = vmatpush3.bf16.xpose.msk.msra.mxu0 %vm6890_vm3, %v5176_v18  ;;  %v5320_v16 = vpack.c.bf16 %v789_v12, %v788_v11  ;;  %v679_v18 = vld [vmem:[%s6596_s26 + $0x38] sm:$0xff]  ;;  %v680_v21 = vld [vmem:[%s6596_s26 + $0x40] sm:$0xff]  ;;  %v790_v25 = vld [vmem:[%s6604_s29 + $0x1b0] sm:$0xff] }
 0x13c   : > { %5229 = vmatpush3.bf16.xpose.msk.msra.mxu1 %vm6890_vm3, %v5224_v19  ;;  %5184 = vmatprep.subr.msk.bf16.mxu0 %vm6890_vm3, %v5182_v26  ;;  %v694_v19 = vld [vmem:[%s6596_s26 + $0xb0] sm:$0xff]  ;;  %v775_v23 = vld [vmem:[%s6604_s29 + $0x138] sm:$0xff]  ;;  %v696_v24 = vld [vmem:[%s6596_s26 + $0xc0] sm:$0xff] }
 0x13d   : > { %5232 = vmatprep.subr.msk.bf16.mxu1 %vm6890_vm3, %v5230_v27  ;;  %v5278_v28 = vpack.c.bf16 %v775_v23, %v774_v22  ;;  %v697_v29 = vld [vmem:[%s6596_s26 + $0xc8] sm:$0xff]  ;;  %v682_v31 = vld [vmem:[%s6596_s26 + $0x50] sm:$0xff]  ;;  %v699_v34 = vld [vmem:[%s6596_s26 + $0xd8] sm:$0xff] }
 0x13e   : > { %v684_v35 = vld [vmem:[%s6596_s26 + $0x60] sm:$0xff]  ;;  %v777_v37 = vld [vmem:[%s6604_s29 + $0x148] sm:$0xff]  ;;  %v687_v46 = vld [vmem:[%s6596_s26 + $0x78] sm:$0xff] }
 0x13f   : > { %v776_v36 = vld [vmem:[%s6604_s29 + $0x140] sm:$0xff]  ;;  %v793_v40 = vld [vmem:[%s6604_s29 + $0x1c8] sm:$0xff]  ;;  %v702_v47 = vld [vmem:[%s6596_s26 + $0xf0] sm:$0xff] }
 0x140   : > { %v685_v41 = vld [vmem:[%s6596_s26 + $0x68] sm:$0xff]  ;;  %v5284_v42 = vpack.c.bf16 %v777_v37, %v776_v36  ;;  %v703_v48 = vld [vmem:[%s6596_s26 + $0xf8] sm:$0xff]  ;;  %v704_v49 = vld [vmem:[%s6596_s26 + $0x100] sm:$0xff] }
 0x141   : > { %v701_v43 = vld [vmem:[%s6596_s26 + $0xe8] sm:$0xff]  ;;  %v720_v52 = vld [vmem:[%s6596_s26 + $0x180] sm:$0xff]  ;;  %v794_v53 = vld [vmem:[%s6604_s29 + $0x1d0] sm:$0xff] }
 0x142   : > { %v795_v54 = vld [vmem:[%s6604_s29 + $0x1d8] sm:$0xff]  ;;  %v781_v58 = vld [vmem:[%s6604_s29 + $0x168] sm:$0xff]  ;;  %v796_v59 = vld [vmem:[%s6604_s29 + $0x1e0] sm:$0xff] }
 0x143   : > { %5187 = vmatpush3.bf16.xpose.msk.msra.mxu0 %vm6890_vm3, %v5182_v26  ;;  %v791_v26 = vld [vmem:[%s6604_s29 + $0x1b8] sm:$0xff]  ;;  %v816_v8 = vld [vmem:[%s6611_s0 + $0x80] sm:$0xff]  ;;  %v817_v9 = vld [vmem:[%s6611_s0 + $0x88] sm:$0xff] }
 0x144   : > { %5235 = vmatpush3.bf16.xpose.msk.msra.mxu1 %vm6890_vm3, %v5230_v27  ;;  %5190 = vmatprep.subr.msk.bf16.mxu0 %vm6890_vm3, %v5188_v32  ;;  %v681_v27 = vld [vmem:[%s6596_s26 + $0x48] sm:$0xff]  ;;  %v5326_v30 = vpack.c.bf16 %v791_v26, %v790_v25  ;;  %v5388_v11 = vpack.c.bf16 %v817_v9, %v816_v8  ;;  %v802_v12 = vld [vmem:[%s6611_s0 + $0x10] sm:$0xff]  ;;  %v707_v23 = vld [vmem:[%s6596_s26 + $0x118] sm:$0xff] }
 0x145   : > { %5238 = vmatprep.subr.msk.bf16.mxu1 %vm6890_vm3, %v5236_v33  ;;  %v805_v22 = vld [vmem:[%s6611_s0 + $0x28] sm:$0xff]  ;;  %v723_v26 = vld [vmem:[%s6596_s26 + $0x198] sm:$0xff]  ;;  %v712_v37 = vld [vmem:[%s6596_s26 + $0x140] sm:$0xff] }
 0x146   : > { %v821_v25 = vld [vmem:[%s6611_s0 + $0xa8] sm:$0xff]  ;;  %v727_v36 = vld [vmem:[%s6596_s26 + $0x1b8] sm:$0xff]  ;;  %v812_v8 = vld [vmem:[%s6611_s0 + $0x60] sm:$0xff] }
 0x147   : > { %v813_v9 = vld [vmem:[%s6611_s0 + $0x68] sm:$0xff] }
 0x14b   : > { %5193 = vmatpush3.bf16.xpose.msk.msra.mxu0 %vm6890_vm3, %v5188_v32  ;;  %v683_v32 = vld [vmem:[%s6596_s26 + $0x58] sm:$0xff] }
 0x14c   : > { %5241 = vmatpush3.bf16.xpose.msk.msra.mxu1 %vm6890_vm3, %v5236_v33  ;;  %5196 = vmatprep.subr.msk.bf16.mxu0 %vm6890_vm3, %v5194_v38  ;;  %v698_v33 = vld [vmem:[%s6596_s26 + $0xd0] sm:$0xff] }
 0x14d   : > { %5244 = vmatprep.subr.msk.bf16.mxu1 %vm6890_vm3, %v5242_v39 }
 0x153   : > { %5199 = vmatpush3.bf16.xpose.msk.msra.mxu0 %vm6890_vm3, %v5194_v38  ;;  %v700_v38 = vld [vmem:[%s6596_s26 + $0xe0] sm:$0xff] }
 0x154   : > { %5247 = vmatpush3.bf16.xpose.msk.msra.mxu1 %vm6890_vm3, %v5242_v39  ;;  %5202 = vmatprep.subr.msk.bf16.mxu0 %vm6890_vm3, %v5200_v44  ;;  %v792_v39 = vld [vmem:[%s6604_s29 + $0x1c0] sm:$0xff] }
 0x155   : > { %5250 = vmatprep.subr.msk.bf16.mxu1 %vm6890_vm3, %v5248_v45 }
 0x15b   : > { %5205 = vmatpush3.bf16.xpose.msk.msra.mxu0 %vm6890_vm3, %v5200_v44  ;;  %v5332_v44 = vpack.c.bf16 %v793_v40, %v792_v39  ;;  %v713_v39 = vld [vmem:[%s6596_s26 + $0x148] sm:$0xff] }
 0x15c   : > { %5253 = vmatpush3.bf16.xpose.msk.msra.mxu1 %vm6890_vm3, %v5248_v45  ;;  %5208 = vmatprep.subr.msk.bf16.mxu0 %vm6890_vm3, %v5206_v50  ;;  %v686_v45 = vld [vmem:[%s6596_s26 + $0x70] sm:$0xff]  ;;  %v729_v40 = vld [vmem:[%s6596_s26 + $0x1c8] sm:$0xff] }
 0x15d   : > { %5256 = vmatprep.subr.msk.bf16.mxu1 %vm6890_vm3, %v5254_v51 }
 0x163   : > { %5211 = vmatpush3.bf16.xpose.msk.msra.mxu0 %vm6890_vm3, %v5206_v50  ;;  %v778_v50 = vld [vmem:[%s6604_s29 + $0x150] sm:$0xff] }
 0x164   : > { %5259 = vmatpush3.bf16.xpose.msk.msra.mxu1 %vm6890_vm3, %v5254_v51  ;;  %5262 = vmatprep.subr.msk.bf16.mxu0 %vm6890_vm3, %v5260_v56  ;;  %v779_v51 = vld [vmem:[%s6604_s29 + $0x158] sm:$0xff] }
 0x165   : > { %5310 = vmatprep.subr.msk.bf16.mxu1 %vm6890_vm3, %v5308_v57  ;;  %v5290_v55 = vpack.c.bf16 %v779_v51, %v778_v50  ;;  %v823_v50 = vld [vmem:[%s6611_s0 + $0xb8] sm:$0xff]  ;;  %v732_v51 = vld [vmem:[%s6596_s26 + $0x1e0] sm:$0xff] }
 0x16a   : > { %4749 = vmatmul.mubr.msk.f32.vlgmr.msra.gmra.mrb[0].mxu0 %vm896_vm2, %v673_v60  ;;  %v797_v60 = vld [vmem:[%s6604_s29 + $0x1e8] sm:$0xff] }
 0x16b   : > { %4805 = vmatmul.mubr.msk.f32.vlgmr.msra.gmra.mrb[0].mxu1 %vm896_vm2, %v689_v63  ;;  %5265 = vmatpush3.bf16.xpose.msk.msra.mxu0 %vm6890_vm3, %v5260_v56  ;;  %v5338_v56 = vpack.c.bf16 %v795_v54, %v794_v53  ;;  %v5344_v62 = vpack.c.bf16 %v797_v60, %v796_v59  ;;  %v782_v63 = vld [vmem:[%s6604_s29 + $0x170] sm:$0xff]  ;;  %v717_v53 = vld [vmem:[%s6596_s26 + $0x168] sm:$0xff] }
 0x16c   : > { %5313 = vmatpush3.bf16.xpose.msk.msra.mxu1 %vm6890_vm3, %v5308_v57  ;;  %4751 = vmatprep.mubr.msk.f32.mxu0 %vm896_vm2, %v674_v0  ;;  %v780_v57 = vld [vmem:[%s6604_s29 + $0x160] sm:$0xff]  ;;  %v783_v0 = vld [vmem:[%s6604_s29 + $0x178] sm:$0xff]  ;;  %v733_v54 = vld [vmem:[%s6596_s26 + $0x1e8] sm:$0xff] }
 0x16d   : > { %4807 = vmatprep.mubr.msk.f32.mxu1 %vm896_vm2, %v690_v2  ;;  %5268 = vmatprep.subr.msk.bf16.mxu0 %vm6890_vm3, %v5266_v1  ;;  %v5296_v61 = vpack.c.bf16 %v781_v58, %v780_v57  ;;  %v799_v2 = vld [vmem:[%s6604_s29 + $0x1f8] sm:$0xff]  ;;  %v809_v57 = vld [vmem:[%s6611_s0 + $0x48] sm:$0xff]  ;;  %v824_v58 = vld [vmem:[%s6611_s0 + $0xc0] sm:$0xff] }
 0x16e   : > { %4752 = vmatmul.mubr.msk.f32.gmra.mrb[2].mxu0 %vm896_vm2, %v675_v4  ;;  %5316 = vmatprep.subr.msk.bf16.mxu1 %vm6890_vm3, %v5314_v3  ;;  %v734_v59 = vld [vmem:[%s6596_s26 + $0x1f0] sm:$0xff] }
 0x16f   : > { %4808 = vmatmul.mubr.msk.f32.gmra.mrb[2].mxu1 %vm896_vm2, %v691_v6  ;;  %4754 = vmatprep.mubr.msk.f32.mxu0 %vm896_vm2, %v676_v7  ;;  %v800_v6 = vld [vmem:[%s6611_s0] sm:$0xff]  ;;  %v801_v7 = vld [vmem:[%s6611_s0 + $0x8] sm:$0xff] }
 0x170   : > { %4810 = vmatprep.mubr.msk.f32.mxu1 %vm896_vm2, %v692_v10  ;;  %v5356_v10 = vpack.c.bf16 %v801_v7, %v800_v6  ;;  %v827_v6 = vld [vmem:[%s6611_s0 + $0xd8] sm:$0xff] }
 0x172   : > { %4755 = vmatmul.mubr.msk.f32.gmra.mrb[4].mxu0 %vm896_vm2, %v677_v13  ;;  %v803_v13 = vld [vmem:[%s6611_s0 + $0x18] sm:$0xff] }
 0x173   : > { %5271 = vmatpush3.bf16.xpose.msk.msra.mxu0 %vm6890_vm3, %v5266_v1  ;;  %4811 = vmatmul.mubr.msk.f32.gmra.mrb[4].mxu1 %vm896_vm2, %v693_v15  ;;  %v798_v1 = vld [vmem:[%s6604_s29 + $0x1f0] sm:$0xff] }
 0x174   : > { %5319 = vmatpush3.bf16.xpose.msk.msra.mxu1 %vm6890_vm3, %v5314_v3  ;;  %5274 = vmatprep.subr.msk.bf16.mxu0 %vm6890_vm3, %v5272_v14  ;;  %v5302_v3 = vpack.c.bf16 %v783_v0, %v782_v63  ;;  %v5350_v4 = vpack.c.bf16 %v799_v2, %v798_v1  ;;  %v818_v15 = vld [vmem:[%s6611_s0 + $0x90] sm:$0xff]  ;;  %v719_v63 = vld [vmem:[%s6596_s26 + $0x178] sm:$0xff] }
 0x175   : > { %5322 = vmatprep.subr.msk.bf16.mxu1 %vm6890_vm3, %v5320_v16  ;;  %4757 = vmatprep.mubr.msk.f32.mxu0 %vm896_vm2, %v678_v17  ;;  %v721_v17 = vld [vmem:[%s6596_s26 + $0x188] sm:$0xff]  ;;  %v735_v0 = vld [vmem:[%s6596_s26 + $0x1f8] sm:$0xff]  ;;  %v810_v1 = vld [vmem:[%s6611_s0 + $0x50] sm:$0xff] }
 0x176   : > { %4758 = vmatmul.mubr.msk.f32.gmra.mrb[6].mxu0 %vm896_vm2, %v679_v18  ;;  %4813 = vmatprep.mubr.msk.f32.mxu1 %vm896_vm2, %v694_v19  ;;  %v706_v18 = vld [vmem:[%s6596_s26 + $0x110] sm:$0xff]  ;;  %v811_v2 = vld [vmem:[%s6611_s0 + $0x58] sm:$0xff] }
 0x177   : > { %4814 = vmatmul.mubr.msk.f32.gmra.mrb[6].mxu1 %vm896_vm2, %v695_v20  ;;  %4760 = vmatprep.mubr.msk.f32.mxu0 %vm896_vm2, %v680_v21  ;;  %v722_v19 = vld [vmem:[%s6596_s26 + $0x190] sm:$0xff]  ;;  %v5360_v20 = vpack.c.bf16 %v803_v13, %v802_v12  ;;  %v804_v21 = vld [vmem:[%s6611_s0 + $0x20] sm:$0xff]  ;;  %v829_v12 = vld [vmem:[%s6611_s0 + $0xe8] sm:$0xff] }
 0x178   : > { %4816 = vmatprep.mubr.msk.f32.mxu1 %vm896_vm2, %v696_v24  ;;  %v820_v24 = vld [vmem:[%s6611_s0 + $0xa0] sm:$0xff] }
 0x17a   : > { %4761 = vmatmul.mubr.msk.f32.gmra.mrb[8].mxu0 %vm896_vm2, %v681_v27  ;;  %v708_v27 = vld [vmem:[%s6596_s26 + $0x120] sm:$0xff] }
 0x17b   : > { %5277 = vmatpush3.bf16.xpose.msk.msra.mxu0 %vm6890_vm3, %v5272_v14  ;;  %4817 = vmatmul.mubr.msk.f32.gmra.mrb[8].mxu1 %vm896_vm2, %v697_v29  ;;  %v705_v14 = vld [vmem:[%s6596_s26 + $0x108] sm:$0xff]  ;;  %v5364_v29 = vpack.c.bf16 %v805_v22, %v804_v21  ;;  %v848_v21 = vld [vmem:[%s6611_s0 + $0x180] sm:$0xff] }
 0x17c   : > { %5325 = vmatpush3.bf16.xpose.msk.msra.mxu1 %vm6890_vm3, %v5320_v16  ;;  %5280 = vmatprep.subr.msk.bf16.mxu0 %vm6890_vm3, %v5278_v28  ;;  %v819_v16 = vld [vmem:[%s6611_s0 + $0x98] sm:$0xff] }
 0x17d   : > { %5328 = vmatprep.subr.msk.bf16.mxu1 %vm6890_vm3, %v5326_v30  ;;  %4763 = vmatprep.mubr.msk.f32.mxu0 %vm896_vm2, %v682_v31  ;;  %v5392_v5 = vpack.c.bf16 %v819_v16, %v818_v15  ;;  %v709_v31 = vld [vmem:[%s6596_s26 + $0x128] sm:$0xff]  ;;  %v815_v15 = vld [vmem:[%s6611_s0 + $0x78] sm:$0xff]  ;;  %v830_v16 = vld [vmem:[%s6611_s0 + $0xf0] sm:$0xff] }
 0x17e   : > { %4764 = vmatmul.mubr.msk.f32.gmra.mrb[10].mxu0 %vm896_vm2, %v683_v32  ;;  %4819 = vmatprep.mubr.msk.f32.mxu1 %vm896_vm2, %v698_v33  ;;  %v725_v32 = vld [vmem:[%s6596_s26 + $0x1a8] sm:$0xff]  ;;  %v710_v33 = vld [vmem:[%s6596_s26 + $0x130] sm:$0xff] }
 0x17f   : > { %4820 = vmatmul.mubr.msk.f32.gmra.mrb[10].mxu1 %vm896_vm2, %v699_v34  ;;  %4766 = vmatprep.mubr.msk.f32.mxu0 %vm896_vm2, %v684_v35  ;;  %v726_v34 = vld [vmem:[%s6596_s26 + $0x1b0] sm:$0xff]  ;;  %v711_v35 = vld [vmem:[%s6596_s26 + $0x138] sm:$0xff] }
 0x180   : > { %4822 = vmatprep.mubr.msk.f32.mxu1 %vm896_vm2, %v700_v38  ;;  %v728_v38 = vld [vmem:[%s6596_s26 + $0x1c0] sm:$0xff] }
 0x182   : > { %4767 = vmatmul.mubr.msk.f32.gmra.mrb[12].mxu0 %vm896_vm2, %v685_v41  ;;  %v714_v41 = vld [vmem:[%s6596_s26 + $0x150] sm:$0xff] }
 0x183   : > { %5283 = vmatpush3.bf16.xpose.msk.msra.mxu0 %vm6890_vm3, %v5278_v28  ;;  %4823 = vmatmul.mubr.msk.f32.gmra.mrb[12].mxu1 %vm896_vm2, %v701_v43  ;;  %v724_v28 = vld [vmem:[%s6596_s26 + $0x1a0] sm:$0xff]  ;;  %v715_v43 = vld [vmem:[%s6596_s26 + $0x158] sm:$0xff] }
 0x184   : > { %5331 = vmatpush3.bf16.xpose.msk.msra.mxu1 %vm6890_vm3, %v5326_v30  ;;  %5286 = vmatprep.subr.msk.bf16.mxu0 %vm6890_vm3, %v5284_v42  ;;  %v5396_v30 = vpack.c.bf16 %v821_v25, %v820_v24 }
 0x185   : > { %5334 = vmatprep.subr.msk.bf16.mxu1 %vm6890_vm3, %v5332_v44  ;;  %4769 = vmatprep.mubr.msk.f32.mxu0 %vm896_vm2, %v686_v45  ;;  %v807_v45 = vld [vmem:[%s6611_s0 + $0x38] sm:$0xff] }
 0x186   : > { %4770 = vmatmul.mubr.msk.f32.gmra.mrb[14].mxu0 %vm896_vm2, %v687_v46  ;;  %4825 = vmatprep.mubr.msk.f32.mxu1 %vm896_vm2, %v702_v47  ;;  %v822_v46 = vld [vmem:[%s6611_s0 + $0xb0] sm:$0xff]  ;;  %v731_v47 = vld [vmem:[%s6596_s26 + $0x1d8] sm:$0xff] }
 0x187   : > { %4826 = vmatmul.mubr.msk.f32.gmra.mrb[14].mxu1 %vm896_vm2, %v703_v48  ;;  %4860 = vmatprep.mubr.msk.f32.mxu0 %vm896_vm2, %v704_v49  ;;  %v716_v48 = vld [vmem:[%s6596_s26 + $0x160] sm:$0xff] }
 0x188   : > { %4916 = vmatprep.mubr.msk.f32.mxu1 %vm896_vm2, %v720_v52  ;;  %v5400_v52 = vpack.c.bf16 %v823_v50, %v822_v46 }
 0x18b   : > { %5289 = vmatpush3.bf16.xpose.msk.msra.mxu0 %vm6890_vm3, %v5284_v42  ;;  %v730_v42 = vld [vmem:[%s6596_s26 + $0x1d0] sm:$0xff] }
 0x18c   : > { %5337 = vmatpush3.bf16.xpose.msk.msra.mxu1 %vm6890_vm3, %v5332_v44  ;;  %5292 = vmatprep.subr.msk.bf16.mxu0 %vm6890_vm3, %v5290_v55  ;;  %v806_v44 = vld [vmem:[%s6611_s0 + $0x30] sm:$0xff] }
 0x18d   : > { %5340 = vmatprep.subr.msk.bf16.mxu1 %vm6890_vm3, %v5338_v56  ;;  %v5368_v49 = vpack.c.bf16 %v807_v45, %v806_v44 }
 0x193   : > { %5295 = vmatpush3.bf16.xpose.msk.msra.mxu0 %vm6890_vm3, %v5290_v55  ;;  %v718_v55 = vld [vmem:[%s6596_s26 + $0x170] sm:$0xff] }
 0x194   : > { %5343 = vmatpush3.bf16.xpose.msk.msra.mxu1 %vm6890_vm3, %v5338_v56  ;;  %5298 = vmatprep.subr.msk.bf16.mxu0 %vm6890_vm3, %v5296_v61  ;;  %v808_v56 = vld [vmem:[%s6611_s0 + $0x40] sm:$0xff] }
 0x195   : > { %5346 = vmatprep.subr.msk.bf16.mxu1 %vm6890_vm3, %v5344_v62  ;;  %v5372_v60 = vpack.c.bf16 %v809_v57, %v808_v56 }
 0x19b   : > { %5301 = vmatpush3.bf16.xpose.msk.msra.mxu0 %vm6890_vm3, %v5296_v61  ;;  %v825_v61 = vld [vmem:[%s6611_s0 + $0xc8] sm:$0xff] }
 0x19c   : > { %5349 = vmatpush3.bf16.xpose.msk.msra.mxu1 %vm6890_vm3, %v5344_v62  ;;  %5304 = vmatprep.subr.msk.bf16.mxu0 %vm6890_vm3, %v5302_v3  ;;  %v5404_v62 = vpack.c.bf16 %v825_v61, %v824_v58 }
 0x19d   : > { %5352 = vmatprep.subr.msk.bf16.mxu1 %vm6890_vm3, %v5350_v4 }
 0x1a3   : > { %5307 = vmatpush3.bf16.xpose.msk.msra.mxu0 %vm6890_vm3, %v5302_v3  ;;  %v826_v3 = vld [vmem:[%s6611_s0 + $0xd0] sm:$0xff] }
 0x1a4   : > { %5355 = vmatpush3.bf16.xpose.msk.msra.mxu1 %vm6890_vm3, %v5350_v4  ;;  %5357 = vmatprep.subr.bf16.mxu0 %v5356_v10  ;;  %v5376_v4 = vpack.c.bf16 %v811_v2, %v810_v1  ;;  %v5408_v7 = vpack.c.bf16 %v827_v6, %v826_v3 }
 0x1a5   : > { %5389 = vmatprep.subr.bf16.mxu1 %v5388_v11 }
 0x1aa   : > { %4861 = vmatmul.mubr.msk.f32.vlgmr.msra.gmra.mrb[16].mxu0 %vm896_vm2, %v705_v14  ;;  %v814_v14 = vld [vmem:[%s6611_s0 + $0x70] sm:$0xff] }
 0x1ab   : > { %4917 = vmatmul.mubr.msk.f32.vlgmr.msra.gmra.mrb[16].mxu1 %vm896_vm2, %v721_v17  ;;  %4863 = vmatprep.mubr.msk.f32.mxu0 %vm896_vm2, %v706_v18  ;;  %v5384_v17 = vpack.c.bf16 %v815_v15, %v814_v14  ;;  %v831_v18 = vld [vmem:[%s6611_s0 + $0xf8] sm:$0xff] }
 0x1ac   : > { %4919 = vmatprep.mubr.msk.f32.mxu1 %vm896_vm2, %v722_v19  ;;  %5359 = vmatpush3.bf16.msra.mxu0 %v5356_v10  ;;  %v828_v10 = vld [vmem:[%s6611_s0 + $0xe0] sm:$0xff]  ;;  %v5416_v19 = vpack.c.bf16 %v831_v18, %v830_v16 }
 0x1ad   : > { %5391 = vmatpush3.bf16.msra.mxu1 %v5388_v11  ;;  %5361 = vmatprep.subr.bf16.mxu0 %v5360_v20  ;;  %v5380_v11 = vpack.c.bf16 %v813_v9, %v812_v8  ;;  %v5412_v13 = vpack.c.bf16 %v829_v12, %v828_v10 }
 0x1ae   : > { %4864 = vmatmul.mubr.msk.f32.gmra.mrb[18].mxu0 %vm896_vm2, %v707_v23  ;;  %5393 = vmatprep.subr.bf16.mxu1 %v5392_v5  ;;  %v849_v23 = vld [vmem:[%s6611_s0 + $0x188] sm:$0xff] }
 0x1af   : > { %4920 = vmatmul.mubr.msk.f32.gmra.mrb[18].mxu1 %vm896_vm2, %v723_v26  ;;  %4866 = vmatprep.mubr.msk.f32.mxu0 %vm896_vm2, %v708_v27  ;;  %v7249_v24 = vpack.c.bf16 %v849_v23, %v848_v21 }
 0x1b0   : > { %4922 = vmatprep.mubr.msk.f32.mxu1 %vm896_vm2, %v724_v28  ;;  %5363 = vmatpush3.bf16.msra.mxu0 %v5360_v20  ;;  %v832_v20 = vld [vmem:[%s6611_s0 + $0x100] sm:$0xff] }
 0x1b1   : > { %5395 = vmatpush3.bf16.msra.mxu1 %v5392_v5  ;;  %5365 = vmatprep.subr.bf16.mxu0 %v5364_v29  ;;  %v833_v5 = vld [vmem:[%s6611_s0 + $0x108] sm:$0xff] }
 0x1b2   : > { %4867 = vmatmul.mubr.msk.f32.gmra.mrb[20].mxu0 %vm896_vm2, %v709_v31  ;;  %5397 = vmatprep.subr.bf16.mxu1 %v5396_v30  ;;  %v7246_v22 = vpack.c.bf16 %v833_v5, %v832_v20 }
 0x1b3   : > { %4923 = vmatmul.mubr.msk.f32.gmra.mrb[20].mxu1 %vm896_vm2, %v725_v32  ;;  %4869 = vmatprep.mubr.msk.f32.mxu0 %vm896_vm2, %v710_v33 }
 0x1b4   : > { %4925 = vmatprep.mubr.msk.f32.mxu1 %vm896_vm2, %v726_v34  ;;  %5367 = vmatpush3.bf16.msra.mxu0 %v5364_v29 }
 0x1b5   : > { %5399 = vmatpush3.bf16.msra.mxu1 %v5396_v30  ;;  %5369 = vmatprep.subr.bf16.mxu0 %v5368_v49 }
 0x1b6   : > { %4870 = vmatmul.mubr.msk.f32.gmra.mrb[22].mxu0 %vm896_vm2, %v711_v35  ;;  %5401 = vmatprep.subr.bf16.mxu1 %v5400_v52 }
 0x1b7   : > { %4926 = vmatmul.mubr.msk.f32.gmra.mrb[22].mxu1 %vm896_vm2, %v727_v36  ;;  %4872 = vmatprep.mubr.msk.f32.mxu0 %vm896_vm2, %v712_v37 }
 0x1b8   : > { %4928 = vmatprep.mubr.msk.f32.mxu1 %vm896_vm2, %v728_v38  ;;  %5371 = vmatpush3.bf16.msra.mxu0 %v5368_v49 }
 0x1b9   : > { %5403 = vmatpush3.bf16.msra.mxu1 %v5400_v52  ;;  %5373 = vmatprep.subr.bf16.mxu0 %v5372_v60  ;;  %v4422_v52 = vld [vmem:[%s6618_s3] sm:$0xff]  }
 0x1ba   : > { %4873 = vmatmul.mubr.msk.f32.gmra.mrb[24].mxu0 %vm896_vm2, %v713_v39  ;;  %5405 = vmatprep.subr.bf16.mxu1 %v5404_v62 }
 0x1bb   : > { %4929 = vmatmul.mubr.msk.f32.gmra.mrb[24].mxu1 %vm896_vm2, %v729_v40  ;;  %4875 = vmatprep.mubr.msk.f32.mxu0 %vm896_vm2, %v714_v41 }
 0x1bc   : > { %4931 = vmatprep.mubr.msk.f32.mxu1 %vm896_vm2, %v730_v42  ;;  %5375 = vmatpush3.bf16.msra.mxu0 %v5372_v60  ;;  %v7254_v60 = vunpack.c.h.bf16 %v4422_v52 }
 0x1bd   : > { %5407 = vmatpush3.bf16.msra.mxu1 %v5404_v62  ;;  %5377 = vmatprep.subr.bf16.mxu0 %v5376_v4  ;;  %v4453_v62 = vld [vmem:[%s6618_s3 + $0x8] sm:$0xff]  }
 0x1be   : > { %4876 = vmatmul.mubr.msk.f32.gmra.mrb[26].mxu0 %vm896_vm2, %v715_v43  ;;  %5409 = vmatprep.subr.bf16.mxu1 %v5408_v7  ;;  %v7259_v10 = vunpack.c.h.bf16 %v4453_v62  ;;  %v7261_v12 = vunpack.c.l.bf16 %v4453_v62 }
 0x1bf   : > { %4932 = vmatmul.mubr.msk.f32.gmra.mrb[26].mxu1 %vm896_vm2, %v731_v47  ;;  %4878 = vmatprep.mubr.msk.f32.mxu0 %vm896_vm2, %v716_v48 }
 0x1c0   : > { %4934 = vmatprep.mubr.msk.f32.mxu1 %vm896_vm2, %v732_v51  ;;  %5379 = vmatpush3.bf16.msra.mxu0 %v5376_v4  ;;  %v7257_v4 = vunpack.c.l.bf16 %v4422_v52 }
 0x1c1   : > { %5411 = vmatpush3.bf16.msra.mxu1 %v5408_v7  ;;  %5381 = vmatprep.subr.bf16.mxu0 %v5380_v11 }
 0x1c2   : > { %4879 = vmatmul.mubr.msk.f32.gmra.mrb[28].mxu0 %vm896_vm2, %v717_v53  ;;  %5413 = vmatprep.subr.bf16.mxu1 %v5412_v13 }
 0x1c3   : > { %4935 = vmatmul.mubr.msk.f32.gmra.mrb[28].mxu1 %vm896_vm2, %v733_v54  ;;  %4881 = vmatprep.mubr.msk.f32.mxu0 %vm896_vm2, %v718_v55 }
 0x1c4   : > { %4937 = vmatprep.mubr.msk.f32.mxu1 %vm896_vm2, %v734_v59  ;;  %5383 = vmatpush3.bf16.msra.mxu0 %v5380_v11 }
 0x1c5   : > { %5415 = vmatpush3.bf16.msra.mxu1 %v5412_v13  ;;  %5385 = vmatprep.subr.bf16.mxu0 %v5384_v17 }
 0x1c6   : > { %4882 = vmatmul.mubr.msk.f32.gmra.mrb[30].mxu0 %vm896_vm2, %v719_v63  ;;  %5417 = vmatprep.subr.bf16.mxu1 %v5416_v19 }
 0x1c7   : > { %4938 = vmatmul.mubr.msk.f32.gmra.mrb[30].mxu1 %vm896_vm2, %v735_v0 }
 0x1c8   : > { %5387 = vmatpush3.bf16.msra.mxu0 %v5384_v17 }
 0x1c9   : > { %5419 = vmatpush3.bf16.msra.mxu1 %v5416_v19  ;;  %5421 = vmatprep.subr.bf16.mxu0 %v7246_v22 }
 0x1ca   : > { %5453 = vmatprep.subr.bf16.mxu1 %v7249_v24 }
 0x23d   : > { %v4750_v25 = vpop.f32.mrb[0].mxu0 }
 0x23e   : > { %v4347_v26 = vclamps-f32 %v4750_v25, 5.0  ;;  %v4806_v27 = vpop.f32.mrb[0].mxu1  ;;  %v1059_v28 = vpop.f32.mrb[1].mxu0 }
 0x23f   : > { %v4363_v29 = vclamps-f32 %v4806_v27, 5.0  ;;  %v4346_v30 = vclamps-f32 %v1059_v28, 5.0  ;;  %v1300_v31 = vpop.f32.mrb[1].mxu1 }
 0x240   : > { %v1991_v32 = vmul.f32 1.442695, %v4347_v26  ;;  %v4362_v33 = vclamps-f32 %v1300_v31, 5.0  ;;  %v834_v31 = vld [vmem:[%s6611_s0 + $0x110] sm:$0xff] }
 0x241   : > { %v2023_v34 = vmul.f32 1.442695, %v4363_v29  ;;  %v1989_v35 = vmul.f32 1.442695, %v4346_v30  ;;  %v4753_v36 = vpop.f32.mrb[2].mxu0  ;;  %v4454_v29 = vld [vmem:[%s6618_s3 + $0x10] sm:$0xff]  }
 0x242   : > { %5700 = vpow2.f32 %v1991_v32  ;;  %v2021_v37 = vmul.f32 1.442695, %v4362_v33  ;;  %v4349_v38 = vclamps-f32 %v4753_v36, 5.0  ;;  %v4809_v39 = vpop.f32.mrb[2].mxu1  ;;  %v1069_v40 = vpop.f32.mrb[3].mxu0  ;;  %v835_v32 = vld [vmem:[%s6611_s0 + $0x118] sm:$0xff] }
 0x243   : > { %5702 = vpow2.f32 %v2023_v34  ;;  %v4365_v41 = vclamps-f32 %v4809_v39, 5.0  ;;  %v4348_v42 = vclamps-f32 %v1069_v40, 5.0  ;;  %v1310_v43 = vpop.f32.mrb[3].mxu1 }
 0x244   : > { %5704 = vpow2.f32 %v1989_v35  ;;  %v1995_v44 = vmul.f32 1.442695, %v4349_v38  ;;  %v4364_v45 = vclamps-f32 %v1310_v43, 5.0 }
 0x245   : > { %5706 = vpow2.f32 %v2021_v37  ;;  %v2027_v46 = vmul.f32 1.442695, %v4365_v41  ;;  %v1993_v47 = vmul.f32 1.442695, %v4348_v42  ;;  %v4756_v48 = vpop.f32.mrb[4].mxu0  ;;  %v7273_v42 = vunpack.c.l.bf16 %v4454_v29 }
 0x246   : > { %5708 = vpow2.f32 %v1995_v44  ;;  %v2025_v49 = vmul.f32 1.442695, %v4364_v45  ;;  %v4351_v50 = vclamps-f32 %v4756_v48, 5.0  ;;  %v1079_v51 = vpop.f32.mrb[5].mxu0  ;;  %v4812_v53 = vpop.f32.mrb[4].mxu1  ;;  %v851_v48 = vld [vmem:[%s6611_s0 + $0x198] sm:$0xff] }
 0x247   : > { %5710 = vpow2.f32 %v2027_v46  ;;  %v4350_v54 = vclamps-f32 %v1079_v51, 5.0  ;;  %v4367_v55 = vclamps-f32 %v4812_v53, 5.0  ;;  %v1320_v56 = vpop.f32.mrb[5].mxu1  ;;  %v7277_v46 = vpack.c.bf16 %v835_v32, %v834_v31 }
 0x248   : > { %5712 = vpow2.f32 %v1993_v47  ;;  %v1999_v57 = vmul.f32 1.442695, %v4351_v50  ;;  %v4366_v58 = vclamps-f32 %v1320_v56, 5.0  ;;  %v850_v47 = vld [vmem:[%s6611_s0 + $0x190] sm:$0xff] }
 0x249   : > { %5714 = vpow2.f32 %v2025_v49  ;;  %v1997_v59 = vmul.f32 1.442695, %v4350_v54  ;;  %v2031_v61 = vmul.f32 1.442695, %v4367_v55  ;;  %v4759_v63 = vpop.f32.mrb[6].mxu0 }
 0x24a   : > { %v2029_v0 = vmul.f32 1.442695, %v4366_v58  ;;  %v4353_v1 = vclamps-f32 %v4759_v63, 5.0  ;;  %v1089_v2 = vpop.f32.mrb[7].mxu0  ;;  %v4815_v3 = vpop.f32.mrb[6].mxu1  ;;  %v5456_v63 = vpack.c.bf16 %v851_v48, %v850_v47 }
 0x24b   : > { %5716 = vpow2.f32 %v1997_v59  ;;  %v4352_v6 = vclamps-f32 %v1089_v2, 5.0  ;;  %v4369_v7 = vclamps-f32 %v4815_v3, 5.0  ;;  %v1330_v8 = vpop.f32.mrb[7].mxu1  ;;  %v852_v2 = vld [vmem:[%s6611_s0 + $0x1a0] sm:$0xff] }
 0x24c   : > { %v5701_v9 = vpop.eup %5700  ;;  %5718 = vpow2.f32 %v1999_v57  ;;  %v4368_v11 = vclamps-f32 %v1330_v8, 5.0  ;;  %v2003_v15 = vmul.f32 1.442695, %v4353_v1  ;;  %v4455_v57 = vld [vmem:[%s6618_s3 + $0x18] sm:$0xff]   ;;  %v837_v1 = vld [vmem:[%s6611_s0 + $0x128] sm:$0xff] }
 0x24d   : > { %v5703_v13 = vpop.eup %5702  ;;  %v2118_v14 = vmul.f32 %v5701_v9, %v7254_v60  ;;  %5720 = vpow2.f32 %v2029_v0  ;;  %v2001_v16 = vmul.f32 1.442695, %v4352_v6  ;;  %v4762_v17 = vpop.f32.mrb[8].mxu0  ;;  %v2035_v20 = vmul.f32 1.442695, %v4369_v7  ;;  %v836_v0 = vld [vmem:[%s6611_s0 + $0x120] sm:$0xff] }
 0x24e   : > { %v5705_v18 = vpop.eup %5704  ;;  %v2134_v19 = vmul.f32 %v5703_v13, %v7254_v60  ;;  %5722 = vpow2.f32 %v2031_v61  ;;  %v2033_v5 = vmul.f32 1.442695, %v4368_v11  ;;  %v1099_v21 = vpop.f32.mrb[9].mxu0  ;;  %v4355_v27 = vclamps-f32 %v4762_v17, 5.0  ;;  %v853_v11 = vld [vmem:[%s6611_s0 + $0x1a8] sm:$0xff] }
 0x24f   : > { %v4818_v23 = vpop.f32.mrb[8].mxu1  ;;  %v5707_v25 = vpop.eup %5706  ;;  %2247 = vadd.xlane.f32.xlu0 %v2118_v14  ;;  %v2117_v26 = vmul.f32 %v5705_v18, %v7257_v4  ;;  %5724 = vpow2.f32 %v2001_v16  ;;  %v4354_v28 = vclamps-f32 %v1099_v21, 5.0  ;;  %v7296_v6 = vunpack.c.h.bf16 %v4454_v29  ;;  %v838_v29 = vld [vmem:[%s6611_s0 + $0x130] sm:$0xff] }
 0x250   : > { %v1340_v30 = vpop.f32.mrb[9].mxu1  ;;  %v5709_v33 = vpop.eup %5708  ;;  %2279 = vadd.xlane.f32.xlu1 %v2134_v19  ;;  %v2133_v34 = vmul.f32 %v5707_v25, %v7257_v4  ;;  %v4371_v35 = vclamps-f32 %v4818_v23, 5.0  ;;  %5726 = vpow2.f32 %v2033_v5  ;;  %v2007_v51 = vmul.f32 1.442695, %v4355_v27  ;;  %v4456_v25 = vld [vmem:[%s6618_s3 + $0x20] sm:$0xff]  }
 0x251   : > { %v4370_v36 = vclamps-f32 %v1340_v30, 5.0  ;;  %v5711_v37 = vpop.eup %5710  ;;  %4972 = vmatprep.mubr.f32.mxu0 %v2117_v26  ;;  %v2120_v38 = vmul.f32 %v5709_v33, %v7259_v10  ;;  %v2005_v39 = vmul.f32 1.442695, %v4354_v28  ;;  %v7271_v40 = vpop.f32.mrb[10].mxu0  ;;  %5728 = vpow2.f32 %v2003_v15 }
 0x252   : > { %v5713_v41 = vpop.eup %5712  ;;  %5028 = vmatprep.mubr.f32.mxu1 %v2133_v34  ;;  %4973 = vmatmul.mubr.f32.vlgmr.msra.gmra.mrb[32].mxu0 %v2118_v14  ;;  %v1109_v44 = vpop.f32.mrb[11].mxu0  ;;  %5730 = vpow2.f32 %v2035_v20  ;;  %v2136_v54 = vmul.f32 %v5711_v37, %v7259_v10  ;;  %v2039_v56 = vmul.f32 1.442695, %v4371_v35  ;;  %v4357_v61 = vclamps-f32 %v7271_v40, 5.0  ;;  %v839_v35 = vld [vmem:[%s6611_s0 + $0x138] sm:$0xff] }
 0x253   : > { %v2037_v43 = vmul.f32 1.442695, %v4370_v36  ;;  %v7275_v45 = vpop.f32.mrb[10].mxu1  ;;  %v5715_v49 = vpop.eup %5714  ;;  %5029 = vmatmul.mubr.f32.vlgmr.msra.gmra.mrb[32].mxu1 %v2134_v19  ;;  %2245 = vadd.xlane.f32.xlu0 %v2117_v26  ;;  %v7282_v50 = vmul.f32 %v5713_v41, %v7261_v12  ;;  %v4356_v52 = vclamps-f32 %v1109_v44, 5.0  ;;  %5732 = vpow2.f32 %v2005_v39  ;;  %v854_v41 = vld [vmem:[%s6611_s0 + $0x1b0] sm:$0xff] }
 0x254   : > { %v1350_v53 = vpop.f32.mrb[11].mxu1  ;;  %2251 = vadd.xlane.f32.xlu1 %v2120_v38  ;;  %v2135_v55 = vmul.f32 %v5715_v49, %v7261_v12  ;;  %5423 = vmatpush3.bf16.msra.mxu0 %v7246_v22  ;;  %v4373_v7 = vclamps-f32 %v7275_v45, 5.0  ;;  %v7306_v19 = vunpack.c.l.bf16 %v4455_v57  ;;  %v2011_v21 = vmul.f32 1.442695, %v4357_v61 }
 0x255   : > { %v4372_v58 = vclamps-f32 %v1350_v53, 5.0  ;;  %v5717_v59 = vpop.eup %5716  ;;  %v7289_v62 = vpop.f32.mrb[12].mxu0  ;;  %4975 = vmatprep.mubr.f32.mxu0 %v7282_v50  ;;  %5455 = vmatpush3.bf16.msra.mxu1 %v7249_v24  ;;  %5734 = vpow2.f32 %v2037_v43  ;;  %v2009_v22 = vmul.f32 1.442695, %v4356_v52  ;;  %v7309_v23 = vunpack.c.h.bf16 %v4455_v57  ;;  %v855_v43 = vld [vmem:[%s6611_s0 + $0x1b8] sm:$0xff] }
 0x256   : > { %v5719_v3 = vpop.eup %5718  ;;  %v1119_v8 = vpop.f32.mrb[13].mxu0  ;;  %5031 = vmatprep.mubr.f32.mxu1 %v2135_v55  ;;  %4976 = vmatmul.mubr.f32.gmra.mrb[34].mxu0 %v2120_v38  ;;  %5736 = vpow2.f32 %v2007_v51  ;;  %v2121_v24 = vmul.f32 %v5717_v59, %v7273_v42  ;;  %v5428_v27 = vpack.c.bf16 %v837_v1, %v836_v0  ;;  %v5460_v28 = vpack.c.bf16 %v853_v11, %v852_v2  ;;  %v4457_v1 = vld [vmem:[%s6618_s3 + $0x28] sm:$0xff]  }
 0x257   : > { %v7299_v9 = vpop.f32.mrb[12].mxu1  ;;  %v5721_v13 = vpop.eup %5720  ;;  %2277 = vadd.xlane.f32.xlu0 %v2133_v34  ;;  %v2041_v14 = vmul.f32 1.442695, %v4372_v58  ;;  %v4358_v15 = vclamps-f32 %v1119_v8, 5.0  ;;  %5032 = vmatmul.mubr.f32.gmra.mrb[34].mxu1 %v2136_v54  ;;  %5738 = vpow2.f32 %v2039_v56  ;;  %v2122_v30 = vmul.f32 %v5719_v3, %v7296_v6 }
 0x258   : > { %v1360_v16 = vpop.f32.mrb[13].mxu1  ;;  %v5723_v17 = vpop.eup %5722  ;;  %2283 = vadd.xlane.f32.xlu1 %v2136_v54  ;;  %v7304_v18 = vmul.f32 %v5721_v13, %v7273_v42  ;;  %5425 = vmatprep.subr.bf16.mxu0 %v7277_v46  ;;  %5740 = vpow2.f32 %v2009_v22  ;;  %v2043_v31 = vmul.f32 1.442695, %v4373_v7  ;;  %v4359_v32 = vclamps-f32 %v7289_v62, 5.0  ;;  %v840_v22 = vld [vmem:[%s6611_s0 + $0x140] sm:$0xff]  ;;  %v841_v7 = vld [vmem:[%s6611_s0 + $0x148] sm:$0xff] }
 0x259   : > { %v4374_v20 = vclamps-f32 %v1360_v16, 5.0  ;;  %v5725_v5 = vpop.eup %5724  ;;  %v7312_v26 = vpop.f32.mrb[14].mxu0  ;;  %5457 = vmatprep.subr.bf16.mxu1 %v5456_v63  ;;  %4978 = vmatprep.mubr.f32.mxu0 %v2121_v24  ;;  %v7321_v37 = vmul.f32 %v5723_v17, %v7296_v6  ;;  %5742 = vpow2.f32 %v2041_v14  ;;  %v2013_v38 = vmul.f32 1.442695, %v4358_v15  ;;  %v856_v13 = vld [vmem:[%s6611_s0 + $0x1c0] sm:$0xff] }
 0x25a   : > { %v1129_v33 = vpop.f32.mrb[15].mxu0  ;;  %5034 = vmatprep.mubr.f32.mxu1 %v7304_v18  ;;  %5427 = vmatpush3.bf16.msra.mxu0 %v7277_v46  ;;  %v4827_v34 = vpop.f32.mrb[14].mxu1  ;;  %v4375_v39 = vclamps-f32 %v7299_v9, 5.0  ;;  %v7328_v45 = vmul.f32 %v5725_v5, %v7306_v19  ;;  %v7330_v46 = vunpack.c.l.bf16 %v4456_v25  ;;  %5744 = vpow2.f32 %v2011_v21 }
 0x25b   : > { %v5727_v36 = vpop.eup %5726  ;;  %2281 = vadd.xlane.f32.xlu0 %v2135_v55  ;;  %5459 = vmatpush3.bf16.msra.mxu1 %v5456_v63  ;;  %v1370_v40 = vpop.f32.mrb[15].mxu1  ;;  %v2045_v47 = vmul.f32 1.442695, %v4374_v20  ;;  %v4360_v52 = vclamps-f32 %v1129_v33, 5.0  ;;  %v5432_v53 = vpack.c.bf16 %v839_v35, %v838_v29  ;;  %5746 = vpow2.f32 %v2043_v31  ;;  %v843_v29 = vld [vmem:[%s6611_s0 + $0x158] sm:$0xff] }
 0x25c   : > { %v5729_v44 = vpop.eup %5728  ;;  %2249 = vadd.xlane.f32.xlu1 %v7282_v50  ;;  %4979 = vmatmul.mubr.f32.gmra.mrb[36].mxu0 %v2122_v30  ;;  %v4376_v48 = vclamps-f32 %v1370_v40, 5.0  ;;  %v7333_v51 = vmul.f32 %v5727_v36, %v7306_v19  ;;  %v2015_v50 = vmul.f32 1.442695, %v4359_v32  ;;  %v4377_v54 = vclamps-f32 %v4827_v34, 5.0  ;;  %v858_v32 = vld [vmem:[%s6611_s0 + $0x1d0] sm:$0xff]  ;;  %v859_v33 = vld [vmem:[%s6611_s0 + $0x1d8] sm:$0xff] }
 0x25d   : > { %v5731_v49 = vpop.eup %5730  ;;  %5035 = vmatmul.mubr.f32.gmra.mrb[36].mxu1 %v7321_v37  ;;  %5429 = vmatprep.subr.bf16.mxu0 %v5428_v27  ;;  %v5464_v55 = vpack.c.bf16 %v855_v43, %v854_v41  ;;  %v2124_v57 = vmul.f32 %v5729_v44, %v7309_v23  ;;  %5748 = vpow2.f32 %v2013_v38  ;;  %v2047_v58 = vmul.f32 1.442695, %v4375_v39 }
 0x25e   : > { %5461 = vmatprep.subr.bf16.mxu1 %v5460_v28  ;;  %4981 = vmatprep.mubr.f32.mxu0 %v7328_v45  ;;  %v5733_v56 = vpop.eup %5732  ;;  %v4361_v59 = vclamps-f32 %v7312_v26, 5.0  ;;  %v7341_v62 = vmul.f32 %v5731_v49, %v7309_v23  ;;  %v7343_v63 = vunpack.c.h.bf16 %v4456_v25  ;;  %5750 = vpow2.f32 %v2045_v47  ;;  %v4458_v25 = vld [vmem:[%s6618_s3 + $0x30] sm:$0xff]   ;;  %v844_v47 = vld [vmem:[%s6611_s0 + $0x160] sm:$0xff] }
 0x25f   : > { %2253 = vadd.xlane.f32.xlu0 %v2121_v24  ;;  %5037 = vmatprep.mubr.f32.mxu1 %v7333_v51  ;;  %v5735_v61 = vpop.eup %5734  ;;  %v2049_v0 = vmul.f32 1.442695, %v4376_v48  ;;  %v2017_v3 = vmul.f32 1.442695, %v4360_v52  ;;  %5752 = vpow2.f32 %v2015_v50  ;;  %v7349_v9 = vmul.f32 %v5733_v56, %v7330_v46  ;;  %v857_v24 = vld [vmem:[%s6611_s0 + $0x1c8] sm:$0xff] }
 0x260   : > { %2255 = vadd.xlane.f32.xlu1 %v2122_v30  ;;  %5431 = vmatpush3.bf16.msra.mxu0 %v5428_v27  ;;  %v5737_v2 = vpop.eup %5736  ;;  %v2051_v11 = vmul.f32 1.442695, %v4377_v54  ;;  %5754 = vpow2.f32 %v2047_v58  ;;  %v7356_v14 = vmul.f32 %v5735_v61, %v7330_v46  ;;  %v2019_v15 = vmul.f32 1.442695, %v4361_v59  ;;  %v845_v48 = vld [vmem:[%s6611_s0 + $0x168] sm:$0xff] }
 0x261   : > { %5463 = vmatpush3.bf16.msra.mxu1 %v5460_v28  ;;  %4982 = vmatmul.mubr.f32.gmra.mrb[38].mxu0 %v2124_v57  ;;  %v5739_v8 = vpop.eup %5738  ;;  %v7358_v16 = vunpack.c.l.bf16 %v4457_v1  ;;  %v7362_v20 = vmul.f32 %v5737_v2, %v7343_v63  ;;  %5756 = vpow2.f32 %v2049_v0  ;;  %v5468_v26 = vpack.c.bf16 %v857_v24, %v856_v13  ;;  %v842_v28 = vld [vmem:[%s6611_s0 + $0x150] sm:$0xff]  ;;  %v861_v50 = vld [vmem:[%s6611_s0 + $0x1e8] sm:$0xff] }
 0x262   : > { %5038 = vmatmul.mubr.f32.gmra.mrb[38].mxu1 %v7341_v62  ;;  %5433 = vmatprep.subr.bf16.mxu0 %v5432_v53  ;;  %v5741_v17 = vpop.eup %5740  ;;  %v7366_v21 = vmul.f32 %v5739_v8, %v7343_v63  ;;  %5758 = vpow2.f32 %v2017_v3  ;;  %v7370_v27 = vunpack.c.h.bf16 %v4457_v1  ;;  %v7385_v36 = vunpack.c.l.bf16 %v4458_v25 }
 0x263   : > { %2285 = vadd.xlane.f32.xlu0 %v7304_v18  ;;  %5465 = vmatprep.subr.bf16.mxu1 %v5464_v55  ;;  %v5436_v18 = vpack.c.bf16 %v841_v7, %v840_v22  ;;  %v5743_v5 = vpop.eup %5742  ;;  %5760 = vpow2.f32 %v2051_v11  ;;  %v7377_v31 = vmul.f32 %v5741_v17, %v7358_v16  ;;  %v5440_v38 = vpack.c.bf16 %v843_v29, %v842_v28  ;;  %v846_v22 = vld [vmem:[%s6611_s0 + $0x170] sm:$0xff]  ;;  %v847_v7 = vld [vmem:[%s6611_s0 + $0x178] sm:$0xff] }
 0x264   : > { %2287 = vadd.xlane.f32.xlu1 %v7321_v37  ;;  %4984 = vmatprep.mubr.f32.mxu0 %v7349_v9  ;;  %v5745_v30 = vpop.eup %5744  ;;  %5762 = vpow2.f32 %v2019_v15  ;;  %v7383_v35 = vmul.f32 %v5743_v5, %v7358_v16  ;;  %v5472_v41 = vpack.c.bf16 %v859_v33, %v858_v32  ;;  %v7392_v44 = vunpack.c.h.bf16 %v4458_v25  ;;  %v863_v11 = vld [vmem:[%s6611_s0 + $0x1f8] sm:$0xff] }
 0x265   : > { %5040 = vmatprep.mubr.f32.mxu1 %v7356_v14  ;;  %5435 = vmatpush3.bf16.msra.mxu0 %v5432_v53  ;;  %v5747_v34 = vpop.eup %5746  ;;  %v2128_v40 = vmul.f32 %v5745_v30, %v7370_v27  ;;  %v860_v53 = vld [vmem:[%s6611_s0 + $0x1e0] sm:$0xff]  ;;  %v5448_v15 = vpack.c.bf16 %v847_v7, %v846_v22 }
 0x266   : > { %5467 = vmatpush3.bf16.msra.mxu1 %v5464_v55  ;;  %4985 = vmatmul.mubr.f32.gmra.mrb[40].mxu0 %v7362_v20  ;;  %v2144_v43 = vmul.f32 %v5747_v34, %v7370_v27  ;;  %v5476_v61 = vpack.c.bf16 %v861_v50, %v860_v53 }
 0x267   : > { %2257 = vadd.xlane.f32.xlu0 %v7328_v45  ;;  %5041 = vmatmul.mubr.f32.gmra.mrb[40].mxu1 %v7366_v21  ;;  %v5749_v37 = vpop.eup %5748  ;;  %v4459_v45 = vld [vmem:[%s6618_s3 + $0x38] sm:$0xff]  }
 0x268   : > { %2259 = vadd.xlane.f32.xlu1 %v2124_v57  ;;  %5437 = vmatprep.subr.bf16.mxu0 %v5436_v18  ;;  %v5751_v39 = vpop.eup %5750  ;;  %v2129_v52 = vmul.f32 %v5749_v37, %v7385_v36  ;;  %v7404_v56 = vunpack.c.l.bf16 %v4459_v45  ;;  %v5444_v57 = vpack.c.bf16 %v845_v48, %v844_v47  ;;  %v7411_v1 = vunpack.c.h.bf16 %v4459_v45 }
 0x269   : > { %5469 = vmatprep.subr.bf16.mxu1 %v5468_v26  ;;  %4987 = vmatprep.mubr.f32.mxu0 %v7377_v31  ;;  %v5753_v49 = vpop.eup %5752 }
 0x26a   : > { %5043 = vmatprep.mubr.f32.mxu1 %v7383_v35  ;;  %5439 = vmatpush3.bf16.msra.mxu0 %v5436_v18  ;;  %v5755_v54 = vpop.eup %5754  ;;  %v2130_v59 = vmul.f32 %v5753_v49, %v7392_v44 }
 0x26b   : > { %2289 = vadd.xlane.f32.xlu0 %v7333_v51  ;;  %5471 = vmatpush3.bf16.msra.mxu1 %v5468_v26  ;;  %v7402_v51 = vmul.f32 %v5751_v39, %v7385_v36  ;;  %v5757_v55 = vpop.eup %5756  ;;  %v2146_v0 = vmul.f32 %v5755_v54, %v7392_v44 }
 0x26c   : > { %2291 = vadd.xlane.f32.xlu1 %v7341_v62  ;;  %4988 = vmatmul.mubr.f32.gmra.mrb[42].mxu0 %v2128_v40  ;;  %v5759_v58 = vpop.eup %5758  ;;  %v7414_v3 = vmul.f32 %v5757_v55, %v7404_v56 }
 0x26d   : > { %5044 = vmatmul.mubr.f32.gmra.mrb[42].mxu1 %v2144_v43  ;;  %5441 = vmatprep.subr.bf16.mxu0 %v5440_v38  ;;  %v5761_v62 = vpop.eup %5760  ;;  %v7419_v8 = vmul.f32 %v5759_v58, %v7404_v56 }
 0x26e   : > { %5473 = vmatprep.subr.bf16.mxu1 %v5472_v41  ;;  %4990 = vmatprep.mubr.f32.mxu0 %v2129_v52  ;;  %v5763_v2 = vpop.eup %5762  ;;  %v7425_v13 = vmul.f32 %v5761_v62, %v7411_v1 }
 0x26f   : > { %2261 = vadd.xlane.f32.xlu0 %v7349_v9  ;;  %5046 = vmatprep.mubr.f32.mxu1 %v7402_v51  ;;  %v862_v9 = vld [vmem:[%s6611_s0 + $0x1f0] sm:$0xff]  ;;  %v2132_v24 = vmul.f32 %v5763_v2, %v7411_v1 }
 0x270   : > { %2263 = vadd.xlane.f32.xlu1 %v7362_v20  ;;  %5443 = vmatpush3.bf16.msra.mxu0 %v5440_v38  ;;  %v5480_v17 = vpack.c.bf16 %v863_v11, %v862_v9 }
 0x271   : > { %5475 = vmatpush3.bf16.msra.mxu1 %v5472_v41  ;;  %4991 = vmatmul.mubr.f32.gmra.mrb[44].mxu0 %v2130_v59 }
 0x272   : > { %5047 = vmatmul.mubr.f32.gmra.mrb[44].mxu1 %v2146_v0  ;;  %5445 = vmatprep.subr.bf16.mxu0 %v5444_v57 }
 0x273   : > { %2293 = vadd.xlane.f32.xlu0 %v7356_v14  ;;  %5477 = vmatprep.subr.bf16.mxu1 %v5476_v61 }
 0x274   : > { %2295 = vadd.xlane.f32.xlu1 %v7366_v21  ;;  %4993 = vmatprep.mubr.f32.mxu0 %v7419_v8 }
 0x275   : > { %5049 = vmatprep.mubr.f32.mxu1 %v7414_v3  ;;  %5447 = vmatpush3.bf16.msra.mxu0 %v5444_v57 }
 0x276   : > { %5479 = vmatpush3.bf16.msra.mxu1 %v5476_v61  ;;  %4994 = vmatmul.mubr.f32.gmra.mrb[46].mxu0 %v2132_v24 }
 0x277   : > { %2265 = vadd.xlane.f32.xlu0 %v7377_v31  ;;  %5050 = vmatmul.mubr.f32.gmra.mrb[46].mxu1 %v7425_v13 }
 0x278   : > { %2267 = vadd.xlane.f32.xlu1 %v2128_v40  ;;  %5449 = vmatprep.subr.bf16.mxu0 %v5448_v15 }
 0x279   : > { %5481 = vmatprep.subr.bf16.mxu1 %v5480_v17  ;;  %5451 = vmatpush3.bf16.msra.mxu0 %v5448_v15 }
 0x27a   : > { %5483 = vmatpush3.bf16.msra.mxu1 %v5480_v17 }
 0x27b   : > { %2297 = vadd.xlane.f32.xlu0 %v7383_v35 }
 0x27c   : > { %2299 = vadd.xlane.f32.xlu1 %v2144_v43 }
 0x27d   : > { %v4862_v14 = vpop.f32.mrb[16].mxu0 }
 0x27e   : > { %v4379_v20 = vclamps-f32 %v4862_v14, 5.0  ;;  %v4918_v18 = vpop.f32.mrb[16].mxu1  ;;  %v1541_v5 = vpop.f32.mrb[17].mxu0 }
 0x27f   : > { %v4395_v21 = vclamps-f32 %v4918_v18, 5.0  ;;  %v4378_v25 = vclamps-f32 %v1541_v5, 5.0  ;;  %v1782_v26 = vpop.f32.mrb[17].mxu1  ;;  %2269 = vadd.xlane.f32.xlu0 %v2129_v52 }
 0x280   : > { %v2055_v28 = vmul.f32 1.442695, %v4379_v20  ;;  %v4394_v29 = vclamps-f32 %v1782_v26, 5.0  ;;  %2271 = vadd.xlane.f32.xlu1 %v2130_v59 }
 0x281   : > { %v2087_v30 = vmul.f32 1.442695, %v4395_v21  ;;  %v2053_v31 = vmul.f32 1.442695, %v4378_v25  ;;  %v4865_v32 = vpop.f32.mrb[18].mxu0 }
 0x282   : > { %5764 = vpow2.f32 %v2055_v28  ;;  %v2085_v33 = vmul.f32 1.442695, %v4394_v29  ;;  %v4381_v34 = vclamps-f32 %v4865_v32, 5.0  ;;  %v4921_v37 = vpop.f32.mrb[18].mxu1  ;;  %v1551_v35 = vpop.f32.mrb[19].mxu0 }
 0x283   : > { %5766 = vpow2.f32 %v2087_v30  ;;  %v4397_v38 = vclamps-f32 %v4921_v37, 5.0  ;;  %v4380_v39 = vclamps-f32 %v1551_v35, 5.0  ;;  %v1792_v40 = vpop.f32.mrb[19].mxu1  ;;  %2301 = vadd.xlane.f32.xlu0 %v7402_v51 }
 0x284   : > { %5768 = vpow2.f32 %v2053_v31  ;;  %v2059_v41 = vmul.f32 1.442695, %v4381_v34  ;;  %v4396_v43 = vclamps-f32 %v1792_v40, 5.0  ;;  %2303 = vadd.xlane.f32.xlu1 %v2146_v0 }
 0x285   : > { %5770 = vpow2.f32 %v2085_v33  ;;  %v2091_v45 = vmul.f32 1.442695, %v4397_v38  ;;  %v2057_v47 = vmul.f32 1.442695, %v4380_v39  ;;  %v4868_v48 = vpop.f32.mrb[20].mxu0 }
 0x286   : > { %5772 = vpow2.f32 %v2059_v41  ;;  %v2089_v49 = vmul.f32 1.442695, %v4396_v43  ;;  %v4383_v52 = vclamps-f32 %v4868_v48, 5.0  ;;  %v4924_v53 = vpop.f32.mrb[20].mxu1  ;;  %v1561_v50 = vpop.f32.mrb[21].mxu0 }
 0x287   : > { %5774 = vpow2.f32 %v2091_v45  ;;  %v4399_v54 = vclamps-f32 %v4924_v53, 5.0  ;;  %v4382_v55 = vclamps-f32 %v1561_v50, 5.0  ;;  %v1802_v57 = vpop.f32.mrb[21].mxu1  ;;  %2273 = vadd.xlane.f32.xlu0 %v7419_v8 }
 0x288   : > { %5776 = vpow2.f32 %v2057_v47  ;;  %v2063_v51 = vmul.f32 1.442695, %v4383_v52  ;;  %v4398_v58 = vclamps-f32 %v1802_v57, 5.0  ;;  %2275 = vadd.xlane.f32.xlu1 %v2132_v24 }
 0x289   : > { %5778 = vpow2.f32 %v2089_v49  ;;  %v2095_v59 = vmul.f32 1.442695, %v4399_v54  ;;  %v2061_v61 = vmul.f32 1.442695, %v4382_v55  ;;  %v4871_v62 = vpop.f32.mrb[22].mxu0 }
 0x28a   : > { %5780 = vpow2.f32 %v2063_v51  ;;  %v2093_v0 = vmul.f32 1.442695, %v4398_v58  ;;  %v4385_v2 = vclamps-f32 %v4871_v62, 5.0  ;;  %v4927_v22 = vpop.f32.mrb[22].mxu1  ;;  %v1571_v7 = vpop.f32.mrb[23].mxu0 }
 0x28b   : > { %5782 = vpow2.f32 %v2095_v59  ;;  %v4401_v9 = vclamps-f32 %v4927_v22, 5.0  ;;  %v4384_v11 = vclamps-f32 %v1571_v7, 5.0  ;;  %v1812_v15 = vpop.f32.mrb[23].mxu1  ;;  %2305 = vadd.xlane.f32.xlu0 %v7414_v3 }
 0x28c   : > { %v5765_v8 = vpop.eup %5764  ;;  %5784 = vpow2.f32 %v2061_v61  ;;  %v2067_v17 = vmul.f32 1.442695, %v4385_v2  ;;  %v4400_v14 = vclamps-f32 %v1812_v15, 5.0  ;;  %2307 = vadd.xlane.f32.xlu1 %v7425_v13 }
 0x28d   : > { %v5767_v24 = vpop.eup %5766  ;;  %5786 = vpow2.f32 %v2093_v0  ;;  %v2099_v20 = vmul.f32 1.442695, %v4401_v9  ;;  %v2065_v18 = vmul.f32 1.442695, %v4384_v11  ;;  %v4874_v5 = vpop.f32.mrb[24].mxu0  ;;  %v2150_v21 = vmul.f32 %v5765_v8, %v7254_v60 }
 0x28e   : > { %v5769_v25 = vpop.eup %5768  ;;  %5788 = vpow2.f32 %v2067_v17  ;;  %v2097_v26 = vmul.f32 1.442695, %v4400_v14  ;;  %v4387_v28 = vclamps-f32 %v4874_v5, 5.0  ;;  %v4930_v29 = vpop.f32.mrb[24].mxu1  ;;  %v2166_v3 = vmul.f32 %v5767_v24, %v7254_v60 }
 0x28f   : > { %v1581_v30 = vpop.f32.mrb[25].mxu0  ;;  %v5771_v31 = vpop.eup %5770  ;;  %5790 = vpow2.f32 %v2099_v20  ;;  %v4403_v32 = vclamps-f32 %v4930_v29, 5.0  ;;  %v2149_v34 = vmul.f32 %v5769_v25, %v7257_v4 }
 0x290   : > { %v4386_v33 = vclamps-f32 %v1581_v30, 5.0  ;;  %v1822_v13 = vpop.f32.mrb[25].mxu1  ;;  %v5773_v37 = vpop.eup %5772  ;;  %5792 = vpow2.f32 %v2065_v18  ;;  %v2071_v35 = vmul.f32 1.442695, %v4387_v28  ;;  %2311 = vadd.xlane.f32.xlu1 %v2150_v21  ;;  %v2165_v39 = vmul.f32 %v5771_v31, %v7257_v4 }
 0x291   : > { %v4402_v38 = vclamps-f32 %v1822_v13, 5.0  ;;  %v5775_v40 = vpop.eup %5774  ;;  %5794 = vpow2.f32 %v2097_v26  ;;  %v2103_v41 = vmul.f32 1.442695, %v4403_v32  ;;  %2309 = vadd.xlane.f32.xlu0 %v2149_v34  ;;  %5084 = vmatprep.mubr.f32.mxu0 %v2149_v34  ;;  %v4877_v60 = vpop.f32.mrb[26].mxu0  ;;  %v2152_v45 = vmul.f32 %v5773_v37, %v7259_v10 }
 0x292   : > { %v2069_v43 = vmul.f32 1.442695, %v4386_v33  ;;  %v5777_v47 = vpop.eup %5776  ;;  %5796 = vpow2.f32 %v2071_v35  ;;  %5140 = vmatprep.mubr.f32.mxu1 %v2165_v39  ;;  %v4389_v49 = vclamps-f32 %v4877_v60, 5.0  ;;  %v4933_v52 = vpop.f32.mrb[26].mxu1  ;;  %5085 = vmatmul.mubr.f32.vlgmr.msra.gmra.mrb[48].mxu0 %v2150_v21  ;;  %v7444_v50 = vmul.f32 %v5775_v40, %v7259_v10 }
 0x293   : > { %v2101_v48 = vmul.f32 1.442695, %v4402_v38  ;;  %v1591_v53 = vpop.f32.mrb[27].mxu0  ;;  %v5779_v4 = vpop.eup %5778  ;;  %5798 = vpow2.f32 %v2103_v41  ;;  %v4405_v54 = vclamps-f32 %v4933_v52, 5.0  ;;  %5141 = vmatmul.mubr.f32.vlgmr.msra.gmra.mrb[48].mxu1 %v2166_v3  ;;  %v2151_v51 = vmul.f32 %v5777_v47, %v7261_v12 }
 0x294   : > { %v4388_v55 = vclamps-f32 %v1591_v53, 5.0  ;;  %v1832_v57 = vpop.f32.mrb[27].mxu1  ;;  %v5781_v58 = vpop.eup %5780  ;;  %5800 = vpow2.f32 %v2069_v43  ;;  %v2075_v59 = vmul.f32 1.442695, %v4389_v49  ;;  %2343 = vadd.xlane.f32.xlu1 %v2166_v3  ;;  %v7448_v62 = vmul.f32 %v5779_v4, %v7261_v12 }
 0x295   : > { %v4404_v61 = vclamps-f32 %v1832_v57, 5.0  ;;  %v5783_v0 = vpop.eup %5782  ;;  %5802 = vpow2.f32 %v2101_v48  ;;  %v2107_v10 = vmul.f32 1.442695, %v4405_v54  ;;  %2341 = vadd.xlane.f32.xlu0 %v2165_v39  ;;  %5087 = vmatprep.mubr.f32.mxu0 %v2151_v51  ;;  %v4880_v22 = vpop.f32.mrb[28].mxu0  ;;  %v7451_v7 = vmul.f32 %v5781_v58, %v7296_v6 }
 0x296   : > { %v2073_v2 = vmul.f32 1.442695, %v4388_v55  ;;  %v5785_v9 = vpop.eup %5784  ;;  %5804 = vpow2.f32 %v2075_v59  ;;  %5143 = vmatprep.mubr.f32.mxu1 %v7448_v62  ;;  %v4391_v15 = vclamps-f32 %v4880_v22, 5.0  ;;  %v4936_v8 = vpop.f32.mrb[28].mxu1  ;;  %5088 = vmatmul.mubr.f32.gmra.mrb[50].mxu0 %v2152_v45  ;;  %v7455_v17 = vmul.f32 %v5783_v0, %v7296_v6 }
 0x297   : > { %v2105_v11 = vmul.f32 1.442695, %v4404_v61  ;;  %v1601_v12 = vpop.f32.mrb[29].mxu0  ;;  %v5787_v14 = vpop.eup %5786  ;;  %5806 = vpow2.f32 %v2107_v10  ;;  %v4407_v24 = vclamps-f32 %v4936_v8, 5.0  ;;  %5144 = vmatmul.mubr.f32.gmra.mrb[50].mxu1 %v7444_v50  ;;  %v2153_v5 = vmul.f32 %v5785_v9, %v7273_v42 }
 0x298   : > { %v4390_v20 = vclamps-f32 %v1601_v12, 5.0  ;;  %v1842_v18 = vpop.f32.mrb[29].mxu1  ;;  %v5789_v21 = vpop.eup %5788  ;;  %5808 = vpow2.f32 %v2073_v2  ;;  %v2079_v25 = vmul.f32 1.442695, %v4391_v15  ;;  %2315 = vadd.xlane.f32.xlu1 %v2152_v45  ;;  %v7460_v28 = vmul.f32 %v5787_v14, %v7273_v42 }
 0x299   : > { %v4406_v26 = vclamps-f32 %v1842_v18, 5.0  ;;  %v5791_v29 = vpop.eup %5790  ;;  %5810 = vpow2.f32 %v2105_v11  ;;  %v2111_v6 = vmul.f32 1.442695, %v4407_v24  ;;  %2313 = vadd.xlane.f32.xlu0 %v2151_v51  ;;  %5090 = vmatprep.mubr.f32.mxu0 %v2153_v5  ;;  %v4883_v3 = vpop.f32.mrb[30].mxu0  ;;  %v2156_v42 = vmul.f32 %v5789_v21, %v7309_v23  ;;  %v2181_v21 = vld [vmem:[#allocation3] sm:$0xff] }
 0x29a   : > { %v2077_v30 = vmul.f32 1.442695, %v4390_v20  ;;  %v5793_v31 = vpop.eup %5792  ;;  %5812 = vpow2.f32 %v2079_v25  ;;  %5146 = vmatprep.mubr.f32.mxu1 %v7460_v28  ;;  %v4393_v33 = vclamps-f32 %v4883_v3, 5.0  ;;  %v4939_v13 = vpop.f32.mrb[30].mxu1  ;;  %5091 = vmatmul.mubr.f32.gmra.mrb[52].mxu0 %v7451_v7  ;;  %v2172_v52 = vmul.f32 %v5791_v29, %v7309_v23  ;;  %v2184_v25 = vld [vmem:[#allocation3 + $0x18] sm:$0xff] }
 0x29b   : > { %v2109_v32 = vmul.f32 1.442695, %v4406_v26  ;;  %v1611_v34 = vpop.f32.mrb[31].mxu0  ;;  %v5795_v37 = vpop.eup %5794  ;;  %5814 = vpow2.f32 %v2111_v6  ;;  %v4409_v35 = vclamps-f32 %v4939_v13, 5.0  ;;  %5147 = vmatmul.mubr.f32.gmra.mrb[52].mxu1 %v7455_v17  ;;  %v2155_v40 = vmul.f32 %v5793_v31, %v7306_v19  ;;  %v2200_v3 = vld [vmem:[#allocation3 + $0x98] sm:$0xff] }
 0x29c   : > { %v4392_v38 = vclamps-f32 %v1611_v34, 5.0  ;;  %v1852_v39 = vpop.f32.mrb[31].mxu1  ;;  %v5797_v41 = vpop.eup %5796  ;;  %5816 = vpow2.f32 %v2077_v30  ;;  %v2083_v43 = vmul.f32 1.442695, %v4393_v33  ;;  %2347 = vadd.xlane.f32.xlu1 %v7444_v50  ;;  %v7469_v45 = vmul.f32 %v5795_v37, %v7306_v19  ;;  %v2197_v30 = vld [vmem:[#allocation3 + $0x80] sm:$0xff]  ;;  %v2199_v34 = vld [vmem:[#allocation3 + $0x90] sm:$0xff] }
 0x29d   : > { %v4408_v60 = vclamps-f32 %v1852_v39, 5.0  ;;  %v5799_v47 = vpop.eup %5798  ;;  %5818 = vpow2.f32 %v2109_v32  ;;  %v2115_v48 = vmul.f32 1.442695, %v4409_v35  ;;  %2345 = vadd.xlane.f32.xlu0 %v7448_v62  ;;  %5093 = vmatprep.mubr.f32.mxu0 %v2155_v40  ;;  %v2158_v57 = vmul.f32 %v5797_v41, %v7343_v63  ;;  %v2186_v41 = vld [vmem:[#allocation3 + $0x28] sm:$0xff] }
 0x29e   : > { %v2081_v49 = vmul.f32 1.442695, %v4392_v38  ;;  %v5801_v53 = vpop.eup %5800  ;;  %5820 = vpow2.f32 %v2083_v43  ;;  %5149 = vmatprep.mubr.f32.mxu1 %v7469_v45  ;;  %5094 = vmatmul.mubr.f32.gmra.mrb[54].mxu0 %v2156_v42  ;;  %v2174_v51 = vmul.f32 %v5799_v47, %v7343_v63 }
 0x29f   : > { %v2113_v4 = vmul.f32 1.442695, %v4408_v60  ;;  %v5803_v54 = vpop.eup %5802  ;;  %5822 = vpow2.f32 %v2115_v48  ;;  %5150 = vmatmul.mubr.f32.gmra.mrb[54].mxu1 %v2172_v52  ;;  %v2157_v19 = vmul.f32 %v5801_v53, %v7330_v46  ;;  %v2201_v48 = vld [vmem:[#allocation3 + $0xa0] sm:$0xff] }
 0x2a0   : > { %v5805_v50 = vpop.eup %5804  ;;  %5824 = vpow2.f32 %v2081_v49  ;;  %2319 = vadd.xlane.f32.xlu1 %v7451_v7  ;;  %v2173_v55 = vmul.f32 %v5803_v54, %v7330_v46  ;;  %v2202_v49 = vld [vmem:[#allocation3 + $0xa8] sm:$0xff] }
 0x2a1   : > { %v5807_v23 = vpop.eup %5806  ;;  %5826 = vpow2.f32 %v2113_v4  ;;  %2317 = vadd.xlane.f32.xlu0 %v2153_v5  ;;  %5096 = vmatprep.mubr.f32.mxu0 %v2157_v19  ;;  %v2160_v0 = vmul.f32 %v5805_v50, %v7370_v27  ;;  %v2188_v50 = vld [vmem:[#allocation3 + $0x38] sm:$0xff] }
 0x2a2   : > { %v5809_v58 = vpop.eup %5808  ;;  %5152 = vmatprep.mubr.f32.mxu1 %v2173_v55  ;;  %5097 = vmatmul.mubr.f32.gmra.mrb[56].mxu0 %v2158_v57  ;;  %v2176_v63 = vmul.f32 %v5807_v23, %v7370_v27 }
 0x2a3   : > { %v5811_v59 = vpop.eup %5810  ;;  %5153 = vmatmul.mubr.f32.gmra.mrb[56].mxu1 %v2174_v51  ;;  %v2159_v61 = vmul.f32 %v5809_v58, %v7358_v16  ;;  %v2203_v58 = vld [vmem:[#allocation3 + $0xb0] sm:$0xff] }
 0x2a4   : > { %v5813_v62 = vpop.eup %5812  ;;  %2351 = vadd.xlane.f32.xlu1 %v7455_v17  ;;  %v2175_v46 = vmul.f32 %v5811_v59, %v7358_v16  ;;  %v2204_v59 = vld [vmem:[#allocation3 + $0xb8] sm:$0xff] }
 0x2a5   : > { %v5815_v10 = vpop.eup %5814  ;;  %2349 = vadd.xlane.f32.xlu0 %v7460_v28  ;;  %5099 = vmatprep.mubr.f32.mxu0 %v2159_v61  ;;  %v2162_v16 = vmul.f32 %v5813_v62, %v7392_v44 }
 0x2a6   : > { %v5817_v2 = vpop.eup %5816  ;;  %5155 = vmatprep.mubr.f32.mxu1 %v2175_v46  ;;  %5100 = vmatmul.mubr.f32.gmra.mrb[58].mxu0 %v2160_v0  ;;  %v2178_v8 = vmul.f32 %v5815_v10, %v7392_v44  ;;  %v2182_v44 = vld [vmem:[#allocation3 + $0x8] sm:$0xff]  ;;  %v2189_v10 = vld [vmem:[#allocation3 + $0x40] sm:$0xff] }
 0x2a7   : > { %v5819_v22 = vpop.eup %5818  ;;  %5156 = vmatmul.mubr.f32.gmra.mrb[58].mxu1 %v2176_v63  ;;  %v2161_v7 = vmul.f32 %v5817_v2, %v7385_v36 }
 0x2a8   : > { %v5821_v9 = vpop.eup %5820  ;;  %2323 = vadd.xlane.f32.xlu1 %v2156_v42  ;;  %v2177_v11 = vmul.f32 %v5819_v22, %v7385_v36  ;;  %v2183_v42 = vld [vmem:[#allocation3 + $0x10] sm:$0xff] }
 0x2a9   : > { %v5823_v15 = vpop.eup %5822  ;;  %2321 = vadd.xlane.f32.xlu0 %v2155_v40  ;;  %5102 = vmatprep.mubr.f32.mxu0 %v2161_v7  ;;  %v2164_v24 = vmul.f32 %v5821_v9, %v7411_v1  ;;  %v2185_v40 = vld [vmem:[#allocation3 + $0x20] sm:$0xff] }
 0x2aa   : > { %v5825_v12 = vpop.eup %5824  ;;  %5158 = vmatprep.mubr.f32.mxu1 %v2177_v11  ;;  %5103 = vmatmul.mubr.f32.gmra.mrb[60].mxu0 %v2162_v16  ;;  %v2180_v36 = vmul.f32 %v5823_v15, %v7411_v1 }
 0x2ab   : > { %v5827_v27 = vpop.eup %5826  ;;  %5159 = vmatmul.mubr.f32.gmra.mrb[60].mxu1 %v2178_v8  ;;  %v2163_v17 = vmul.f32 %v5825_v12, %v7404_v56 }
 0x2ac   : > { %2355 = vadd.xlane.f32.xlu1 %v2172_v52  ;;  %v2179_v14 = vmul.f32 %v5827_v27, %v7404_v56  ;;  %v2198_v56 = vld [vmem:[#allocation3 + $0x88] sm:$0xff] }
 0x2ad   : > { %2353 = vadd.xlane.f32.xlu0 %v7469_v45  ;;  %5105 = vmatprep.mubr.f32.mxu0 %v2163_v17 }
 0x2ae   : > { %5161 = vmatprep.mubr.f32.mxu1 %v2179_v14  ;;  %5106 = vmatmul.mubr.f32.gmra.mrb[62].mxu0 %v2164_v24 }
 0x2af   : > { %5162 = vmatmul.mubr.f32.gmra.mrb[62].mxu1 %v2180_v36 }
 0x2b0   : > { %2327 = vadd.xlane.f32.xlu1 %v2158_v57 }
 0x2b1   : > { %2325 = vadd.xlane.f32.xlu0 %v2157_v19  ;;  %v2187_v19 = vld [vmem:[#allocation3 + $0x30] sm:$0xff] }
 0x2b4   : > { %2359 = vadd.xlane.f32.xlu1 %v2174_v51 }
 0x2b5   : > { %2357 = vadd.xlane.f32.xlu0 %v2173_v55 }
 0x2b8   : > { %2331 = vadd.xlane.f32.xlu1 %v2160_v0 }
 0x2b9   : > { %2329 = vadd.xlane.f32.xlu0 %v2159_v61 }
 0x2bc   : > { %2363 = vadd.xlane.f32.xlu1 %v2176_v63  ;;  %v2190_v63 = vld [vmem:[#allocation3 + $0x48] sm:$0xff] }
 0x2bd   : > { %2361 = vadd.xlane.f32.xlu0 %v2175_v46 }
 0x2c0   : > { %2335 = vadd.xlane.f32.xlu1 %v2162_v16  ;;  %v2206_v16 = vld [vmem:[#allocation3 + $0xc8] sm:$0xff] }
 0x2c1   : > { %2333 = vadd.xlane.f32.xlu0 %v2161_v7 }
 0x2c4   : > { %2367 = vadd.xlane.f32.xlu1 %v2178_v8 }
 0x2c5   : > { %2365 = vadd.xlane.f32.xlu0 %v2177_v11  ;;  %v2205_v11 = vld [vmem:[#allocation3 + $0xc0] sm:$0xff] }
 0x2c8   : > { %2339 = vadd.xlane.f32.xlu1 %v2164_v24 }
 0x2c9   : > { %2337 = vadd.xlane.f32.xlu0 %v2163_v17  ;;  %v2191_v17 = vld [vmem:[#allocation3 + $0x50] sm:$0xff] }
 0x2cc   : > { %2371 = vadd.xlane.f32.xlu1 %v2180_v36 }
 0x2cd   : > { %2369 = vadd.xlane.f32.xlu0 %v2179_v14  ;;  %v2192_v14 = vld [vmem:[#allocation3 + $0x58] sm:$0xff] }
 0x2dc   : > { %v2248_v1 = vpop.xlane.xlu0 %2247 }
 0x2dd   : > { %v2280_v20 = vpop.xlane.xlu1 %2279  ;;  %v2374_v18 = vadd.f32 %v2248_v1, %v2182_v44  ;;  %v2207_v1 = vld [vmem:[#allocation3 + $0xd0] sm:$0xff] }
 0x2de   : > { %v2390_v5 = vadd.f32 %v2280_v20, %v2198_v56  ;;  %v2208_v20 = vld [vmem:[#allocation3 + $0xd8] sm:$0xff] }
 0x2df   : > { %2439 = vst.msk [vmem:[#allocation3 + $0x8] sm:$0xff] %vm2437_vm4, %v2374_v18 }
 0x2e0   : > { %2455 = vst.msk [vmem:[#allocation3 + $0x88] sm:$0xff] %vm2437_vm4, %v2390_v5  ;;  %v2246_v26 = vpop.xlane.xlu0 %2245 }
 0x2e1   : > { %v2373_v28 = vadd.f32 %v2246_v26, %v2181_v21  ;;  %v2252_v29 = vpop.xlane.xlu1 %2251  ;;  %v2193_v26 = vld [vmem:[#allocation3 + $0x60] sm:$0xff] }
 0x2e2   : > { %v2376_v6 = vadd.f32 %v2252_v29, %v2184_v25 }
 0x2e3   : > { %2438 = vst.msk [vmem:[#allocation3] sm:$0xff] %vm2437_vm4, %v2373_v28  ;;  %v2194_v28 = vld [vmem:[#allocation3 + $0x68] sm:$0xff] }
 0x2e4   : > { %2441 = vst.msk [vmem:[#allocation3 + $0x18] sm:$0xff] %vm2437_vm4, %v2376_v6  ;;  %v2278_v31 = vpop.xlane.xlu0 %2277 }
 0x2e5   : > { %v2389_v32 = vadd.f32 %v2278_v31, %v2197_v30  ;;  %v2284_v33 = vpop.xlane.xlu1 %2283  ;;  %v2209_v31 = vld [vmem:[#allocation3 + $0xe0] sm:$0xff] }
 0x2e6   : > { %v2392_v13 = vadd.f32 %v2284_v33, %v2200_v3 }
 0x2e7   : > { %2454 = vst.msk [vmem:[#allocation3 + $0x80] sm:$0xff] %vm2437_vm4, %v2389_v32  ;;  %v2210_v32 = vld [vmem:[#allocation3 + $0xe8] sm:$0xff] }
 0x2e8   : > { %2457 = vst.msk [vmem:[#allocation3 + $0x98] sm:$0xff] %vm2437_vm4, %v2392_v13  ;;  %v2282_v37 = vpop.xlane.xlu0 %2281 }
 0x2e9   : > { %v2391_v35 = vadd.f32 %v2282_v37, %v2199_v34  ;;  %v2250_v38 = vpop.xlane.xlu1 %2249  ;;  %v2195_v37 = vld [vmem:[#allocation3 + $0x70] sm:$0xff] }
 0x2ea   : > { %v2375_v39 = vadd.f32 %v2250_v38, %v2183_v42 }
 0x2eb   : > { %2456 = vst.msk [vmem:[#allocation3 + $0x90] sm:$0xff] %vm2437_vm4, %v2391_v35  ;;  %v2196_v35 = vld [vmem:[#allocation3 + $0x78] sm:$0xff] }
 0x2ec   : > { %2440 = vst.msk [vmem:[#allocation3 + $0x10] sm:$0xff] %vm2437_vm4, %v2375_v39  ;;  %v2254_v43 = vpop.xlane.xlu0 %2253 }
 0x2ed   : > { %v2256_v60 = vpop.xlane.xlu1 %2255  ;;  %v2377_v45 = vadd.f32 %v2254_v43, %v2185_v40  ;;  %v2211_v43 = vld [vmem:[#allocation3 + $0xf0] sm:$0xff] }
 0x2ee   : > { %v2378_v47 = vadd.f32 %v2256_v60, %v2186_v41  ;;  %v2212_v60 = vld [vmem:[#allocation3 + $0xf8] sm:$0xff] }
 0x2ef   : > { %2442 = vst.msk [vmem:[#allocation3 + $0x20] sm:$0xff] %vm2437_vm4, %v2377_v45 }
 0x2f0   : > { %2443 = vst.msk [vmem:[#allocation3 + $0x28] sm:$0xff] %vm2437_vm4, %v2378_v47  ;;  %v2286_v52 = vpop.xlane.xlu0 %2285 }
 0x2f1   : > { %v2288_v53 = vpop.xlane.xlu1 %2287  ;;  %v2393_v4 = vadd.f32 %v2286_v52, %v2201_v48  ;;  %v2214_v52 = vld [vmem:[#allocation3 + $0x108] sm:$0xff] }
 0x2f2   : > { %v2394_v54 = vadd.f32 %v2288_v53, %v2202_v49  ;;  %v2213_v53 = vld [vmem:[#allocation3 + $0x100] sm:$0xff] }
 0x2f3   : > { %2458 = vst.msk [vmem:[#allocation3 + $0xa0] sm:$0xff] %vm2437_vm4, %v2393_v4 }
 0x2f4   : > { %2459 = vst.msk [vmem:[#allocation3 + $0xa8] sm:$0xff] %vm2437_vm4, %v2394_v54  ;;  %v2258_v55 = vpop.xlane.xlu0 %2257 }
 0x2f5   : > { %v2260_v57 = vpop.xlane.xlu1 %2259  ;;  %v2379_v23 = vadd.f32 %v2258_v55, %v2187_v19  ;;  %v2230_v55 = vld [vmem:[#allocation3 + $0x188] sm:$0xff] }
 0x2f6   : > { %v2380_v51 = vadd.f32 %v2260_v57, %v2188_v50  ;;  %v2229_v57 = vld [vmem:[#allocation3 + $0x180] sm:$0xff] }
 0x2f7   : > { %2444 = vst.msk [vmem:[#allocation3 + $0x30] sm:$0xff] %vm2437_vm4, %v2379_v23 }
 0x2f8   : > { %2445 = vst.msk [vmem:[#allocation3 + $0x38] sm:$0xff] %vm2437_vm4, %v2380_v51  ;;  %v2290_v61 = vpop.xlane.xlu0 %2289 }
 0x2f9   : > { %v2292_v62 = vpop.xlane.xlu1 %2291  ;;  %v2395_v46 = vadd.f32 %v2290_v61, %v2203_v58  ;;  %v2216_v61 = vld [vmem:[#allocation3 + $0x118] sm:$0xff] }
 0x2fa   : > { %v2396_v0 = vadd.f32 %v2292_v62, %v2204_v59  ;;  %v2503_v62 = vld [vmem:[#allocation2 + $0x8] sm:$0xff] }
 0x2fb   : > { %2460 = vst.msk [vmem:[#allocation3 + $0xb0] sm:$0xff] %vm2437_vm4, %v2395_v46  ;;  %v2519_v46 = vld [vmem:[#allocation2 + $0x88] sm:$0xff] }
 0x2fc   : > { %2461 = vst.msk [vmem:[#allocation3 + $0xb8] sm:$0xff] %vm2437_vm4, %v2396_v0  ;;  %v2262_v2 = vpop.xlane.xlu0 %2261  ;;  %v2215_v0 = vld [vmem:[#allocation3 + $0x110] sm:$0xff] }
 0x2fd   : > { %v2264_v22 = vpop.xlane.xlu1 %2263  ;;  %v2381_v7 = vadd.f32 %v2262_v2, %v2189_v10  ;;  %v2518_v2 = vld [vmem:[#allocation2 + $0x80] sm:$0xff] }
 0x2fe   : > { %v2382_v9 = vadd.f32 %v2264_v22, %v2190_v63  ;;  %v2502_v22 = vld [vmem:[#allocation2] sm:$0xff] }
 0x2ff   : > { %2446 = vst.msk [vmem:[#allocation3 + $0x40] sm:$0xff] %vm2437_vm4, %v2381_v7 }
 0x300   : > { %2447 = vst.msk [vmem:[#allocation3 + $0x48] sm:$0xff] %vm2437_vm4, %v2382_v9  ;;  %v2294_v15 = vpop.xlane.xlu0 %2293 }
 0x301   : > { %v2296_v8 = vpop.xlane.xlu1 %2295  ;;  %v2397_v12 = vadd.f32 %v2294_v15, %v2205_v11 }
 0x302   : > { %v2398_v27 = vadd.f32 %v2296_v8, %v2206_v16 }
 0x303   : > { %2462 = vst.msk [vmem:[#allocation3 + $0xc0] sm:$0xff] %vm2437_vm4, %v2397_v12 }
 0x304   : > { %2463 = vst.msk [vmem:[#allocation3 + $0xc8] sm:$0xff] %vm2437_vm4, %v2398_v27  ;;  %v2266_v24 = vpop.xlane.xlu0 %2265 }
 0x305   : > { %v2268_v36 = vpop.xlane.xlu1 %2267  ;;  %v2383_v44 = vadd.f32 %v2266_v24, %v2191_v17  ;;  %v2232_v17 = vld [vmem:[#allocation3 + $0x198] sm:$0xff] }
 0x306   : > { %v2384_v56 = vadd.f32 %v2268_v36, %v2192_v14  ;;  %v2505_v14 = vld [vmem:[#allocation2 + $0x18] sm:$0xff] }
 0x307   : > { %2448 = vst.msk [vmem:[#allocation3 + $0x50] sm:$0xff] %vm2437_vm4, %v2383_v44  ;;  %v2231_v44 = vld [vmem:[#allocation3 + $0x190] sm:$0xff] }
 0x308   : > { %2449 = vst.msk [vmem:[#allocation3 + $0x58] sm:$0xff] %vm2437_vm4, %v2384_v56  ;;  %v2298_v18 = vpop.xlane.xlu0 %2297  ;;  %v2521_v56 = vld [vmem:[#allocation2 + $0x98] sm:$0xff] }
 0x309   : > { %v2300_v5 = vpop.xlane.xlu1 %2299  ;;  %v2399_v21 = vadd.f32 %v2298_v18, %v2207_v1  ;;  %v2504_v18 = vld [vmem:[#allocation2 + $0x10] sm:$0xff] }
 0x30a   : > { %v2400_v25 = vadd.f32 %v2300_v5, %v2208_v20  ;;  %v2520_v5 = vld [vmem:[#allocation2 + $0x90] sm:$0xff] }
 0x30b   : > { %2464 = vst.msk [vmem:[#allocation3 + $0xd0] sm:$0xff] %vm2437_vm4, %v2399_v21 }
 0x30c   : > { %2465 = vst.msk [vmem:[#allocation3 + $0xd8] sm:$0xff] %vm2437_vm4, %v2400_v25  ;;  %v2270_v29 = vpop.xlane.xlu0 %2269 }
 0x30d   : > { %v2272_v6 = vpop.xlane.xlu1 %2271  ;;  %v2385_v30 = vadd.f32 %v2270_v29, %v2193_v26 }
 0x30e   : > { %v2386_v3 = vadd.f32 %v2272_v6, %v2194_v28  ;;  %v2218_v6 = vld [vmem:[#allocation3 + $0x128] sm:$0xff] }
 0x30f   : > { %2450 = vst.msk [vmem:[#allocation3 + $0x60] sm:$0xff] %vm2437_vm4, %v2385_v30 }
 0x310   : > { %2451 = vst.msk [vmem:[#allocation3 + $0x68] sm:$0xff] %vm2437_vm4, %v2386_v3  ;;  %v2302_v33 = vpop.xlane.xlu0 %2301 }
 0x311   : > { %v2304_v13 = vpop.xlane.xlu1 %2303  ;;  %v2401_v34 = vadd.f32 %v2302_v33, %v2209_v31 }
 0x312   : > { %v2402_v42 = vadd.f32 %v2304_v13, %v2210_v32  ;;  %v2217_v32 = vld [vmem:[#allocation3 + $0x120] sm:$0xff] }
 0x313   : > { %2466 = vst.msk [vmem:[#allocation3 + $0xe0] sm:$0xff] %vm2437_vm4, %v2401_v34 }
 0x314   : > { %2467 = vst.msk [vmem:[#allocation3 + $0xe8] sm:$0xff] %vm2437_vm4, %v2402_v42  ;;  %v2274_v38 = vpop.xlane.xlu0 %2273  ;;  %v2507_v42 = vld [vmem:[#allocation2 + $0x28] sm:$0xff] }
 0x315   : > { %v2276_v39 = vpop.xlane.xlu1 %2275  ;;  %v2387_v40 = vadd.f32 %v2274_v38, %v2195_v37  ;;  %v2523_v38 = vld [vmem:[#allocation2 + $0xa8] sm:$0xff] }
 0x316   : > { %v2388_v41 = vadd.f32 %v2276_v39, %v2196_v35  ;;  %v2506_v39 = vld [vmem:[#allocation2 + $0x20] sm:$0xff] }
 0x317   : > { %2452 = vst.msk [vmem:[#allocation3 + $0x70] sm:$0xff] %vm2437_vm4, %v2387_v40 }
 0x318   : > { %2453 = vst.msk [vmem:[#allocation3 + $0x78] sm:$0xff] %vm2437_vm4, %v2388_v41  ;;  %v2306_v45 = vpop.xlane.xlu0 %2305  ;;  %v2234_v41 = vld [vmem:[#allocation3 + $0x1a8] sm:$0xff] }
 0x319   : > { %v2308_v47 = vpop.xlane.xlu1 %2307  ;;  %v2403_v48 = vadd.f32 %v2306_v45, %v2211_v43  ;;  %v2233_v45 = vld [vmem:[#allocation3 + $0x1a0] sm:$0xff] }
 0x31a   : > { %v2404_v49 = vadd.f32 %v2308_v47, %v2212_v60  ;;  %v2522_v60 = vld [vmem:[#allocation2 + $0xa0] sm:$0xff] }
 0x31b   : > { %2468 = vst.msk [vmem:[#allocation3 + $0xf0] sm:$0xff] %vm2437_vm4, %v2403_v48 }
 0x31c   : > { %2469 = vst.msk [vmem:[#allocation3 + $0xf8] sm:$0xff] %vm2437_vm4, %v2404_v49 }
 0x31d   : > { %v2312_v4 = vpop.xlane.xlu1 %2311 }
 0x31e   : > { %v2406_v54 = vadd.f32 %v2312_v4, %v2214_v52  ;;  %v2310_v19 = vpop.xlane.xlu0 %2309 }
 0x31f   : > { %v2405_v50 = vadd.f32 %v2310_v19, %v2213_v53 }
 0x320   : > { %2471 = vst.msk [vmem:[#allocation3 + $0x108] sm:$0xff] %vm2437_vm4, %v2406_v54 }
 0x321   : > { %2470 = vst.msk [vmem:[#allocation3 + $0x100] sm:$0xff] %vm2437_vm4, %v2405_v50  ;;  %v2344_v23 = vpop.xlane.xlu1 %2343 }
 0x322   : > { %v2422_v51 = vadd.f32 %v2344_v23, %v2230_v55  ;;  %v2342_v58 = vpop.xlane.xlu0 %2341 }
 0x323   : > { %v2421_v59 = vadd.f32 %v2342_v58, %v2229_v57  ;;  %v2509_v57 = vld [vmem:[#allocation2 + $0x38] sm:$0xff] }
 0x324   : > { %2487 = vst.msk [vmem:[#allocation3 + $0x188] sm:$0xff] %vm2437_vm4, %v2422_v51  ;;  %v2220_v51 = vld [vmem:[#allocation3 + $0x138] sm:$0xff] }
 0x325   : > { %2486 = vst.msk [vmem:[#allocation3 + $0x180] sm:$0xff] %vm2437_vm4, %v2421_v59  ;;  %v2316_v10 = vpop.xlane.xlu1 %2315  ;;  %v4974_v63 = vpop.f32.mrb[32].mxu0  ;;  %v2525_v58 = vld [vmem:[#allocation2 + $0xb8] sm:$0xff]  ;;  %v2219_v59 = vld [vmem:[#allocation3 + $0x130] sm:$0xff] }
 0x326   : > { %v5030_v7 = vpop.f32.mrb[32].mxu1  ;;  %v2408_v9 = vadd.f32 %v2316_v10, %v2216_v61  ;;  %v3147_v11 = vadd.f32 %v4974_v63, %v2503_v62  ;;  %v2314_v16 = vpop.xlane.xlu0 %2313  ;;  %v2508_v62 = vld [vmem:[#allocation2 + $0x30] sm:$0xff] }
 0x327   : > { %v3163_v15 = vadd.f32 %v5030_v7, %v2519_v46  ;;  %v2777_v8 = vpop.f32.mrb[33].mxu1  ;;  %v2407_v12 = vadd.f32 %v2314_v16, %v2215_v0  ;;  %v2632_v27 = vpop.f32.mrb[33].mxu0  ;;  %v2524_v63 = vld [vmem:[#allocation2 + $0xb0] sm:$0xff]  ;;  %v2236_v16 = vld [vmem:[#allocation3 + $0x1b8] sm:$0xff] }
 0x328   : > { %2473 = vst.msk [vmem:[#allocation3 + $0x118] sm:$0xff] %vm2437_vm4, %v2408_v9  ;;  %v3162_v24 = vadd.f32 %v2777_v8, %v2518_v2  ;;  %v3146_v36 = vadd.f32 %v2632_v27, %v2502_v22  ;;  %v2235_v27 = vld [vmem:[#allocation3 + $0x1b0] sm:$0xff] }
 0x329   : > { %3211 = vst.msk [vmem:[#allocation2 + $0x8] sm:$0xff] %vm896_vm2, %v3147_v11  ;;  %3227 = vst.msk [vmem:[#allocation2 + $0x88] sm:$0xff] %vm896_vm2, %v3163_v15  ;;  %v2348_v1 = vpop.xlane.xlu1 %2347  ;;  %v4977_v20 = vpop.f32.mrb[34].mxu0 }
 0x32a   : > { %2472 = vst.msk [vmem:[#allocation3 + $0x110] sm:$0xff] %vm2437_vm4, %v2407_v12  ;;  %v2424_v21 = vadd.f32 %v2348_v1, %v2232_v17  ;;  %v2346_v25 = vpop.xlane.xlu0 %2345  ;;  %v5033_v26 = vpop.f32.mrb[34].mxu1  ;;  %v3149_v28 = vadd.f32 %v4977_v20, %v2505_v14  ;;  %v2511_v12 = vld [vmem:[#allocation2 + $0x48] sm:$0xff] }
 0x32b   : > { %3226 = vst.msk [vmem:[#allocation2 + $0x80] sm:$0xff] %vm896_vm2, %v3162_v24  ;;  %3210 = vst.msk [vmem:[#allocation2] sm:$0xff] %vm896_vm2, %v3146_v36  ;;  %v2423_v29 = vadd.f32 %v2346_v25, %v2231_v44  ;;  %v3165_v30 = vadd.f32 %v5033_v26, %v2521_v56  ;;  %v2642_v3 = vpop.f32.mrb[35].mxu0  ;;  %v2787_v31 = vpop.f32.mrb[35].mxu1  ;;  %v2527_v14 = vld [vmem:[#allocation2 + $0xc8] sm:$0xff]  ;;  %v2510_v44 = vld [vmem:[#allocation2 + $0x40] sm:$0xff] }
 0x32c   : > { %2489 = vst.msk [vmem:[#allocation3 + $0x198] sm:$0xff] %vm2437_vm4, %v2424_v21  ;;  %v3148_v33 = vadd.f32 %v2642_v3, %v2504_v18  ;;  %v3164_v13 = vadd.f32 %v2787_v31, %v2520_v5  ;;  %v2526_v56 = vld [vmem:[#allocation2 + $0xc0] sm:$0xff]  ;;  %v2222_v25 = vld [vmem:[#allocation3 + $0x148] sm:$0xff] }
 0x32d   : > { %3213 = vst.msk [vmem:[#allocation2 + $0x18] sm:$0xff] %vm896_vm2, %v3149_v28  ;;  %v2320_v34 = vpop.xlane.xlu1 %2319  ;;  %3229 = vst.msk [vmem:[#allocation2 + $0x98] sm:$0xff] %vm896_vm2, %v3165_v30 }
 0x32e   : > { %2488 = vst.msk [vmem:[#allocation3 + $0x190] sm:$0xff] %vm2437_vm4, %v2423_v29  ;;  %v2410_v37 = vadd.f32 %v2320_v34, %v2218_v6  ;;  %v2318_v35 = vpop.xlane.xlu0 %2317  ;;  %v2221_v6 = vld [vmem:[#allocation3 + $0x140] sm:$0xff]  ;;  %v2529_v34 = vld [vmem:[#allocation2 + $0xd8] sm:$0xff] }
 0x32f   : > { %3212 = vst.msk [vmem:[#allocation2 + $0x10] sm:$0xff] %vm896_vm2, %v3148_v33  ;;  %3228 = vst.msk [vmem:[#allocation2 + $0x90] sm:$0xff] %vm896_vm2, %v3164_v13  ;;  %v2409_v40 = vadd.f32 %v2318_v35, %v2217_v32  ;;  %v4980_v43 = vpop.f32.mrb[36].mxu0  ;;  %v2513_v32 = vld [vmem:[#allocation2 + $0x58] sm:$0xff]  ;;  %v2238_v35 = vld [vmem:[#allocation3 + $0x1c8] sm:$0xff] }
 0x330   : > { %2475 = vst.msk [vmem:[#allocation3 + $0x128] sm:$0xff] %vm2437_vm4, %v2410_v37  ;;  %v5036_v47 = vpop.f32.mrb[36].mxu1  ;;  %v3151_v48 = vadd.f32 %v4980_v43, %v2507_v42  ;;  %v2652_v49 = vpop.f32.mrb[37].mxu0  ;;  %v2512_v42 = vld [vmem:[#allocation2 + $0x50] sm:$0xff] }
 0x331   : > { %2474 = vst.msk [vmem:[#allocation3 + $0x120] sm:$0xff] %vm2437_vm4, %v2409_v40  ;;  %v2352_v52 = vpop.xlane.xlu1 %2351  ;;  %v3167_v53 = vadd.f32 %v5036_v47, %v2523_v38  ;;  %v3150_v4 = vadd.f32 %v2652_v49, %v2506_v39  ;;  %v2797_v54 = vpop.f32.mrb[37].mxu1  ;;  %v2528_v39 = vld [vmem:[#allocation2 + $0xd0] sm:$0xff]  ;;  %v2237_v40 = vld [vmem:[#allocation3 + $0x1c0] sm:$0xff] }
 0x332   : > { %v2426_v19 = vadd.f32 %v2352_v52, %v2234_v41  ;;  %v2350_v50 = vpop.xlane.xlu0 %2349  ;;  %3215 = vst.msk [vmem:[#allocation2 + $0x28] sm:$0xff] %vm896_vm2, %v3151_v48  ;;  %v3166_v55 = vadd.f32 %v2797_v54, %v2522_v60  ;;  %v2515_v54 = vld [vmem:[#allocation2 + $0x68] sm:$0xff] }
 0x333   : > { %v2425_v23 = vadd.f32 %v2350_v50, %v2233_v45  ;;  %3231 = vst.msk [vmem:[#allocation2 + $0xa8] sm:$0xff] %vm896_vm2, %v3167_v53  ;;  %3214 = vst.msk [vmem:[#allocation2 + $0x20] sm:$0xff] %vm896_vm2, %v3150_v4  ;;  %v2224_v50 = vld [vmem:[#allocation3 + $0x158] sm:$0xff] }
 0x334   : > { %2491 = vst.msk [vmem:[#allocation3 + $0x1a8] sm:$0xff] %vm2437_vm4, %v2426_v19  ;;  %v4983_v61 = vpop.f32.mrb[38].mxu0 }
 0x335   : > { %3230 = vst.msk [vmem:[#allocation2 + $0xa0] sm:$0xff] %vm896_vm2, %v3166_v55  ;;  %v2324_v46 = vpop.xlane.xlu1 %2323  ;;  %v5039_v0 = vpop.f32.mrb[38].mxu1  ;;  %v3153_v10 = vadd.f32 %v4983_v61, %v2509_v57  ;;  %v2531_v55 = vld [vmem:[#allocation2 + $0xe8] sm:$0xff]  ;;  %v2223_v57 = vld [vmem:[#allocation3 + $0x150] sm:$0xff] }
 0x336   : > { %2490 = vst.msk [vmem:[#allocation3 + $0x1a0] sm:$0xff] %vm2437_vm4, %v2425_v23  ;;  %v2412_v2 = vadd.f32 %v2324_v46, %v2220_v51  ;;  %v2322_v22 = vpop.xlane.xlu0 %2321  ;;  %v3169_v7 = vadd.f32 %v5039_v0, %v2525_v58  ;;  %v2662_v9 = vpop.f32.mrb[39].mxu0  ;;  %v2514_v51 = vld [vmem:[#allocation2 + $0x60] sm:$0xff] }
 0x337   : > { %v2411_v11 = vadd.f32 %v2322_v22, %v2219_v59  ;;  %3217 = vst.msk [vmem:[#allocation2 + $0x38] sm:$0xff] %vm896_vm2, %v3153_v10  ;;  %v3152_v15 = vadd.f32 %v2662_v9, %v2508_v62  ;;  %v2807_v8 = vpop.f32.mrb[39].mxu1  ;;  %v2530_v62 = vld [vmem:[#allocation2 + $0xe0] sm:$0xff]  ;;  %v2240_v22 = vld [vmem:[#allocation3 + $0x1d8] sm:$0xff] }
 0x338   : > { %2477 = vst.msk [vmem:[#allocation3 + $0x138] sm:$0xff] %vm2437_vm4, %v2412_v2  ;;  %v3168_v17 = vadd.f32 %v2807_v8, %v2524_v63  ;;  %v2533_v8 = vld [vmem:[#allocation2 + $0xf8] sm:$0xff] }
 0x339   : > { %3233 = vst.msk [vmem:[#allocation2 + $0xb8] sm:$0xff] %vm896_vm2, %v3169_v7  ;;  %v2356_v24 = vpop.xlane.xlu1 %2355  ;;  %3216 = vst.msk [vmem:[#allocation2 + $0x30] sm:$0xff] %vm896_vm2, %v3152_v15  ;;  %v4986_v36 = vpop.f32.mrb[40].mxu0 }
 0x33a   : > { %2476 = vst.msk [vmem:[#allocation3 + $0x130] sm:$0xff] %vm2437_vm4, %v2411_v11  ;;  %v2428_v1 = vadd.f32 %v2356_v24, %v2236_v16  ;;  %v2354_v20 = vpop.xlane.xlu0 %2353  ;;  %v5042_v18 = vpop.f32.mrb[40].mxu1  ;;  %v3155_v5 = vadd.f32 %v4986_v36, %v2511_v12  ;;  %v2517_v11 = vld [vmem:[#allocation2 + $0x78] sm:$0xff]  ;;  %v2239_v16 = vld [vmem:[#allocation3 + $0x1d0] sm:$0xff] }
 0x33b   : > { %3232 = vst.msk [vmem:[#allocation2 + $0xb0] sm:$0xff] %vm896_vm2, %v3168_v17  ;;  %v2427_v21 = vadd.f32 %v2354_v20, %v2235_v27  ;;  %v3171_v26 = vadd.f32 %v5042_v18, %v2527_v14  ;;  %v2672_v28 = vpop.f32.mrb[41].mxu0  ;;  %v2817_v29 = vpop.f32.mrb[41].mxu1  ;;  %v2516_v17 = vld [vmem:[#allocation2 + $0x70] sm:$0xff]  ;;  %v2226_v20 = vld [vmem:[#allocation3 + $0x168] sm:$0xff] }
 0x33c   : > { %2493 = vst.msk [vmem:[#allocation3 + $0x1b8] sm:$0xff] %vm2437_vm4, %v2428_v1  ;;  %v3154_v30 = vadd.f32 %v2672_v28, %v2510_v44  ;;  %v3170_v3 = vadd.f32 %v2817_v29, %v2526_v56  ;;  %v2532_v14 = vld [vmem:[#allocation2 + $0xf0] sm:$0xff] }
 0x33d   : > { %3219 = vst.msk [vmem:[#allocation2 + $0x48] sm:$0xff] %vm896_vm2, %v3155_v5  ;;  %v2328_v31 = vpop.xlane.xlu1 %2327  ;;  %3235 = vst.msk [vmem:[#allocation2 + $0xc8] sm:$0xff] %vm896_vm2, %v3171_v26 }
 0x33e   : > { %2492 = vst.msk [vmem:[#allocation3 + $0x1b0] sm:$0xff] %vm2437_vm4, %v2427_v21  ;;  %v2414_v33 = vadd.f32 %v2328_v31, %v2222_v25  ;;  %v2326_v13 = vpop.xlane.xlu0 %2325  ;;  %v2225_v25 = vld [vmem:[#allocation3 + $0x160] sm:$0xff]  ;;  %v2242_v31 = vld [vmem:[#allocation3 + $0x1e8] sm:$0xff] }
 0x33f   : > { %3218 = vst.msk [vmem:[#allocation2 + $0x40] sm:$0xff] %vm896_vm2, %v3154_v30  ;;  %3234 = vst.msk [vmem:[#allocation2 + $0xc0] sm:$0xff] %vm896_vm2, %v3170_v3  ;;  %v2413_v37 = vadd.f32 %v2326_v13, %v2221_v6  ;;  %v4989_v38 = vpop.f32.mrb[42].mxu0 }
 0x340   : > { %2479 = vst.msk [vmem:[#allocation3 + $0x148] sm:$0xff] %vm2437_vm4, %v2414_v33  ;;  %v3157_v41 = vadd.f32 %v4989_v38, %v2513_v32  ;;  %v5045_v43 = vpop.f32.mrb[42].mxu1  ;;  %v2682_v60 = vpop.f32.mrb[43].mxu0  ;;  %v2241_v32 = vld [vmem:[#allocation3 + $0x1e0] sm:$0xff] }
 0x341   : > { %2478 = vst.msk [vmem:[#allocation3 + $0x140] sm:$0xff] %vm2437_vm4, %v2413_v37  ;;  %v2360_v45 = vpop.xlane.xlu1 %2359  ;;  %v3173_v47 = vadd.f32 %v5045_v43, %v2529_v34  ;;  %v3156_v48 = vadd.f32 %v2682_v60, %v2512_v42  ;;  %v2827_v49 = vpop.f32.mrb[43].mxu1  ;;  %v2228_v37 = vld [vmem:[#allocation3 + $0x178] sm:$0xff]  ;;  %v2243_v60 = vld [vmem:[#allocation3 + $0x1f0] sm:$0xff] }
 0x342   : > { %v2430_v52 = vadd.f32 %v2360_v45, %v2238_v35  ;;  %v2358_v53 = vpop.xlane.xlu0 %2357  ;;  %3221 = vst.msk [vmem:[#allocation2 + $0x58] sm:$0xff] %vm896_vm2, %v3157_v41  ;;  %v3172_v4 = vadd.f32 %v2827_v49, %v2528_v39  ;;  %v2227_v35 = vld [vmem:[#allocation3 + $0x170] sm:$0xff]  ;;  %v2244_v43 = vld [vmem:[#allocation3 + $0x1f8] sm:$0xff] }
 0x343   : > { %v2429_v19 = vadd.f32 %v2358_v53, %v2237_v40  ;;  %3237 = vst.msk [vmem:[#allocation2 + $0xd8] sm:$0xff] %vm896_vm2, %v3173_v47  ;;  %3220 = vst.msk [vmem:[#allocation2 + $0x50] sm:$0xff] %vm896_vm2, %v3156_v48  ;;  %v2551_v53 = vld [vmem:[#allocation2 + $0x188] sm:$0xff] }
 0x344   : > { %2495 = vst.msk [vmem:[#allocation3 + $0x1c8] sm:$0xff] %vm2437_vm4, %v2430_v52  ;;  %v4992_v23 = vpop.f32.mrb[44].mxu0  ;;  %v2535_v52 = vld [vmem:[#allocation2 + $0x108] sm:$0xff] }
 0x345   : > { %3236 = vst.msk [vmem:[#allocation2 + $0xd0] sm:$0xff] %vm896_vm2, %v3172_v4  ;;  %v2332_v58 = vpop.xlane.xlu1 %2331  ;;  %v3159_v59 = vadd.f32 %v4992_v23, %v2515_v54  ;;  %v5048_v61 = vpop.f32.mrb[44].mxu1  ;;  %v2534_v4 = vld [vmem:[#allocation2 + $0x100] sm:$0xff] }
 0x346   : > { %2494 = vst.msk [vmem:[#allocation3 + $0x1c0] sm:$0xff] %vm2437_vm4, %v2429_v19  ;;  %v2416_v46 = vadd.f32 %v2332_v58, %v2224_v50  ;;  %v2330_v0 = vpop.xlane.xlu0 %2329  ;;  %v3175_v10 = vadd.f32 %v5048_v61, %v2531_v55  ;;  %v2692_v63 = vpop.f32.mrb[45].mxu0  ;;  %v2550_v19 = vld [vmem:[#allocation2 + $0x180] sm:$0xff] }
 0x347   : > { %v2415_v2 = vadd.f32 %v2330_v0, %v2223_v57  ;;  %3223 = vst.msk [vmem:[#allocation2 + $0x68] sm:$0xff] %vm896_vm2, %v3159_v59  ;;  %v3158_v7 = vadd.f32 %v2692_v63, %v2514_v51  ;;  %v2837_v9 = vpop.f32.mrb[45].mxu1  ;;  %v2537_v59 = vld [vmem:[#allocation2 + $0x118] sm:$0xff] }
 0x348   : > { %2481 = vst.msk [vmem:[#allocation3 + $0x158] sm:$0xff] %vm2437_vm4, %v2416_v46  ;;  %v3174_v15 = vadd.f32 %v2837_v9, %v2530_v62  ;;  %v2553_v62 = vld [vmem:[#allocation2 + $0x198] sm:$0xff]  ;;  %v2536_v46 = vld [vmem:[#allocation2 + $0x110] sm:$0xff] }
 0x349   : > { %3239 = vst.msk [vmem:[#allocation2 + $0xe8] sm:$0xff] %vm896_vm2, %v3175_v10  ;;  %v2364_v12 = vpop.xlane.xlu1 %2363  ;;  %3222 = vst.msk [vmem:[#allocation2 + $0x60] sm:$0xff] %vm896_vm2, %v3158_v7  ;;  %v4995_v27 = vpop.f32.mrb[46].mxu0  ;;  %v2552_v10 = vld [vmem:[#allocation2 + $0x190] sm:$0xff] }
 0x34a   : > { %2480 = vst.msk [vmem:[#allocation3 + $0x150] sm:$0xff] %vm2437_vm4, %v2415_v2  ;;  %v2432_v24 = vadd.f32 %v2364_v12, %v2240_v22  ;;  %v2362_v36 = vpop.xlane.xlu0 %2361  ;;  %v3161_v44 = vadd.f32 %v4995_v27, %v2517_v11  ;;  %v5051_v56 = vpop.f32.mrb[46].mxu1  ;;  %v2538_v12 = vld [vmem:[#allocation2 + $0x120] sm:$0xff] }
 0x34b   : > { %3238 = vst.msk [vmem:[#allocation2 + $0xe0] sm:$0xff] %vm896_vm2, %v3174_v15  ;;  %v2431_v1 = vadd.f32 %v2362_v36, %v2239_v16  ;;  %v3177_v18 = vadd.f32 %v5051_v56, %v2533_v8  ;;  %v2702_v5 = vpop.f32.mrb[47].mxu0  ;;  %v2847_v21 = vpop.f32.mrb[47].mxu1  ;;  %v2539_v16 = vld [vmem:[#allocation2 + $0x128] sm:$0xff] }
 0x34c   : > { %2497 = vst.msk [vmem:[#allocation3 + $0x1d8] sm:$0xff] %vm2437_vm4, %v2432_v24  ;;  %v3160_v26 = vadd.f32 %v2702_v5, %v2516_v17  ;;  %v3176_v28 = vadd.f32 %v2847_v21, %v2532_v14  ;;  %v2555_v8 = vld [vmem:[#allocation2 + $0x1a8] sm:$0xff]  ;;  %v2554_v17 = vld [vmem:[#allocation2 + $0x1a0] sm:$0xff]  ;;  %v2557_v5 = vld [vmem:[#allocation2 + $0x1b8] sm:$0xff] }
 0x34d   : > { %3225 = vst.msk [vmem:[#allocation2 + $0x78] sm:$0xff] %vm896_vm2, %v3161_v44  ;;  %v2336_v29 = vpop.xlane.xlu1 %2335  ;;  %3241 = vst.msk [vmem:[#allocation2 + $0xf8] sm:$0xff] %vm896_vm2, %v3177_v18  ;;  %v2540_v21 = vld [vmem:[#allocation2 + $0x130] sm:$0xff] }
 0x34e   : > { %2496 = vst.msk [vmem:[#allocation3 + $0x1d0] sm:$0xff] %vm2437_vm4, %v2431_v1  ;;  %v2418_v6 = vadd.f32 %v2336_v29, %v2226_v20  ;;  %v2334_v30 = vpop.xlane.xlu0 %2333  ;;  %v2541_v20 = vld [vmem:[#allocation2 + $0x138] sm:$0xff] }
 0x34f   : > { %3224 = vst.msk [vmem:[#allocation2 + $0x70] sm:$0xff] %vm896_vm2, %v3160_v26  ;;  %3240 = vst.msk [vmem:[#allocation2 + $0xf0] sm:$0xff] %vm896_vm2, %v3176_v28  ;;  %v2417_v3 = vadd.f32 %v2334_v30, %v2225_v25  ;;  %v2556_v26 = vld [vmem:[#allocation2 + $0x1b0] sm:$0xff] }
 0x350   : > { %2483 = vst.msk [vmem:[#allocation3 + $0x168] sm:$0xff] %vm2437_vm4, %v2418_v6 }
 0x351   : > { %2482 = vst.msk [vmem:[#allocation3 + $0x160] sm:$0xff] %vm2437_vm4, %v2417_v3  ;;  %v2368_v33 = vpop.xlane.xlu1 %2367 }
 0x352   : > { %v2434_v13 = vadd.f32 %v2368_v33, %v2242_v31  ;;  %v2366_v34 = vpop.xlane.xlu0 %2365 }
 0x353   : > { %v2433_v42 = vadd.f32 %v2366_v34, %v2241_v32  ;;  %v2543_v32 = vld [vmem:[#allocation2 + $0x148] sm:$0xff]  ;;  %v2542_v34 = vld [vmem:[#allocation2 + $0x140] sm:$0xff] }
 0x354   : > { %2499 = vst.msk [vmem:[#allocation3 + $0x1e8] sm:$0xff] %vm2437_vm4, %v2434_v13  ;;  %v2559_v13 = vld [vmem:[#allocation2 + $0x1c8] sm:$0xff] }
 0x355   : > { %2498 = vst.msk [vmem:[#allocation3 + $0x1e0] sm:$0xff] %vm2437_vm4, %v2433_v42  ;;  %v2340_v38 = vpop.xlane.xlu1 %2339 }
 0x356   : > { %v2420_v39 = vadd.f32 %v2340_v38, %v2228_v37  ;;  %v2338_v40 = vpop.xlane.xlu0 %2337  ;;  %v2558_v37 = vld [vmem:[#allocation2 + $0x1c0] sm:$0xff] }
 0x357   : > { %v2419_v41 = vadd.f32 %v2338_v40, %v2227_v35 }
 0x358   : > { %2485 = vst.msk [vmem:[#allocation3 + $0x178] sm:$0xff] %vm2437_vm4, %v2420_v39 }
 0x359   : > { %2484 = vst.msk [vmem:[#allocation3 + $0x170] sm:$0xff] %vm2437_vm4, %v2419_v41  ;;  %v2372_v45 = vpop.xlane.xlu1 %2371 }
 0x35a   : > { %v2436_v47 = vadd.f32 %v2372_v45, %v2244_v43  ;;  %v2370_v48 = vpop.xlane.xlu0 %2369 }
 0x35b   : > { %v2435_v49 = vadd.f32 %v2370_v48, %v2243_v60  ;;  %v2545_v60 = vld [vmem:[#allocation2 + $0x158] sm:$0xff]  ;;  %v2544_v48 = vld [vmem:[#allocation2 + $0x150] sm:$0xff] }
 0x35c   : > { %2501 = vst.msk [vmem:[#allocation3 + $0x1f8] sm:$0xff] %vm2437_vm4, %v2436_v47  ;;  %v2561_v47 = vld [vmem:[#allocation2 + $0x1d8] sm:$0xff] }
 0x35d   : > { %2500 = vst.msk [vmem:[#allocation3 + $0x1f0] sm:$0xff] %vm2437_vm4, %v2435_v49 }
 0x365   : > { %v5086_v54 = vpop.f32.mrb[48].mxu0 }
 0x366   : > { %v3179_v50 = vadd.f32 %v5086_v54, %v2535_v52  ;;  %v5142_v55 = vpop.f32.mrb[48].mxu1  ;;  %v2922_v57 = vpop.f32.mrb[49].mxu0  ;;  %v2560_v52 = vld [vmem:[#allocation2 + $0x1d0] sm:$0xff] }
 0x367   : > { %v3195_v23 = vadd.f32 %v5142_v55, %v2551_v53  ;;  %v3178_v51 = vadd.f32 %v2922_v57, %v2534_v4  ;;  %v3067_v58 = vpop.f32.mrb[49].mxu1  ;;  %v2547_v57 = vld [vmem:[#allocation2 + $0x168] sm:$0xff] }
 0x368   : > { %3243 = vst.msk [vmem:[#allocation2 + $0x108] sm:$0xff] %vm896_vm2, %v3179_v50  ;;  %v3194_v61 = vadd.f32 %v3067_v58, %v2550_v19  ;;  %v2546_v58 = vld [vmem:[#allocation2 + $0x160] sm:$0xff] }
 0x369   : > { %3259 = vst.msk [vmem:[#allocation2 + $0x188] sm:$0xff] %vm896_vm2, %v3195_v23  ;;  %3242 = vst.msk [vmem:[#allocation2 + $0x100] sm:$0xff] %vm896_vm2, %v3178_v51  ;;  %v5089_v0 = vpop.f32.mrb[50].mxu0  ;;  %v2563_v51 = vld [vmem:[#allocation2 + $0x1e8] sm:$0xff] }
 0x36a   : > { %3258 = vst.msk [vmem:[#allocation2 + $0x180] sm:$0xff] %vm896_vm2, %v3194_v61  ;;  %v3181_v63 = vadd.f32 %v5089_v0, %v2537_v59  ;;  %v5145_v2 = vpop.f32.mrb[50].mxu1  ;;  %v2932_v22 = vpop.f32.mrb[51].mxu0  ;;  %v2562_v61 = vld [vmem:[#allocation2 + $0x1e0] sm:$0xff] }
 0x36b   : > { %v3197_v7 = vadd.f32 %v5145_v2, %v2553_v62  ;;  %v3180_v9 = vadd.f32 %v2932_v22, %v2536_v46  ;;  %v3077_v11 = vpop.f32.mrb[51].mxu1  ;;  %v2549_v22 = vld [vmem:[#allocation2 + $0x178] sm:$0xff] }
 0x36c   : > { %3245 = vst.msk [vmem:[#allocation2 + $0x118] sm:$0xff] %vm896_vm2, %v3181_v63  ;;  %v3196_v15 = vadd.f32 %v3077_v11, %v2552_v10  ;;  %v2548_v11 = vld [vmem:[#allocation2 + $0x170] sm:$0xff] }
 0x36d   : > { %3261 = vst.msk [vmem:[#allocation2 + $0x198] sm:$0xff] %vm896_vm2, %v3197_v7  ;;  %3244 = vst.msk [vmem:[#allocation2 + $0x110] sm:$0xff] %vm896_vm2, %v3180_v9  ;;  %v5092_v27 = vpop.f32.mrb[52].mxu0  ;;  %v2565_v9 = vld [vmem:[#allocation2 + $0x1f8] sm:$0xff] }
 0x36e   : > { %3260 = vst.msk [vmem:[#allocation2 + $0x190] sm:$0xff] %vm896_vm2, %v3196_v15  ;;  %v3183_v14 = vadd.f32 %v5092_v27, %v2539_v16  ;;  %v5148_v24 = vpop.f32.mrb[52].mxu1  ;;  %v2942_v36 = vpop.f32.mrb[53].mxu0  ;;  %v2564_v15 = vld [vmem:[#allocation2 + $0x1f0] sm:$0xff] }
 0x36f   : > { %v3199_v44 = vadd.f32 %v5148_v24, %v2555_v8  ;;  %v3182_v56 = vadd.f32 %v2942_v36, %v2538_v12  ;;  %v3087_v1 = vpop.f32.mrb[53].mxu1 }
 0x370   : > { %3247 = vst.msk [vmem:[#allocation2 + $0x128] sm:$0xff] %vm896_vm2, %v3183_v14  ;;  %v3198_v18 = vadd.f32 %v3087_v1, %v2554_v17 }
 0x371   : > { %3263 = vst.msk [vmem:[#allocation2 + $0x1a8] sm:$0xff] %vm896_vm2, %v3199_v44  ;;  %3246 = vst.msk [vmem:[#allocation2 + $0x120] sm:$0xff] %vm896_vm2, %v3182_v56  ;;  %v5095_v25 = vpop.f32.mrb[54].mxu0 }
 0x372   : > { %3262 = vst.msk [vmem:[#allocation2 + $0x1a0] sm:$0xff] %vm896_vm2, %v3198_v18  ;;  %v3185_v28 = vadd.f32 %v5095_v25, %v2541_v20  ;;  %v5151_v29 = vpop.f32.mrb[54].mxu1  ;;  %v2952_v6 = vpop.f32.mrb[55].mxu0 }
 0x373   : > { %v3201_v30 = vadd.f32 %v5151_v29, %v2557_v5  ;;  %v3184_v3 = vadd.f32 %v2952_v6, %v2540_v21  ;;  %v3097_v31 = vpop.f32.mrb[55].mxu1 }
 0x374   : > { %3249 = vst.msk [vmem:[#allocation2 + $0x138] sm:$0xff] %vm896_vm2, %v3185_v28  ;;  %v3200_v33 = vadd.f32 %v3097_v31, %v2556_v26 }
 0x375   : > { %3265 = vst.msk [vmem:[#allocation2 + $0x1b8] sm:$0xff] %vm896_vm2, %v3201_v30  ;;  %3248 = vst.msk [vmem:[#allocation2 + $0x130] sm:$0xff] %vm896_vm2, %v3184_v3  ;;  %v5098_v42 = vpop.f32.mrb[56].mxu0 }
 0x376   : > { %3264 = vst.msk [vmem:[#allocation2 + $0x1b0] sm:$0xff] %vm896_vm2, %v3200_v33  ;;  %v3187_v35 = vadd.f32 %v5098_v42, %v2543_v32  ;;  %v5154_v38 = vpop.f32.mrb[56].mxu1  ;;  %v2962_v39 = vpop.f32.mrb[57].mxu0 }
 0x377   : > { %v3203_v40 = vadd.f32 %v5154_v38, %v2559_v13  ;;  %v3186_v41 = vadd.f32 %v2962_v39, %v2542_v34  ;;  %v3107_v43 = vpop.f32.mrb[57].mxu1 }
 0x378   : > { %3251 = vst.msk [vmem:[#allocation2 + $0x148] sm:$0xff] %vm896_vm2, %v3187_v35  ;;  %v3202_v45 = vadd.f32 %v3107_v43, %v2558_v37 }
 0x379   : > { %3267 = vst.msk [vmem:[#allocation2 + $0x1c8] sm:$0xff] %vm896_vm2, %v3203_v40  ;;  %3250 = vst.msk [vmem:[#allocation2 + $0x140] sm:$0xff] %vm896_vm2, %v3186_v41  ;;  %v5101_v49 = vpop.f32.mrb[58].mxu0 }
 0x37a   : > { %3266 = vst.msk [vmem:[#allocation2 + $0x1c0] sm:$0xff] %vm896_vm2, %v3202_v45  ;;  %v3189_v53 = vadd.f32 %v5101_v49, %v2545_v60  ;;  %v5157_v4 = vpop.f32.mrb[58].mxu1  ;;  %v2972_v54 = vpop.f32.mrb[59].mxu0 }
 0x37b   : > { %v3205_v19 = vadd.f32 %v5157_v4, %v2561_v47  ;;  %v3188_v50 = vadd.f32 %v2972_v54, %v2544_v48  ;;  %v3117_v55 = vpop.f32.mrb[59].mxu1 }
 0x37c   : > { %3253 = vst.msk [vmem:[#allocation2 + $0x158] sm:$0xff] %vm896_vm2, %v3189_v53  ;;  %v3204_v23 = vadd.f32 %v3117_v55, %v2560_v52 }
 0x37d   : > { %3269 = vst.msk [vmem:[#allocation2 + $0x1d8] sm:$0xff] %vm896_vm2, %v3205_v19  ;;  %3252 = vst.msk [vmem:[#allocation2 + $0x150] sm:$0xff] %vm896_vm2, %v3188_v50  ;;  %v5104_v59 = vpop.f32.mrb[60].mxu0 }
 0x37e   : > { %3268 = vst.msk [vmem:[#allocation2 + $0x1d0] sm:$0xff] %vm896_vm2, %v3204_v23  ;;  %v3191_v62 = vadd.f32 %v5104_v59, %v2547_v57  ;;  %v5160_v46 = vpop.f32.mrb[60].mxu1  ;;  %v2982_v0 = vpop.f32.mrb[61].mxu0 }
 0x37f   : > { %v3207_v10 = vadd.f32 %v5160_v46, %v2563_v51  ;;  %v3190_v63 = vadd.f32 %v2982_v0, %v2546_v58  ;;  %v3127_v2 = vpop.f32.mrb[61].mxu1 }
 0x380   : > { %3255 = vst.msk [vmem:[#allocation2 + $0x168] sm:$0xff] %vm896_vm2, %v3191_v62  ;;  %v3206_v7 = vadd.f32 %v3127_v2, %v2562_v61 }
 0x381   : > { %3271 = vst.msk [vmem:[#allocation2 + $0x1e8] sm:$0xff] %vm896_vm2, %v3207_v10  ;;  %3254 = vst.msk [vmem:[#allocation2 + $0x160] sm:$0xff] %vm896_vm2, %v3190_v63  ;;  %v5107_v16 = vpop.f32.mrb[62].mxu0 }
 0x382   : > { %3270 = vst.msk [vmem:[#allocation2 + $0x1e0] sm:$0xff] %vm896_vm2, %v3206_v7  ;;  %v3193_v8 = vadd.f32 %v5107_v16, %v2549_v22  ;;  %v5163_v12 = vpop.f32.mrb[62].mxu1  ;;  %v2992_v27 = vpop.f32.mrb[63].mxu0 }
 0x383   : > { %v3209_v17 = vadd.f32 %v5163_v12, %v2565_v9  ;;  %v3192_v14 = vadd.f32 %v2992_v27, %v2548_v11  ;;  %v3137_v24 = vpop.f32.mrb[63].mxu1 }
 0x384   : > { %3257 = vst.msk [vmem:[#allocation2 + $0x178] sm:$0xff] %vm896_vm2, %v3193_v8  ;;  %v3208_v36 = vadd.f32 %v3137_v24, %v2564_v15 }
 0x385   : > { %3273 = vst.msk [vmem:[#allocation2 + $0x1f8] sm:$0xff] %vm896_vm2, %v3209_v17  ;;  %3256 = vst.msk [vmem:[#allocation2 + $0x170] sm:$0xff] %vm896_vm2, %v3192_v14 }
 0x386   : > { %3272 = vst.msk [vmem:[#allocation2 + $0x1f0] sm:$0xff] %vm896_vm2, %v3208_v36 }
 0x387 PF: > { %s7909_s26 = sld [smem:[#allocation39_spill]] }
 0x38d   : > { %p4410_p8 = scmp.ne.s32.totalorder %s7909_s26, 1 }
 0x38e   : > { %v3280_v44 = vld [vmem:[#allocation3 + $0x10] sm:$0xff] (!%p4410_p8)  ;;  %v3278_v56 = vld [vmem:[#allocation3] sm:$0xff] (!%p4410_p8)  ;;  %v3281_v1 = vld [vmem:[#allocation3 + $0x18] sm:$0xff] (!%p4410_p8)  ;;  %v6189_v20 = vmov (!%p4410_p8), 0   ;;  %vm3918_vm5 = vcmask (!%p4410_p8), 130048  }
 0x38f   : > { %3277 = sbr.rel (%p4410_p8) target bundleno = 1180 (0x49c), region = 64  ;;  %5829 = vset.pattern.permute.xlu1 (!%p4410_p8), %v6189_v20  ;;  %5828 = vset.pattern.permute.xlu0 (!%p4410_p8), %v6189_v20  ;;  %v3344_v18 = vadd.f32 (!%p4410_p8), 1e-06, %v3280_v44  ;;  %v3342_v5 = vadd.f32 (!%p4410_p8), 1e-06, %v3278_v56  ;;  %v3279_v25 = vld [vmem:[#allocation3 + $0x8] sm:$0xff] (!%p4410_p8) }
 0x390   : > { %v3345_v21 = vadd.f32 (!%p4410_p8), 1e-06, %v3281_v1  ;;  %v3283_v26 = vld [vmem:[#allocation3 + $0x28] sm:$0xff] (!%p4410_p8)  ;;  %v3343_v28 = vadd.f32 (!%p4410_p8), 1e-06, %v3279_v25  ;;  %v3282_v29 = vld [vmem:[#allocation3 + $0x20] sm:$0xff] (!%p4410_p8) }
 0x391   : > { %5830 = vrcp.f32 (!%p4410_p8), %v3344_v18  ;;  %v3347_v6 = vadd.f32 (!%p4410_p8), 1e-06, %v3283_v26  ;;  %v3346_v30 = vadd.f32 (!%p4410_p8), 1e-06, %v3282_v29  ;;  %v3285_v3 = vld [vmem:[#allocation3 + $0x38] sm:$0xff] (!%p4410_p8)  ;;  %v3284_v31 = vld [vmem:[#allocation3 + $0x30] sm:$0xff] (!%p4410_p8) }
 0x392   : > { %5832 = vrcp.f32 (!%p4410_p8), %v3342_v5  ;;  %v3349_v32 = vadd.f32 (!%p4410_p8), 1e-06, %v3285_v3  ;;  %v3348_v33 = vadd.f32 (!%p4410_p8), 1e-06, %v3284_v31  ;;  %v3287_v13 = vld [vmem:[#allocation3 + $0x48] sm:$0xff] (!%p4410_p8)  ;;  %v3286_v34 = vld [vmem:[#allocation3 + $0x40] sm:$0xff] (!%p4410_p8) }
 0x393   : > { %5834 = vrcp.f32 (!%p4410_p8), %v3345_v21  ;;  %v3351_v37 = vadd.f32 (!%p4410_p8), 1e-06, %v3287_v13  ;;  %v3350_v38 = vadd.f32 (!%p4410_p8), 1e-06, %v3286_v34  ;;  %v3289_v39 = vld [vmem:[#allocation3 + $0x58] sm:$0xff] (!%p4410_p8)  ;;  %v3288_v41 = vld [vmem:[#allocation3 + $0x50] sm:$0xff] (!%p4410_p8) }
 0x394   : > { %5836 = vrcp.f32 (!%p4410_p8), %v3343_v28  ;;  %v3353_v60 = vadd.f32 (!%p4410_p8), 1e-06, %v3289_v39  ;;  %v3352_v45 = vadd.f32 (!%p4410_p8), 1e-06, %v3288_v41  ;;  %v3291_v47 = vld [vmem:[#allocation3 + $0x68] sm:$0xff] (!%p4410_p8)  ;;  %v3290_v49 = vld [vmem:[#allocation3 + $0x60] sm:$0xff] (!%p4410_p8) }
 0x395   : > { %5838 = vrcp.f32 (!%p4410_p8), %v3347_v6  ;;  %v3355_v53 = vadd.f32 (!%p4410_p8), 1e-06, %v3291_v47  ;;  %v3354_v4 = vadd.f32 (!%p4410_p8), 1e-06, %v3290_v49  ;;  %v3293_v54 = vld [vmem:[#allocation3 + $0x78] sm:$0xff] (!%p4410_p8)  ;;  %v3292_v50 = vld [vmem:[#allocation3 + $0x70] sm:$0xff] (!%p4410_p8) }
 0x396   : > { %5840 = vrcp.f32 %v3346_v30  ;;  %v3357_v57 = vadd.f32 1e-06, %v3293_v54  ;;  %v3356_v23 = vadd.f32 1e-06, %v3292_v50  ;;  %v3295_v51 = vld [vmem:[#allocation3 + $0x88] sm:$0xff]  ;;  %v3294_v59 = vld [vmem:[#allocation3 + $0x80] sm:$0xff] }
 0x397   : > { %5842 = vrcp.f32 %v3349_v32  ;;  %v3359_v62 = vadd.f32 1e-06, %v3295_v51  ;;  %v3358_v46 = vadd.f32 1e-06, %v3294_v59  ;;  %v3297_v0 = vld [vmem:[#allocation3 + $0x98] sm:$0xff]  ;;  %v3296_v63 = vld [vmem:[#allocation3 + $0x90] sm:$0xff] }
 0x398   : > { %5844 = vrcp.f32 %v3348_v33  ;;  %v3361_v22 = vadd.f32 1e-06, %v3297_v0  ;;  %v3360_v7 = vadd.f32 1e-06, %v3296_v63  ;;  %v3299_v9 = vld [vmem:[#allocation3 + $0xa8] sm:$0xff]  ;;  %v3298_v16 = vld [vmem:[#allocation3 + $0xa0] sm:$0xff] }
 0x399   : > { %5846 = vrcp.f32 %v3351_v37  ;;  %v3363_v8 = vadd.f32 1e-06, %v3299_v9  ;;  %v3362_v12 = vadd.f32 1e-06, %v3298_v16  ;;  %v3301_v27 = vld [vmem:[#allocation3 + $0xb8] sm:$0xff]  ;;  %v3300_v14 = vld [vmem:[#allocation3 + $0xb0] sm:$0xff] }
 0x39a   : > { %5848 = vrcp.f32 %v3350_v38  ;;  %v3365_v36 = vadd.f32 1e-06, %v3301_v27  ;;  %v3364_v44 = vadd.f32 1e-06, %v3300_v14  ;;  %v3303_v56 = vld [vmem:[#allocation3 + $0xc8] sm:$0xff]  ;;  %v3302_v20 = vld [vmem:[#allocation3 + $0xc0] sm:$0xff] }
 0x39b   : > { %v5831_v42 = vpop.eup %5830  ;;  %5850 = vrcp.f32 %v3353_v60  ;;  %v3367_v5 = vadd.f32 1e-06, %v3303_v56  ;;  %v3366_v21 = vadd.f32 1e-06, %v3302_v20  ;;  %v3305_v25 = vld [vmem:[#allocation3 + $0xd8] sm:$0xff]  ;;  %v3304_v28 = vld [vmem:[#allocation3 + $0xd0] sm:$0xff] }
 0x39c   : > { %v5833_v35 = vpop.eup %5832  ;;  %3546 = vperm.xlu1 %5829, %v5831_v42   ;;  %5852 = vrcp.f32 %v3352_v45  ;;  %v3369_v6 = vadd.f32 1e-06, %v3305_v25  ;;  %v3368_v30 = vadd.f32 1e-06, %v3304_v28  ;;  %v3307_v3 = vld [vmem:[#allocation3 + $0xe8] sm:$0xff]  ;;  %v3306_v32 = vld [vmem:[#allocation3 + $0xe0] sm:$0xff] }
 0x39d   : > { %v5835_v40 = vpop.eup %5834  ;;  %3536 = vperm.xlu0 %5828, %v5833_v35   ;;  %5854 = vrcp.f32 %v3355_v53  ;;  %v3371_v13 = vadd.f32 1e-06, %v3307_v3  ;;  %v3370_v34 = vadd.f32 1e-06, %v3306_v32  ;;  %v3309_v42 = vld [vmem:[#allocation3 + $0xf8] sm:$0xff]  ;;  %v3308_v35 = vld [vmem:[#allocation3 + $0xf0] sm:$0xff] }
 0x39e   : > { %v5837_v43 = vpop.eup %5836  ;;  %5856 = vrcp.f32 %v3354_v4  ;;  %v3373_v39 = vadd.f32 1e-06, %v3309_v42  ;;  %v3311_v41 = vld [vmem:[#allocation3 + $0x108] sm:$0xff]  ;;  %v3310_v60 = vld [vmem:[#allocation3 + $0x100] sm:$0xff]  ;;  %v3313_v49 = vld [vmem:[#allocation3 + $0x118] sm:$0xff] }
 0x39f   : > { %v5839_v48 = vpop.eup %5838  ;;  %5858 = vrcp.f32 %v3357_v57  ;;  %v3375_v47 = vadd.f32 1e-06, %v3311_v41  ;;  %v3312_v53 = vld [vmem:[#allocation3 + $0x110] sm:$0xff]  ;;  %v3377_v54 = vadd.f32 1e-06, %v3313_v49  ;;  %v3315_v50 = vld [vmem:[#allocation3 + $0x128] sm:$0xff] }
 0x3a0   : > { %3551 = vperm.xlu1 %5829, %v5835_v40   ;;  %v5841_v52 = vpop.eup %5840  ;;  %5860 = vrcp.f32 %v3356_v23  ;;  %v3372_v40 = vadd.f32 1e-06, %v3308_v35  ;;  %v3314_v57 = vld [vmem:[#allocation3 + $0x120] sm:$0xff]  ;;  %v3379_v51 = vadd.f32 1e-06, %v3315_v50  ;;  %v3317_v59 = vld [vmem:[#allocation3 + $0x138] sm:$0xff] }
 0x3a1   : > { %3541 = vperm.xlu0 %5828, %v5837_v43   ;;  %v5843_v19 = vpop.eup %5842  ;;  %5862 = vrcp.f32 %v3359_v62  ;;  %v3316_v62 = vld [vmem:[#allocation3 + $0x130] sm:$0xff]  ;;  %v3381_v0 = vadd.f32 1e-06, %v3317_v59  ;;  %v3319_v63 = vld [vmem:[#allocation3 + $0x148] sm:$0xff]  ;;  %v3321_v16 = vld [vmem:[#allocation3 + $0x158] sm:$0xff] }
 0x3a2   : > { %v5845_v55 = vpop.eup %5844  ;;  %5864 = vrcp.f32 %v3358_v46  ;;  %v3383_v9 = vadd.f32 1e-06, %v3319_v63  ;;  %v3385_v27 = vadd.f32 1e-06, %v3321_v16  ;;  %v3323_v14 = vld [vmem:[#allocation3 + $0x168] sm:$0xff]  ;;  %v3325_v20 = vld [vmem:[#allocation3 + $0x178] sm:$0xff] }
 0x3a3   : > { %v5847_v58 = vpop.eup %5846  ;;  %5866 = vrcp.f32 %v3361_v22  ;;  %v3318_v22 = vld [vmem:[#allocation3 + $0x140] sm:$0xff]  ;;  %v3387_v56 = vadd.f32 1e-06, %v3323_v14  ;;  %v3389_v25 = vadd.f32 1e-06, %v3325_v20  ;;  %v3327_v28 = vld [vmem:[#allocation3 + $0x188] sm:$0xff] }
 0x3a4   : > { %3561 = vperm.xlu1 %5829, %v5839_v48   ;;  %v5849_v61 = vpop.eup %5848  ;;  %5868 = vrcp.f32 %v3360_v7  ;;  %v3374_v48 = vadd.f32 1e-06, %v3310_v60  ;;  %v3391_v3 = vadd.f32 1e-06, %v3327_v28  ;;  %v3329_v32 = vld [vmem:[#allocation3 + $0x198] sm:$0xff]  ;;  %v3331_v35 = vld [vmem:[#allocation3 + $0x1a8] sm:$0xff] }
 0x3a5   : > { %3556 = vperm.xlu0 %5828, %v5841_v52   ;;  %v5851_v10 = vpop.eup %5850  ;;  %5870 = vrcp.f32 %v3363_v8  ;;  %v3320_v8 = vld [vmem:[#allocation3 + $0x150] sm:$0xff]  ;;  %v3393_v42 = vadd.f32 1e-06, %v3329_v32  ;;  %v3395_v41 = vadd.f32 1e-06, %v3331_v35  ;;  %v3333_v60 = vld [vmem:[#allocation3 + $0x1b8] sm:$0xff] }
 0x3a6   : > { %v5853_v2 = vpop.eup %5852  ;;  %5872 = vrcp.f32 %v3362_v12  ;;  %v3397_v49 = vadd.f32 1e-06, %v3333_v60 }
 0x3a7   : > { %v5855_v11 = vpop.eup %5854  ;;  %5874 = vrcp.f32 %v3365_v36  ;;  %v3322_v36 = vld [vmem:[#allocation3 + $0x160] sm:$0xff] }
 0x3a8   : > { %3571 = vperm.xlu1 %5829, %v5843_v19   ;;  %v5857_v15 = vpop.eup %5856  ;;  %5876 = vrcp.f32 %v3364_v44  ;;  %v3376_v19 = vadd.f32 1e-06, %v3312_v53  ;;  %v3335_v53 = vld [vmem:[#allocation3 + $0x1c8] sm:$0xff] }
 0x3a9   : > { %3566 = vperm.xlu0 %5828, %v5845_v55   ;;  %v5859_v17 = vpop.eup %5858  ;;  %5878 = vrcp.f32 %v3367_v5  ;;  %v3324_v5 = vld [vmem:[#allocation3 + $0x170] sm:$0xff]  ;;  %v3399_v50 = vadd.f32 1e-06, %v3335_v53 }
 0x3aa   : > { %v5861_v24 = vpop.eup %5860  ;;  %5880 = vrcp.f32 %v3366_v21 }
 0x3ab   : > { %v5863_v1 = vpop.eup %5862  ;;  %5882 = vrcp.f32 %v3369_v6  ;;  %v3326_v6 = vld [vmem:[#allocation3 + $0x180] sm:$0xff] }
 0x3ac   : > { %3581 = vperm.xlu1 %5829, %v5847_v58   ;;  %v5865_v18 = vpop.eup %5864  ;;  %5884 = vrcp.f32 %v3368_v30  ;;  %v3378_v58 = vadd.f32 1e-06, %v3314_v57  ;;  %v3337_v57 = vld [vmem:[#allocation3 + $0x1d8] sm:$0xff] }
 0x3ad   : > { %3576 = vperm.xlu0 %5828, %v5849_v61   ;;  %v5867_v26 = vpop.eup %5866  ;;  %5886 = vrcp.f32 %v3371_v13  ;;  %v3328_v13 = vld [vmem:[#allocation3 + $0x190] sm:$0xff]  ;;  %v3401_v59 = vadd.f32 1e-06, %v3337_v57 }
 0x3ae   : > { %v5869_v29 = vpop.eup %5868  ;;  %5888 = vrcp.f32 %v3370_v34 }
 0x3af   : > { %v5871_v31 = vpop.eup %5870  ;;  %5890 = vrcp.f32 %v3373_v39  ;;  %v3330_v39 = vld [vmem:[#allocation3 + $0x1a0] sm:$0xff] }
 0x3b0   : > { %3591 = vperm.xlu1 %5829, %v5851_v10   ;;  %v5873_v33 = vpop.eup %5872  ;;  %5892 = vrcp.f32 %v3372_v40  ;;  %v3380_v10 = vadd.f32 1e-06, %v3316_v62  ;;  %v3339_v62 = vld [vmem:[#allocation3 + $0x1e8] sm:$0xff] }
 0x3b1   : > { %3586 = vperm.xlu0 %5828, %v5853_v2   ;;  %v5875_v37 = vpop.eup %5874  ;;  %5894 = vrcp.f32 %v3375_v47  ;;  %v3332_v47 = vld [vmem:[#allocation3 + $0x1b0] sm:$0xff]  ;;  %v3403_v63 = vadd.f32 1e-06, %v3339_v62 }
 0x3b2   : > { %v5877_v38 = vpop.eup %5876  ;;  %5896 = vrcp.f32 %v3374_v48 }
 0x3b3   : > { %v5879_v43 = vpop.eup %5878  ;;  %5898 = vrcp.f32 %v3377_v54  ;;  %v3334_v54 = vld [vmem:[#allocation3 + $0x1c0] sm:$0xff] }
 0x3b4   : > { %3601 = vperm.xlu1 %5829, %v5855_v11   ;;  %v5881_v45 = vpop.eup %5880  ;;  %5900 = vrcp.f32 %v3376_v19  ;;  %v3382_v11 = vadd.f32 1e-06, %v3318_v22  ;;  %v3341_v22 = vld [vmem:[#allocation3 + $0x1f8] sm:$0xff] }
 0x3b5   : > { %3596 = vperm.xlu0 %5828, %v5857_v15   ;;  %v5883_v52 = vpop.eup %5882  ;;  %5902 = vrcp.f32 %v3379_v51  ;;  %v3336_v51 = vld [vmem:[#allocation3 + $0x1d0] sm:$0xff]  ;;  %v3405_v16 = vadd.f32 1e-06, %v3341_v22 }
 0x3b6   : > { %v5885_v4 = vpop.eup %5884  ;;  %5904 = vrcp.f32 %v3378_v58 }
 0x3b7   : > { %v5887_v55 = vpop.eup %5886  ;;  %5906 = vrcp.f32 %v3381_v0  ;;  %v3338_v0 = vld [vmem:[#allocation3 + $0x1e0] sm:$0xff] }
 0x3b8   : > { %3611 = vperm.xlu1 %5829, %v5859_v17   ;;  %v5889_v23 = vpop.eup %5888  ;;  %5908 = vrcp.f32 %v3380_v10  ;;  %v3384_v17 = vadd.f32 1e-06, %v3320_v8 }
 0x3b9   : > { %3606 = vperm.xlu0 %5828, %v5861_v24   ;;  %v5891_v61 = vpop.eup %5890  ;;  %5910 = vrcp.f32 %v3383_v9  ;;  %v3340_v9 = vld [vmem:[#allocation3 + $0x1f0] sm:$0xff] }
 0x3ba   : > { %v5893_v46 = vpop.eup %5892  ;;  %5912 = vrcp.f32 %v3382_v11 }
 0x3bb   : > { %v5895_v2 = vpop.eup %5894  ;;  %5914 = vrcp.f32 %v3385_v27 }
 0x3bc   : > { %3621 = vperm.xlu1 %5829, %v5863_v1   ;;  %v5897_v7 = vpop.eup %5896  ;;  %5916 = vrcp.f32 %v3384_v17  ;;  %v3386_v1 = vadd.f32 1e-06, %v3322_v36 }
 0x3bd   : > { %3616 = vperm.xlu0 %5828, %v5865_v18   ;;  %v5899_v15 = vpop.eup %5898  ;;  %5918 = vrcp.f32 %v3387_v56  ;;  %v3472_v56 = vld [vmem:[#allocation2 + $0x10] sm:$0xff] }
 0x3be   : > { %v5901_v12 = vpop.eup %5900  ;;  %5920 = vrcp.f32 %v3386_v1  ;;  %v3470_v1 = vld [vmem:[#allocation2] sm:$0xff] }
 0x3bf   : > { %v5903_v24 = vpop.eup %5902  ;;  %5922 = vrcp.f32 %v3389_v25  ;;  %v3473_v25 = vld [vmem:[#allocation2 + $0x18] sm:$0xff] }
 0x3c0   : > { %3631 = vperm.xlu1 %5829, %v5867_v26   ;;  %v5905_v44 = vpop.eup %5904  ;;  %v3388_v26 = vadd.f32 1e-06, %v3324_v5 }
 0x3c1   : > { %3626 = vperm.xlu0 %5828, %v5869_v29   ;;  %v5907_v18 = vpop.eup %5906 }
 0x3c2   : > { %v5909_v21 = vpop.eup %5908  ;;  %5924 = vrcp.f32 %v3388_v26  ;;  %v3471_v26 = vld [vmem:[#allocation2 + $0x8] sm:$0xff] }
 0x3c3   : > { %v5911_v29 = vpop.eup %5910  ;;  %5926 = vrcp.f32 %v3391_v3  ;;  %v3475_v3 = vld [vmem:[#allocation2 + $0x28] sm:$0xff] }
 0x3c4   : > { %3641 = vperm.xlu1 %5829, %v5871_v31   ;;  %v5913_v30 = vpop.eup %5912  ;;  %v3390_v31 = vadd.f32 1e-06, %v3326_v6 }
 0x3c5   : > { %3636 = vperm.xlu0 %5828, %v5873_v33   ;;  %v5915_v33 = vpop.eup %5914 }
 0x3c6   : > { %v5917_v34 = vpop.eup %5916  ;;  %5928 = vrcp.f32 %v3390_v31  ;;  %v3474_v31 = vld [vmem:[#allocation2 + $0x20] sm:$0xff] }
 0x3c7   : > { %5930 = vrcp.f32 %v3393_v42  ;;  %v3477_v42 = vld [vmem:[#allocation2 + $0x38] sm:$0xff] }
 0x3c8   : > { %3651 = vperm.xlu1 %5829, %v5875_v37   ;;  %v3392_v37 = vadd.f32 1e-06, %v3328_v13 }
 0x3c9   : > { %3646 = vperm.xlu0 %5828, %v5877_v38   ;;  %v5919_v38 = vpop.eup %5918 }
 0x3ca   : > { %v5921_v40 = vpop.eup %5920  ;;  %5932 = vrcp.f32 %v3392_v37  ;;  %v3476_v37 = vld [vmem:[#allocation2 + $0x30] sm:$0xff] }
 0x3cb   : > { %5934 = vrcp.f32 %v3395_v41  ;;  %v3479_v41 = vld [vmem:[#allocation2 + $0x48] sm:$0xff] }
 0x3cc   : > { %3661 = vperm.xlu1 %5829, %v5879_v43   ;;  %v3394_v43 = vadd.f32 1e-06, %v3330_v39 }
 0x3cd   : > { %3656 = vperm.xlu0 %5828, %v5881_v45   ;;  %v5923_v45 = vpop.eup %5922 }
 0x3ce   : > { %v5925_v48 = vpop.eup %5924  ;;  %5936 = vrcp.f32 %v3394_v43  ;;  %v3478_v43 = vld [vmem:[#allocation2 + $0x40] sm:$0xff] }
 0x3cf   : > { %5938 = vrcp.f32 %v3397_v49  ;;  %v3481_v49 = vld [vmem:[#allocation2 + $0x58] sm:$0xff] }
 0x3d0   : > { %3671 = vperm.xlu1 %5829, %v5883_v52   ;;  %v3396_v52 = vadd.f32 1e-06, %v3332_v47 }
 0x3d1   : > { %3666 = vperm.xlu0 %5828, %v5885_v4   ;;  %v5927_v4 = vpop.eup %5926 }
 0x3d2   : > { %v5929_v19 = vpop.eup %5928  ;;  %5940 = vrcp.f32 %v3396_v52  ;;  %v3480_v52 = vld [vmem:[#allocation2 + $0x50] sm:$0xff] }
 0x3d3   : > { %5942 = vrcp.f32 %v3399_v50  ;;  %v3483_v50 = vld [vmem:[#allocation2 + $0x68] sm:$0xff] }
 0x3d4   : > { %3681 = vperm.xlu1 %5829, %v5887_v55   ;;  %v3398_v55 = vadd.f32 1e-06, %v3334_v54 }
 0x3d5   : > { %3676 = vperm.xlu0 %5828, %v5889_v23   ;;  %v5931_v23 = vpop.eup %5930 }
 0x3d6   : > { %v5933_v58 = vpop.eup %5932  ;;  %5944 = vrcp.f32 %v3398_v55  ;;  %v3482_v55 = vld [vmem:[#allocation2 + $0x60] sm:$0xff] }
 0x3d7   : > { %5946 = vrcp.f32 %v3401_v59  ;;  %v3485_v59 = vld [vmem:[#allocation2 + $0x78] sm:$0xff] }
 0x3d8   : > { %3691 = vperm.xlu1 %5829, %v5891_v61   ;;  %v3400_v61 = vadd.f32 1e-06, %v3336_v51 }
 0x3d9   : > { %3686 = vperm.xlu0 %5828, %v5893_v46   ;;  %v5935_v46 = vpop.eup %5934 }
 0x3da   : > { %v5937_v10 = vpop.eup %5936  ;;  %5948 = vrcp.f32 %v3400_v61  ;;  %v3484_v61 = vld [vmem:[#allocation2 + $0x70] sm:$0xff] }
 0x3db   : > { %5950 = vrcp.f32 %v3403_v63  ;;  %v3487_v63 = vld [vmem:[#allocation2 + $0x88] sm:$0xff] }
 0x3dc   : > { %3701 = vperm.xlu1 %5829, %v5895_v2   ;;  %v3402_v2 = vadd.f32 1e-06, %v3338_v0 }
 0x3dd   : > { %3696 = vperm.xlu0 %5828, %v5897_v7   ;;  %v5939_v7 = vpop.eup %5938 }
 0x3de   : > { %v5941_v11 = vpop.eup %5940  ;;  %5952 = vrcp.f32 %v3402_v2  ;;  %v3486_v2 = vld [vmem:[#allocation2 + $0x80] sm:$0xff] }
 0x3df   : > { %v5943_v8 = vpop.eup %5942  ;;  %5954 = vrcp.f32 %v3405_v16  ;;  %v3489_v16 = vld [vmem:[#allocation2 + $0x98] sm:$0xff] }
 0x3e0   : > { %3711 = vperm.xlu1 %5829, %v5899_v15   ;;  %v3404_v15 = vadd.f32 1e-06, %v3340_v9 }
 0x3e1   : > { %3706 = vperm.xlu0 %5828, %v5901_v12   ;;  %v5945_v12 = vpop.eup %5944 }
 0x3e2   : > { %5956 = vrcp.f32 %v3404_v15  ;;  %v5947_v27 = vpop.eup %5946  ;;  %v3488_v15 = vld [vmem:[#allocation2 + $0x90] sm:$0xff] }
 0x3e4   : > { %3721 = vperm.xlu1 %5829, %v5903_v24   ;;  %v5949_v17 = vpop.eup %5948 }
 0x3e5   : > { %3716 = vperm.xlu0 %5828, %v5905_v44   ;;  %v5951_v14 = vpop.eup %5950 }
 0x3e8   : > { %3731 = vperm.xlu1 %5829, %v5907_v18   ;;  %v5953_v24 = vpop.eup %5952 }
 0x3e9   : > { %3726 = vperm.xlu0 %5828, %v5909_v21   ;;  %v5955_v36 = vpop.eup %5954 }
 0x3ec   : > { %3741 = vperm.xlu1 %5829, %v5911_v29   ;;  %v5957_v44 = vpop.eup %5956 }
 0x3ed   : > { %3736 = vperm.xlu0 %5828, %v5913_v30  }
 0x3f0   : > { %3751 = vperm.xlu1 %5829, %v5915_v33  }
 0x3f1   : > { %3746 = vperm.xlu0 %5828, %v5917_v34  }
 0x3f4   : > { %3761 = vperm.xlu1 %5829, %v5919_v38  }
 0x3f5   : > { %3756 = vperm.xlu0 %5828, %v5921_v40  }
 0x3f8   : > { %3771 = vperm.xlu1 %5829, %v5923_v45  }
 0x3f9   : > { %3766 = vperm.xlu0 %5828, %v5925_v48  }
 0x3fc   : > { %3781 = vperm.xlu1 %5829, %v5927_v4  }
 0x3fd   : > { %3776 = vperm.xlu0 %5828, %v5929_v19  }
 0x400   : > { %3791 = vperm.xlu1 %5829, %v5931_v23  }
 0x401   : > { %3786 = vperm.xlu0 %5828, %v5933_v58  }
 0x404   : > { %3801 = vperm.xlu1 %5829, %v5935_v46  }
 0x405   : > { %3796 = vperm.xlu0 %5828, %v5937_v10  }
 0x408   : > { %3811 = vperm.xlu1 %5829, %v5939_v7  }
 0x409   : > { %3806 = vperm.xlu0 %5828, %v5941_v11  }
 0x40c   : > { %3821 = vperm.xlu1 %5829, %v5943_v8  }
 0x40d   : > { %3816 = vperm.xlu0 %5828, %v5945_v12  }
 0x410   : > { %3831 = vperm.xlu1 %5829, %v5947_v27  }
 0x411   : > { %3826 = vperm.xlu0 %5828, %v5949_v17  }
 0x414   : > { %3841 = vperm.xlu1 %5829, %v5951_v14   ;;  %v3491_v14 = vld [vmem:[#allocation2 + $0xa8] sm:$0xff] }
 0x415   : > { %3836 = vperm.xlu0 %5828, %v5953_v24   ;;  %v3490_v24 = vld [vmem:[#allocation2 + $0xa0] sm:$0xff] }
 0x418   : > { %3851 = vperm.xlu1 %5829, %v5955_v36  }
 0x419   : > { %3846 = vperm.xlu0 %5828, %v5957_v44  }
 0x41b   : > { %v3547_v20 = vpop.permute.xlu1 %3546 }
 0x41c   : > { %v3856_v18 = vmul.f32 %v3547_v20, %v3472_v56  ;;  %v3537_v5 = vpop.permute.xlu0 %3536  ;;  %v3493_v20 = vld [vmem:[#allocation2 + $0xb8] sm:$0xff] }
 0x41d   : > { %v3854_v21 = vmul.f32 %v3537_v5, %v3470_v1 }
 0x41e   : > { %3921 = vst.msk [vmem:[%s6624_s19 + $0x10] sm:$0xff] %vm3918_vm5, %v3856_v18  ;;  %v3492_v18 = vld [vmem:[#allocation2 + $0xb0] sm:$0xff] }
 0x41f   : > { %3919 = vst.msk [vmem:[%s6624_s19] sm:$0xff] %vm3918_vm5, %v3854_v21  ;;  %v3552_v28 = vpop.permute.xlu1 %3551 }
 0x420   : > { %v3857_v29 = vmul.f32 %v3552_v28, %v3473_v25  ;;  %v3542_v6 = vpop.permute.xlu0 %3541  ;;  %v3495_v28 = vld [vmem:[#allocation2 + $0xc8] sm:$0xff] }
 0x421   : > { %v3855_v30 = vmul.f32 %v3542_v6, %v3471_v26 }
 0x422   : > { %3922 = vst.msk [vmem:[%s6624_s19 + $0x18] sm:$0xff] %vm3918_vm5, %v3857_v29  ;;  %v3494_v29 = vld [vmem:[#allocation2 + $0xc0] sm:$0xff] }
 0x423   : > { %3920 = vst.msk [vmem:[%s6624_s19 + $0x8] sm:$0xff] %vm3918_vm5, %v3855_v30  ;;  %v3562_v32 = vpop.permute.xlu1 %3561 }
 0x424   : > { %v3859_v33 = vmul.f32 %v3562_v32, %v3475_v3  ;;  %v3557_v13 = vpop.permute.xlu0 %3556  ;;  %v3497_v32 = vld [vmem:[#allocation2 + $0xd8] sm:$0xff] }
 0x425   : > { %v3858_v34 = vmul.f32 %v3557_v13, %v3474_v31 }
 0x426   : > { %3924 = vst.msk [vmem:[%s6624_s19 + $0x28] sm:$0xff] %vm3918_vm5, %v3859_v33  ;;  %v3496_v33 = vld [vmem:[#allocation2 + $0xd0] sm:$0xff] }
 0x427   : > { %3923 = vst.msk [vmem:[%s6624_s19 + $0x20] sm:$0xff] %vm3918_vm5, %v3858_v34  ;;  %v3572_v35 = vpop.permute.xlu1 %3571 }
 0x428   : > { %v3861_v38 = vmul.f32 %v3572_v35, %v3477_v42  ;;  %v3567_v39 = vpop.permute.xlu0 %3566  ;;  %v3499_v35 = vld [vmem:[#allocation2 + $0xe8] sm:$0xff] }
 0x429   : > { %v3860_v40 = vmul.f32 %v3567_v39, %v3476_v37 }
 0x42a   : > { %3926 = vst.msk [vmem:[%s6624_s19 + $0x38] sm:$0xff] %vm3918_vm5, %v3861_v38  ;;  %v3498_v38 = vld [vmem:[#allocation2 + $0xe0] sm:$0xff] }
 0x42b   : > { %3925 = vst.msk [vmem:[%s6624_s19 + $0x30] sm:$0xff] %vm3918_vm5, %v3860_v40  ;;  %v3582_v60 = vpop.permute.xlu1 %3581 }
 0x42c   : > { %v3863_v45 = vmul.f32 %v3582_v60, %v3479_v41  ;;  %v3577_v47 = vpop.permute.xlu0 %3576  ;;  %v3501_v60 = vld [vmem:[#allocation2 + $0xf8] sm:$0xff] }
 0x42d   : > { %v3862_v48 = vmul.f32 %v3577_v47, %v3478_v43 }
 0x42e   : > { %3928 = vst.msk [vmem:[%s6624_s19 + $0x48] sm:$0xff] %vm3918_vm5, %v3863_v45  ;;  %v3500_v45 = vld [vmem:[#allocation2 + $0xf0] sm:$0xff] }
 0x42f   : > { %3927 = vst.msk [vmem:[%s6624_s19 + $0x40] sm:$0xff] %vm3918_vm5, %v3862_v48  ;;  %v3592_v53 = vpop.permute.xlu1 %3591 }
 0x430   : > { %v3865_v4 = vmul.f32 %v3592_v53, %v3481_v49  ;;  %v3587_v54 = vpop.permute.xlu0 %3586  ;;  %v3503_v53 = vld [vmem:[#allocation2 + $0x108] sm:$0xff] }
 0x431   : > { %v3864_v19 = vmul.f32 %v3587_v54, %v3480_v52 }
 0x432   : > { %3930 = vst.msk [vmem:[%s6624_s19 + $0x58] sm:$0xff] %vm3918_vm5, %v3865_v4  ;;  %v3502_v4 = vld [vmem:[#allocation2 + $0x100] sm:$0xff] }
 0x433   : > { %3929 = vst.msk [vmem:[%s6624_s19 + $0x50] sm:$0xff] %vm3918_vm5, %v3864_v19  ;;  %v3602_v57 = vpop.permute.xlu1 %3601 }
 0x434   : > { %v3867_v23 = vmul.f32 %v3602_v57, %v3483_v50  ;;  %v3597_v51 = vpop.permute.xlu0 %3596  ;;  %v3505_v57 = vld [vmem:[#allocation2 + $0x118] sm:$0xff] }
 0x435   : > { %v3866_v58 = vmul.f32 %v3597_v51, %v3482_v55 }
 0x436   : > { %3932 = vst.msk [vmem:[%s6624_s19 + $0x68] sm:$0xff] %vm3918_vm5, %v3867_v23  ;;  %v3504_v23 = vld [vmem:[#allocation2 + $0x110] sm:$0xff] }
 0x437   : > { %3931 = vst.msk [vmem:[%s6624_s19 + $0x60] sm:$0xff] %vm3918_vm5, %v3866_v58  ;;  %v3612_v62 = vpop.permute.xlu1 %3611 }
 0x438   : > { %v3869_v46 = vmul.f32 %v3612_v62, %v3485_v59  ;;  %v3607_v0 = vpop.permute.xlu0 %3606  ;;  %v3507_v62 = vld [vmem:[#allocation2 + $0x128] sm:$0xff] }
 0x439   : > { %v3868_v10 = vmul.f32 %v3607_v0, %v3484_v61 }
 0x43a   : > { %3934 = vst.msk [vmem:[%s6624_s19 + $0x78] sm:$0xff] %vm3918_vm5, %v3869_v46  ;;  %v3506_v46 = vld [vmem:[#allocation2 + $0x120] sm:$0xff] }
 0x43b   : > { %3933 = vst.msk [vmem:[%s6624_s19 + $0x70] sm:$0xff] %vm3918_vm5, %v3868_v10  ;;  %v3622_v22 = vpop.permute.xlu1 %3621 }
 0x43c   : > { %v3871_v7 = vmul.f32 %v3622_v22, %v3487_v63  ;;  %v3617_v9 = vpop.permute.xlu0 %3616  ;;  %v3509_v22 = vld [vmem:[#allocation2 + $0x138] sm:$0xff] }
 0x43d   : > { %v3870_v11 = vmul.f32 %v3617_v9, %v3486_v2 }
 0x43e   : > { %3936 = vst.msk [vmem:[%s6624_s19 + $0x88] sm:$0xff] %vm3918_vm5, %v3871_v7  ;;  %v3508_v7 = vld [vmem:[#allocation2 + $0x130] sm:$0xff] }
 0x43f   : > { %3935 = vst.msk [vmem:[%s6624_s19 + $0x80] sm:$0xff] %vm3918_vm5, %v3870_v11  ;;  %v3632_v8 = vpop.permute.xlu1 %3631 }
 0x440   : > { %v3873_v12 = vmul.f32 %v3632_v8, %v3489_v16  ;;  %v3627_v27 = vpop.permute.xlu0 %3626  ;;  %v3511_v8 = vld [vmem:[#allocation2 + $0x148] sm:$0xff] }
 0x441   : > { %v3872_v17 = vmul.f32 %v3627_v27, %v3488_v15 }
 0x442   : > { %3938 = vst.msk [vmem:[%s6624_s19 + $0x98] sm:$0xff] %vm3918_vm5, %v3873_v12  ;;  %v3510_v12 = vld [vmem:[#allocation2 + $0x140] sm:$0xff] }
 0x443   : > { %3937 = vst.msk [vmem:[%s6624_s19 + $0x90] sm:$0xff] %vm3918_vm5, %v3872_v17  ;;  %v3642_v36 = vpop.permute.xlu1 %3641 }
 0x444   : > { %v3875_v44 = vmul.f32 %v3642_v36, %v3491_v14  ;;  %v3637_v56 = vpop.permute.xlu0 %3636  ;;  %v3513_v36 = vld [vmem:[#allocation2 + $0x158] sm:$0xff] }
 0x445   : > { %v3874_v1 = vmul.f32 %v3637_v56, %v3490_v24 }
 0x446   : > { %3940 = vst.msk [vmem:[%s6624_s19 + $0xa8] sm:$0xff] %vm3918_vm5, %v3875_v44  ;;  %v3512_v44 = vld [vmem:[#allocation2 + $0x150] sm:$0xff] }
 0x447   : > { %3939 = vst.msk [vmem:[%s6624_s19 + $0xa0] sm:$0xff] %vm3918_vm5, %v3874_v1  ;;  %v3652_v5 = vpop.permute.xlu1 %3651 }
 0x448   : > { %v3877_v21 = vmul.f32 %v3652_v5, %v3493_v20  ;;  %v3647_v25 = vpop.permute.xlu0 %3646  ;;  %v3515_v5 = vld [vmem:[#allocation2 + $0x168] sm:$0xff] }
 0x449   : > { %v3876_v26 = vmul.f32 %v3647_v25, %v3492_v18 }
 0x44a   : > { %3942 = vst.msk [vmem:[%s6624_s19 + $0xb8] sm:$0xff] %vm3918_vm5, %v3877_v21  ;;  %v3514_v21 = vld [vmem:[#allocation2 + $0x160] sm:$0xff] }
 0x44b   : > { %3941 = vst.msk [vmem:[%s6624_s19 + $0xb0] sm:$0xff] %vm3918_vm5, %v3876_v26  ;;  %v3662_v6 = vpop.permute.xlu1 %3661 }
 0x44c   : > { %v3879_v30 = vmul.f32 %v3662_v6, %v3495_v28  ;;  %v3657_v3 = vpop.permute.xlu0 %3656  ;;  %v3517_v6 = vld [vmem:[#allocation2 + $0x178] sm:$0xff] }
 0x44d   : > { %v3878_v31 = vmul.f32 %v3657_v3, %v3494_v29 }
 0x44e   : > { %3944 = vst.msk [vmem:[%s6624_s19 + $0xc8] sm:$0xff] %vm3918_vm5, %v3879_v30  ;;  %v3516_v30 = vld [vmem:[#allocation2 + $0x170] sm:$0xff] }
 0x44f   : > { %3943 = vst.msk [vmem:[%s6624_s19 + $0xc0] sm:$0xff] %vm3918_vm5, %v3878_v31  ;;  %v3672_v13 = vpop.permute.xlu1 %3671 }
 0x450   : > { %v3881_v34 = vmul.f32 %v3672_v13, %v3497_v32  ;;  %v3667_v42 = vpop.permute.xlu0 %3666  ;;  %v3519_v13 = vld [vmem:[#allocation2 + $0x188] sm:$0xff] }
 0x451   : > { %v3880_v37 = vmul.f32 %v3667_v42, %v3496_v33 }
 0x452   : > { %3946 = vst.msk [vmem:[%s6624_s19 + $0xd8] sm:$0xff] %vm3918_vm5, %v3881_v34  ;;  %v3518_v34 = vld [vmem:[#allocation2 + $0x180] sm:$0xff] }
 0x453   : > { %3945 = vst.msk [vmem:[%s6624_s19 + $0xd0] sm:$0xff] %vm3918_vm5, %v3880_v37  ;;  %v3682_v39 = vpop.permute.xlu1 %3681 }
 0x454   : > { %v3883_v40 = vmul.f32 %v3682_v39, %v3499_v35  ;;  %v3677_v41 = vpop.permute.xlu0 %3676  ;;  %v3521_v39 = vld [vmem:[#allocation2 + $0x198] sm:$0xff] }
 0x455   : > { %v3882_v43 = vmul.f32 %v3677_v41, %v3498_v38 }
 0x456   : > { %3948 = vst.msk [vmem:[%s6624_s19 + $0xe8] sm:$0xff] %vm3918_vm5, %v3883_v40  ;;  %v3520_v40 = vld [vmem:[#allocation2 + $0x190] sm:$0xff] }
 0x457   : > { %3947 = vst.msk [vmem:[%s6624_s19 + $0xe0] sm:$0xff] %vm3918_vm5, %v3882_v43  ;;  %v3692_v47 = vpop.permute.xlu1 %3691 }
 0x458   : > { %v3885_v48 = vmul.f32 %v3692_v47, %v3501_v60  ;;  %v3687_v49 = vpop.permute.xlu0 %3686  ;;  %v3523_v47 = vld [vmem:[#allocation2 + $0x1a8] sm:$0xff] }
 0x459   : > { %v3884_v52 = vmul.f32 %v3687_v49, %v3500_v45 }
 0x45a   : > { %3950 = vst.msk [vmem:[%s6624_s19 + $0xf8] sm:$0xff] %vm3918_vm5, %v3885_v48  ;;  %v3522_v48 = vld [vmem:[#allocation2 + $0x1a0] sm:$0xff] }
 0x45b   : > { %3949 = vst.msk [vmem:[%s6624_s19 + $0xf0] sm:$0xff] %vm3918_vm5, %v3884_v52  ;;  %v3702_v54 = vpop.permute.xlu1 %3701 }
 0x45c   : > { %v3887_v19 = vmul.f32 %v3702_v54, %v3503_v53  ;;  %v3697_v50 = vpop.permute.xlu0 %3696  ;;  %v3525_v54 = vld [vmem:[#allocation2 + $0x1b8] sm:$0xff] }
 0x45d   : > { %v3886_v55 = vmul.f32 %v3697_v50, %v3502_v4 }
 0x45e   : > { %3952 = vst.msk [vmem:[%s6624_s19 + $0x108] sm:$0xff] %vm3918_vm5, %v3887_v19  ;;  %v3524_v19 = vld [vmem:[#allocation2 + $0x1b0] sm:$0xff] }
 0x45f   : > { %3951 = vst.msk [vmem:[%s6624_s19 + $0x100] sm:$0xff] %vm3918_vm5, %v3886_v55  ;;  %v3712_v51 = vpop.permute.xlu1 %3711 }
 0x460   : > { %v3889_v58 = vmul.f32 %v3712_v51, %v3505_v57  ;;  %v3707_v59 = vpop.permute.xlu0 %3706  ;;  %v3527_v51 = vld [vmem:[#allocation2 + $0x1c8] sm:$0xff] }
 0x461   : > { %v3888_v61 = vmul.f32 %v3707_v59, %v3504_v23 }
 0x462   : > { %3954 = vst.msk [vmem:[%s6624_s19 + $0x118] sm:$0xff] %vm3918_vm5, %v3889_v58  ;;  %v3526_v58 = vld [vmem:[#allocation2 + $0x1c0] sm:$0xff] }
 0x463   : > { %3953 = vst.msk [vmem:[%s6624_s19 + $0x110] sm:$0xff] %vm3918_vm5, %v3888_v61  ;;  %v3722_v0 = vpop.permute.xlu1 %3721 }
 0x464   : > { %v3891_v10 = vmul.f32 %v3722_v0, %v3507_v62  ;;  %v3717_v63 = vpop.permute.xlu0 %3716  ;;  %v3529_v0 = vld [vmem:[#allocation2 + $0x1d8] sm:$0xff] }
 0x465   : > { %v3890_v2 = vmul.f32 %v3717_v63, %v3506_v46 }
 0x466   : > { %3956 = vst.msk [vmem:[%s6624_s19 + $0x128] sm:$0xff] %vm3918_vm5, %v3891_v10  ;;  %v3528_v10 = vld [vmem:[#allocation2 + $0x1d0] sm:$0xff] }
 0x467   : > { %3955 = vst.msk [vmem:[%s6624_s19 + $0x120] sm:$0xff] %vm3918_vm5, %v3890_v2  ;;  %v3732_v9 = vpop.permute.xlu1 %3731 }
 0x468   : > { %v3893_v11 = vmul.f32 %v3732_v9, %v3509_v22  ;;  %v3727_v16 = vpop.permute.xlu0 %3726  ;;  %v3531_v9 = vld [vmem:[#allocation2 + $0x1e8] sm:$0xff] }
 0x469   : > { %v3892_v15 = vmul.f32 %v3727_v16, %v3508_v7 }
 0x46a   : > { %3958 = vst.msk [vmem:[%s6624_s19 + $0x138] sm:$0xff] %vm3918_vm5, %v3893_v11  ;;  %v3530_v11 = vld [vmem:[#allocation2 + $0x1e0] sm:$0xff] }
 0x46b   : > { %3957 = vst.msk [vmem:[%s6624_s19 + $0x130] sm:$0xff] %vm3918_vm5, %v3892_v15  ;;  %v3742_v27 = vpop.permute.xlu1 %3741 }
 0x46c   : > { %v3895_v17 = vmul.f32 %v3742_v27, %v3511_v8  ;;  %v3737_v14 = vpop.permute.xlu0 %3736  ;;  %v3533_v27 = vld [vmem:[#allocation2 + $0x1f8] sm:$0xff] }
 0x46d   : > { %v3894_v24 = vmul.f32 %v3737_v14, %v3510_v12 }
 0x46e   : > { %3960 = vst.msk [vmem:[%s6624_s19 + $0x148] sm:$0xff] %vm3918_vm5, %v3895_v17  ;;  %v3532_v17 = vld [vmem:[#allocation2 + $0x1f0] sm:$0xff] }
 0x46f   : > { %3959 = vst.msk [vmem:[%s6624_s19 + $0x140] sm:$0xff] %vm3918_vm5, %v3894_v24  ;;  %v3752_v56 = vpop.permute.xlu1 %3751 }
 0x470   : > { %v3897_v1 = vmul.f32 %v3752_v56, %v3513_v36  ;;  %v3747_v20 = vpop.permute.xlu0 %3746 }
 0x471   : > { %v3896_v18 = vmul.f32 %v3747_v20, %v3512_v44 }
 0x472   : > { %3962 = vst.msk [vmem:[%s6624_s19 + $0x158] sm:$0xff] %vm3918_vm5, %v3897_v1 }
 0x473   : > { %3961 = vst.msk [vmem:[%s6624_s19 + $0x150] sm:$0xff] %vm3918_vm5, %v3896_v18  ;;  %v3762_v25 = vpop.permute.xlu1 %3761 }
 0x474   : > { %v3899_v26 = vmul.f32 %v3762_v25, %v3515_v5  ;;  %v3757_v28 = vpop.permute.xlu0 %3756 }
 0x475   : > { %v3898_v29 = vmul.f32 %v3757_v28, %v3514_v21 }
 0x476   : > { %3964 = vst.msk [vmem:[%s6624_s19 + $0x168] sm:$0xff] %vm3918_vm5, %v3899_v26 }
 0x477   : > { %3963 = vst.msk [vmem:[%s6624_s19 + $0x160] sm:$0xff] %vm3918_vm5, %v3898_v29  ;;  %v3772_v3 = vpop.permute.xlu1 %3771 }
 0x478   : > { %v3901_v31 = vmul.f32 %v3772_v3, %v3517_v6  ;;  %v3767_v32 = vpop.permute.xlu0 %3766 }
 0x479   : > { %v3900_v33 = vmul.f32 %v3767_v32, %v3516_v30 }
 0x47a   : > { %3966 = vst.msk [vmem:[%s6624_s19 + $0x178] sm:$0xff] %vm3918_vm5, %v3901_v31 }
 0x47b   : > { %3965 = vst.msk [vmem:[%s6624_s19 + $0x170] sm:$0xff] %vm3918_vm5, %v3900_v33  ;;  %v3782_v42 = vpop.permute.xlu1 %3781 }
 0x47c   : > { %v3903_v37 = vmul.f32 %v3782_v42, %v3519_v13  ;;  %v3777_v35 = vpop.permute.xlu0 %3776 }
 0x47d   : > { %v3902_v38 = vmul.f32 %v3777_v35, %v3518_v34 }
 0x47e   : > { %3968 = vst.msk [vmem:[%s6624_s19 + $0x188] sm:$0xff] %vm3918_vm5, %v3903_v37 }
 0x47f   : > { %3967 = vst.msk [vmem:[%s6624_s19 + $0x180] sm:$0xff] %vm3918_vm5, %v3902_v38  ;;  %v3792_v41 = vpop.permute.xlu1 %3791 }
 0x480   : > { %v3905_v43 = vmul.f32 %v3792_v41, %v3521_v39  ;;  %v3787_v60 = vpop.permute.xlu0 %3786 }
 0x481   : > { %v3904_v45 = vmul.f32 %v3787_v60, %v3520_v40 }
 0x482   : > { %3970 = vst.msk [vmem:[%s6624_s19 + $0x198] sm:$0xff] %vm3918_vm5, %v3905_v43 }
 0x483   : > { %3969 = vst.msk [vmem:[%s6624_s19 + $0x190] sm:$0xff] %vm3918_vm5, %v3904_v45  ;;  %v3802_v49 = vpop.permute.xlu1 %3801 }
 0x484   : > { %v3907_v52 = vmul.f32 %v3802_v49, %v3523_v47  ;;  %v3797_v53 = vpop.permute.xlu0 %3796 }
 0x485   : > { %v3906_v4 = vmul.f32 %v3797_v53, %v3522_v48 }
 0x486   : > { %3972 = vst.msk [vmem:[%s6624_s19 + $0x1a8] sm:$0xff] %vm3918_vm5, %v3907_v52 }
 0x487   : > { %3971 = vst.msk [vmem:[%s6624_s19 + $0x1a0] sm:$0xff] %vm3918_vm5, %v3906_v4  ;;  %v3812_v50 = vpop.permute.xlu1 %3811 }
 0x488   : > { %v3909_v55 = vmul.f32 %v3812_v50, %v3525_v54  ;;  %v3807_v57 = vpop.permute.xlu0 %3806 }
 0x489   : > { %v3908_v23 = vmul.f32 %v3807_v57, %v3524_v19 }
 0x48a   : > { %3974 = vst.msk [vmem:[%s6624_s19 + $0x1b8] sm:$0xff] %vm3918_vm5, %v3909_v55 }
 0x48b   : > { %3973 = vst.msk [vmem:[%s6624_s19 + $0x1b0] sm:$0xff] %vm3918_vm5, %v3908_v23  ;;  %v3822_v59 = vpop.permute.xlu1 %3821 }
 0x48c   : > { %v3911_v61 = vmul.f32 %v3822_v59, %v3527_v51  ;;  %v3817_v62 = vpop.permute.xlu0 %3816 }
 0x48d   : > { %v3910_v46 = vmul.f32 %v3817_v62, %v3526_v58 }
 0x48e   : > { %3976 = vst.msk [vmem:[%s6624_s19 + $0x1c8] sm:$0xff] %vm3918_vm5, %v3911_v61 }
 0x48f   : > { %3975 = vst.msk [vmem:[%s6624_s19 + $0x1c0] sm:$0xff] %vm3918_vm5, %v3910_v46  ;;  %v3832_v63 = vpop.permute.xlu1 %3831 }
 0x490   : > { %v3913_v2 = vmul.f32 %v3832_v63, %v3529_v0  ;;  %v3827_v22 = vpop.permute.xlu0 %3826 }
 0x491   : > { %v3912_v7 = vmul.f32 %v3827_v22, %v3528_v10 }
 0x492   : > { %3978 = vst.msk [vmem:[%s6624_s19 + $0x1d8] sm:$0xff] %vm3918_vm5, %v3913_v2 }
 0x493   : > { %3977 = vst.msk [vmem:[%s6624_s19 + $0x1d0] sm:$0xff] %vm3918_vm5, %v3912_v7  ;;  %v3842_v16 = vpop.permute.xlu1 %3841 }
 0x494   : > { %v3915_v15 = vmul.f32 %v3842_v16, %v3531_v9  ;;  %v3837_v8 = vpop.permute.xlu0 %3836 }
 0x495   : > { %v3914_v12 = vmul.f32 %v3837_v8, %v3530_v11 }
 0x496   : > { %3980 = vst.msk [vmem:[%s6624_s19 + $0x1e8] sm:$0xff] %vm3918_vm5, %v3915_v15 }
 0x497   : > { %3979 = vst.msk [vmem:[%s6624_s19 + $0x1e0] sm:$0xff] %vm3918_vm5, %v3914_v12  ;;  %v3852_v14 = vpop.permute.xlu1 %3851 }
 0x498   : > { %v3917_v24 = vmul.f32 %v3852_v14, %v3533_v27  ;;  %v3847_v36 = vpop.permute.xlu0 %3846 }
 0x499   : > { %v3916_v44 = vmul.f32 %v3847_v36, %v3532_v17 }
 0x49a   : > { %3982 = vst.msk [vmem:[%s6624_s19 + $0x1f8] sm:$0xff] %vm3918_vm5, %v3917_v24 }
 0x49b   : > { %3981 = vst.msk [vmem:[%s6624_s19 + $0x1f0] sm:$0xff] %vm3918_vm5, %v3916_v44 }
 0x49c PF: > { %s3984_s13 = scalar_lea.sflag [#allocation9], %s6592_s6 }
 0x49d   : > { %s7910_s5 = sld [smem:[#allocation40_spill]]  ;;  %s4013_s2 = sshll.u32 %s6624_s19, 4  ;;  %s4014_s2 = int_to_ptr.vmem [resolvable:$true] %s4013_s2 }
 0x49e   : > { %s7911_s21 = sld [smem:[#allocation56_spill]]  ;;  %s6190_s1 = smov 2048  }
 0x49f   : > { %p7912_p12 = scmp.ne.s32.totalorder %s7889_s12, 0  ;;  %s6191_s6 = smov 4096  }
 0x4a0   : > { %s6192_s0 = smov 16   ;;  %s6193_s8 = smov 128  }
 0x4a1   : > { %5519 = sst [smem:[#allocation23]] (%p7912_p12), %s6190_s1  ;;  %s6194_s24 = smov 8  }
 0x4a2   : > { %5520 = sst [smem:[#allocation23 + $0x1]] (%p7912_p12), %s6191_s6  ;;  %s6195_s9 = smov [#allocation22]  }
 0x4a3   : > { %s4420_s10 = sshll.u32 %s7910_s5, 11  ;;  %5521 = sst [smem:[#allocation23 + $0x2]] (%p7912_p12), %s6192_s0 }
 0x4a4   : > { %s3996_s15 = scalar_lea.hbm %s7911_s21, %s4420_s10  ;;  %5522 = sst [smem:[#allocation23 + $0x3]] (%p7912_p12), %s6193_s8 }
 0x4a5   : > { %5523 = sst [smem:[#allocation23 + $0x4]] (%p7912_p12), %s6193_s8  ;;  %s6196_s3 = smov 0  }
 0x4a6   : > { %5524 = sst [smem:[#allocation23 + $0x5]] (%p7912_p12), %s6194_s24 }
 0x4a7   : > { %5525 = dma.general (%p7912_p12), %s4014_s2, 8192, %s3996_s15, %s3984_s13, %s6195_s9, [#allocation23], %s6196_s3, 0  }
 0x4a8 PF: > { %s7913_s19 = sld [smem:[#allocation37_spill]]  ;;  %s7914_s28 = sld [smem:[#allocation51_spill]] }
 0x4a9   : > { %p5531_p9 = scmp.ge.s32.totalorder %s6162_s7, 2 }
 0x4ae   : > { %s4041_s16 = sand.u32 1, %s7913_s19   ;;  %p7915_p13 = scmp.ne.s32.totalorder %s7914_s28, 0 }
 0x4af   : > { %s4042_s4 = scalar_lea.sflag [#allocation9], %s4041_s16 }
 0x4b0   : > { %p5528_p4 = pnand %p5531_p9, %p7915_p13 }
 0x4b2   : > { %6093 = dma.done.wait (!%p5528_p4), %s4042_s4, 8192  }
 0x4b3   : > { %6095 = vsyncadd (!%p5528_p4), %s4042_s4, 4294959104  ;;  %s34_s7 = sadd.s32 1, %s6162_s7   ;;  %s7917_s12 = sld [smem:[#allocation50_spill]] }
 0x4b4   : > { %p7776_p11 = scmp.ge.s32.totalorder %s34_s7, 6   ;;  %s7918_s19 = sld [smem:[#allocation36_spill]] }
 0x4b5   : > { %s7919_s26 = sld [smem:[#allocation49_spill]]  ;;  %s7920_s13 = sld [smem:[#allocation48_spill]] }
 0x4b6   : > { %s7921_s5 = sld [smem:[#allocation38_spill]]  ;;  %s7922_s10 = sld [smem:[#allocation45_spill]] }
 0x4b7   : > { %s7923_s2 = sld [smem:[#allocation41_spill]]  ;;  %s7924_s29 = sld [smem:[#allocation42_spill]] }
 0x4b8   : > { %s7925_s14 = sld [smem:[#allocation43_spill]]  ;;  %s7926_s0 = smov %s6102_s17 }
 0x4b9   : > { %s7927_s17 = smov %s6106_s18  ;;  %s7929_s18 = smov %s7917_s12 }
 0x4ba   : > { %s7930_s1 = smov %s6118_s20  ;;  %s7932_s21 = smov %s6126_s22 }
 0x4bb   : > { %s7931_s20 = smov %s7919_s26  ;;  %s7933_s22 = smov %s6130_s23 }
 0x4bc   : > { %s7934_s23 = smov %s7920_s13  ;;  %s7935_s24 = smov %s6138_s25 }
 0x4bd   : > { %s7936_s25 = smov %s7921_s5  ;;  %s7937_s26 = smov %s7922_s10 }
 0x4be   : > { %s7938_s27 = smov %s7923_s2  ;;  %s7939_s28 = smov %s6158_s30 }
 0x4bf   : > { %s7940_s30 = smov %s7925_s14  ;;  %33 = sbr.rel (!%p7776_p11) target bundleno = 36 (0x24), region = 150 }
 0x4c6   :  { %4047 = vsyncpa [#allocation8], 1 }
 0x4c7   :  { %4049 = vsyncpa [#allocation8 + $0x1], 1 }
 0x4c8   :  { %4050 = vsyncpa [#allocation11], 1 }
 0x4c9   :  { %4052 = vsyncpa [#allocation11 + $0x1], 1 }
 0x4ca   :  { %4053 = vsyncpa [#allocation14], 1 }
 0x4cb   :  { %4055 = vsyncpa [#allocation14 + $0x1], 1 }
 0x4cc   :  { %4056 = vsyncpa [#allocation9], 1 }
 0x4cd   :  { %4058 = vsyncpa [#allocation9 + $0x1], 1 }

</bundles_post_ra>
